<compile_context>
chip_gen: v5e
topology: v5e:2x2
jax: 0.10.0
libtpu: 0.0.40
codegen_flags: <defaults>
</compile_context>

<pallas_src>
import numpy as np
import jax
import jax.numpy as jnp
from jax.experimental import pallas as pl
from jax.experimental.pallas import tpu as pltpu


KSIZE = 7
CENTER = (KSIZE - 1) // 2
C1_OUT = 256        # conv1 out channels (already a multiple of 128)
C2_OUT_P = 128      # conv2 out channels padded 96 -> 128 (lane-dense)
C3_OUT_P = 128      # conv3 out channels padded 32 -> 128 (lane-dense)
FC1_IN_P = 128      # fc1 input padded 32 -> 128 (matches padded pooled vector)


# ------------------------------------------------------------------
# Host-side constants
# ------------------------------------------------------------------
def _tap_masks(batch, seq, ksize):
    """mask[k, b*T + t, 0] = 1 iff source index t + (k - center) lies inside [0, T)."""
    pad = (ksize - 1) // 2
    m = np.zeros((ksize, batch * seq, 1), np.float32)
    for k in range(ksize):
        d = k - pad
        for b in range(batch):
            for t in range(seq):
                if 0 <= t + d < seq:
                    m[k, b * seq + t, 0] = 1.0
    return jnp.asarray(m)


def _pool_matrix(batch, seq):
    """P @ act_flat computes the per-example mean over time (AdaptiveAvgPool1d(1))."""
    p = np.zeros((batch, batch * seq), np.float32)
    for b in range(batch):
        p[b, b * seq:(b + 1) * seq] = 1.0 / seq
    return jnp.asarray(p)


# ------------------------------------------------------------------
# Fused kernel
# ------------------------------------------------------------------
def _cnn_classifier_kernel(
    x_ref, mask_ref, pool_ref,
    w1_ref, b1_ref, w2_hbm, b2_ref, w3_hbm, b3_ref,
    fw1_ref, fb1_ref, fw2_ref, fb2_ref, fw3_ref, fb3_ref,
    out_ref,
    col_ref, w2_vmem, w3_vmem, dma_sem,
):
    bt = x_ref.shape[0]

    # Prefetch the two large conv weights: HBM->VMEM DMA overlaps conv1 compute.
    cp_w2 = pltpu.make_async_copy(w2_hbm, w2_vmem, dma_sem.at[0])
    cp_w3 = pltpu.make_async_copy(w3_hbm, w3_vmem, dma_sem.at[1])
    cp_w2.start()
    cp_w3.start()

    def shifted(act, k):
        # Tap k reads x[t + (k - CENTER)]: XLU sublane roll + VPU boundary mask
        # (zero for out-of-sequence / cross-example rows) instead of a shift matmul.
        d = k - CENTER
        if d == 0:
            return act
        rolled = pltpu.roll(act, shift=(-d) % bt, axis=0)
        return rolled * mask_ref[k]

    # ---- conv1 + ReLU: Cin=8 is far below a lane tile, keep 7 tiny per-tap matmuls ----
    x = x_ref[...]
    acc = None
    for k in range(KSIZE):
        contrib = jnp.dot(shifted(x, k).astype(jnp.bfloat16), w1_ref[k],
                          preferred_element_type=jnp.float32)
        acc = contrib if acc is None else acc + contrib
    act = jnp.maximum(acc + b1_ref[...], 0.0)                      # (B*T, 256) f32

    # ---- conv2 / conv3 + ReLU: one long-K matmul per layer over a bf16 im2col scratch ----
    def conv_fused(act, w_ref, b_ref):
        c = act.shape[1]                                           # 256 or 128 (lane aligned)
        for k in range(KSIZE):
            col_ref[:, k * c:(k + 1) * c] = shifted(act, k).astype(jnp.bfloat16)
        y = jnp.dot(col_ref[:, :KSIZE * c], w_ref[...],
                    preferred_element_type=jnp.float32)
        return jnp.maximum(y + b_ref[...], 0.0)

    cp_w2.wait()
    act = conv_fused(act, w2_vmem, b2_ref)                         # (B*T, 128); cols 96.. are 0
    cp_w3.wait()
    act = conv_fused(act, w3_vmem, b3_ref)                         # (B*T, 128); cols 32.. are 0

    # ---- global average pool + MLP head (tiny; kept in f32) ----
    pooled = jnp.dot(pool_ref[...], act, preferred_element_type=jnp.float32)          # (B, 128)
    h = jnp.maximum(jnp.dot(pooled, fw1_ref[...],
                            preferred_element_type=jnp.float32) + fb1_ref[...], 0.0)  # (B, 64)
    h = jnp.maximum(jnp.dot(h, fw2_ref[...],
                            preferred_element_type=jnp.float32) + fb2_ref[...], 0.0)  # (B, 128)
    logits = jnp.sum(h * fw3_ref[...], axis=1, keepdims=True) + fb3_ref[...]          # (B, 1)
    out_ref[...] = jax.nn.sigmoid(logits).astype(out_ref.dtype)


@jax.jit
def cnn_classifier_forward(x, kparams, masks, pool):
    """x: (B, T, C_in) batch-first (the PyTorch module permutes to (B, C, T) for Conv1d)."""
    b, t, c = x.shape
    x2d = x.reshape(b * t, c).astype(jnp.float32)                  # rows ordered (b, t)

    (w1, b1, w2, b2, w3, b3, f1, g1, f2, g2, f3, g3) = kparams

    vmem = pl.BlockSpec(memory_space=pltpu.MemorySpace.VMEM)
    hbm = pl.BlockSpec(memory_space=pl.ANY)

    return pl.pallas_call(
        _cnn_classifier_kernel,
        out_shape=jax.ShapeDtypeStruct((b, 1), jnp.float32),
        in_specs=[vmem, vmem, vmem,            # x, masks, pool
                  vmem, vmem,                  # w1 (small), b1
                  hbm, vmem,                   # w2 stays in HBM (prefetched in-kernel), b2
                  hbm, vmem,                   # w3 stays in HBM (prefetched in-kernel), b3
                  vmem, vmem, vmem, vmem, vmem, vmem],   # fc params
        out_specs=vmem,
        scratch_shapes=[
            pltpu.VMEM((b * t, KSIZE * C1_OUT), jnp.bfloat16),     # im2col scratch (conv2/conv3)
            pltpu.VMEM(w2.shape, jnp.bfloat16),                    # prefetched conv2 weight
            pltpu.VMEM(w3.shape, jnp.bfloat16),                    # prefetched conv3 weight
            pltpu.SemaphoreType.DMA((2,)),
        ],
    )(x2d, masks, pool, w1, b1, w2, b2, w3, b3, f1, g1, f2, g2, f3, g3)


# ------------------------------------------------------------------
# Parameter init (PyTorch-like uniform(-1/sqrt(fan_in), 1/sqrt(fan_in)))
# ------------------------------------------------------------------
def init_params(key, c_in, ksize=KSIZE):
    keys = iter(jax.random.split(key, 12))

    def unif(k, shape, fan_in):
        bound = 1.0 / np.sqrt(fan_in)
        return jax.random.uniform(k, shape, jnp.float32, -bound, bound)

    def conv(c_i, c_o):
        fan = c_i * ksize
        return unif(next(keys), (c_o, c_i, ksize), fan), unif(next(keys), (c_o,), fan)

    def lin(d_i, d_o):
        return unif(next(keys), (d_o, d_i), d_i), unif(next(keys), (d_o,), d_i)

    return (conv(c_in, 256), conv(256, 96), conv(96, 32),
            lin(32, 64), lin(64, 128), lin(128, 1))


def to_kernel_params(torch_params):
    (cw1, cb1), (cw2, cb2), (cw3, cb3), (fw1, fb1), (fw2, fb2), (fw3, fb3) = torch_params

    # conv1: per-tap (K, Cin, Cout) bf16; bias (1, Cout) f32
    w1 = jnp.transpose(cw1, (2, 1, 0)).astype(jnp.bfloat16)                   # (7, 8, 256)
    b1 = cb1.reshape(1, -1).astype(jnp.float32)

    def fused_conv(w, b, cin_pad, cout_pad):
        cout, cin, k = w.shape
        wt = jnp.transpose(w, (2, 1, 0))                                      # (K, Cin, Cout)
        wt = jnp.pad(wt, ((0, 0), (0, cin_pad - cin), (0, cout_pad - cout)))
        wf = wt.reshape(k * cin_pad, cout_pad).astype(jnp.bfloat16)           # (K*Cin_pad, Cout_pad)
        bf = jnp.pad(b, (0, cout_pad - cout)).reshape(1, -1).astype(jnp.float32)
        return wf, bf

    w2, b2 = fused_conv(cw2, cb2, 256, C2_OUT_P)        # (1792, 128)
    w3, b3 = fused_conv(cw3, cb3, C2_OUT_P, C3_OUT_P)   # (896, 128); zero rows for padded Cin

    f1 = jnp.pad(fw1.T, ((0, FC1_IN_P - fw1.shape[1]), (0, 0))).astype(jnp.float32)  # (128, 64)
    f2 = fw2.T.astype(jnp.float32)                                                   # (64, 128)
    f3 = fw3.astype(jnp.float32)                                                     # (1, 128)
    return (w1, b1, w2, b2, w3, b3,
            f1, fb1.reshape(1, -1).astype(jnp.float32),
            f2, fb2.reshape(1, -1).astype(jnp.float32),
            f3, fb3.reshape(1, -1).astype(jnp.float32))


# ------------------------------------------------------------------
# Pure-JAX reference (sanity check of the Pallas kernel)
# ------------------------------------------------------------------
def reference_forward(x, torch_params):
    (cw1, cb1), (cw2, cb2), (cw3, cb3), (fw1, fb1), (fw2, fb2), (fw3, fb3) = torch_params
    pad = (cw1.shape[-1] - 1) // 2
    h = jnp.transpose(x, (0, 2, 1))                               # (B, C, T), like x.permute(0,2,1)

    def conv_relu(h, w, b):
        y = jax.lax.conv_general_dilated(
            h, w, window_strides=(1,), padding=[(pad, pad)],
            dimension_numbers=("NCH", "OIH", "NCH"),
            precision=jax.lax.Precision.HIGHEST)
        return jnp.maximum(y + b[None, :, None], 0.0)

    h = conv_relu(h, cw1, cb1)
    h = conv_relu(h, cw2, cb2)
    h = conv_relu(h, cw3, cb3)
    pooled = jnp.mean(h, axis=2)                                  # (B, 32)

    def lin(v, w, b):
        return jnp.dot(v, w.T, precision=jax.lax.Precision.HIGHEST) + b

    v = jnp.maximum(lin(pooled, fw1, fb1), 0.0)
    v = jnp.maximum(lin(v, fw2, fb2), 0.0)
    v = lin(v, fw3, fb3)
    return jax.nn.sigmoid(v)


if __name__ == "__main__":
    B, T, C_IN = 2, 16, 8      # x: (batch, seq_len, features); Conv1d consumes (B, C_IN, T)

    key = jax.random.PRNGKey(0)
    k_x, k_p = jax.random.split(key)
    x = jax.random.normal(k_x, (B, T, C_IN), dtype=jnp.float32)

    torch_params = init_params(k_p, C_IN)
    kparams = to_kernel_params(torch_params)
    masks = _tap_masks(B, T, KSIZE)
    pool = _pool_matrix(B, T)

    out = jax.block_until_ready(cnn_classifier_forward(x, kparams, masks, pool))
    assert out.shape == (B, 1)

    ref = reference_forward(x, torch_params)
    # Conv weights/activations feed the MXU in bf16 (f32 accumulation); the reference runs
    # conv/fc at HIGHEST f32 precision, so allow a few bf16 ulps across the matmul chain.
    # Real bugs (e.g. a wrong roll direction or mask) produce errors orders of magnitude larger.
    assert jnp.allclose(out, ref, rtol=2e-2, atol=2e-2), (out, ref)

    print("KERNEL_OK")
</pallas_src>

<mosaic_0001>
module attributes {stable_mosaic.version = 11 : i64} {
  func.func @_cnn_classifier_kernel(%arg0: memref<32x8xf32, #tpu.memory_space<vmem>>, %arg1: memref<7x32x1xf32, #tpu.memory_space<vmem>>, %arg2: memref<2x32xf32, #tpu.memory_space<vmem>>, %arg3: memref<7x8x256xbf16, #tpu.memory_space<vmem>>, %arg4: memref<1x256xf32, #tpu.memory_space<vmem>>, %arg5: memref<1792x128xbf16, #tpu.memory_space<any>>, %arg6: memref<1x128xf32, #tpu.memory_space<vmem>>, %arg7: memref<896x128xbf16, #tpu.memory_space<any>>, %arg8: memref<1x128xf32, #tpu.memory_space<vmem>>, %arg9: memref<128x64xf32, #tpu.memory_space<vmem>>, %arg10: memref<1x64xf32, #tpu.memory_space<vmem>>, %arg11: memref<64x128xf32, #tpu.memory_space<vmem>>, %arg12: memref<1x128xf32, #tpu.memory_space<vmem>>, %arg13: memref<1x128xf32, #tpu.memory_space<vmem>>, %arg14: memref<1x1xf32, #tpu.memory_space<vmem>>, %arg15: memref<2x1xf32, #tpu.memory_space<vmem>>, %arg16: memref<32x1792xbf16, #tpu.memory_space<vmem>>, %arg17: memref<1792x128xbf16, #tpu.memory_space<vmem>>, %arg18: memref<896x128xbf16, #tpu.memory_space<vmem>>, %arg19: memref<2x!tpu.dma_semaphore, #tpu.memory_space<semaphore_mem>>) attributes {dimension_semantics = [], scalar_prefetch = 0 : i64, scratch_operands = 4 : i64, tpu.core_type = #tpu.core_type<tc>} {
    %c0_i32 = arith.constant 0 : i32
    %0 = tpu.memref_slice %arg19[%c0_i32] : memref<2x!tpu.dma_semaphore, #tpu.memory_space<semaphore_mem>> -> memref<1x!tpu.dma_semaphore, #tpu.memory_space<semaphore_mem>>
    %1 = tpu.memref_squeeze %0 : memref<1x!tpu.dma_semaphore, #tpu.memory_space<semaphore_mem>> -> memref<!tpu.dma_semaphore, #tpu.memory_space<semaphore_mem>>
    tpu.enqueue_dma source(%arg5 : memref<1792x128xbf16, #tpu.memory_space<any>>) target(%arg17 : memref<1792x128xbf16, #tpu.memory_space<vmem>>) target_semaphore(%1 : memref<!tpu.dma_semaphore, #tpu.memory_space<semaphore_mem>>)
    %c1_i32 = arith.constant 1 : i32
    %2 = tpu.memref_slice %arg19[%c1_i32] : memref<2x!tpu.dma_semaphore, #tpu.memory_space<semaphore_mem>> -> memref<1x!tpu.dma_semaphore, #tpu.memory_space<semaphore_mem>>
    %3 = tpu.memref_squeeze %2 : memref<1x!tpu.dma_semaphore, #tpu.memory_space<semaphore_mem>> -> memref<!tpu.dma_semaphore, #tpu.memory_space<semaphore_mem>>
    tpu.enqueue_dma source(%arg7 : memref<896x128xbf16, #tpu.memory_space<any>>) target(%arg18 : memref<896x128xbf16, #tpu.memory_space<vmem>>) target_semaphore(%3 : memref<!tpu.dma_semaphore, #tpu.memory_space<semaphore_mem>>)
    %c0 = arith.constant 0 : index
    %c0_0 = arith.constant 0 : index
    %4 = vector.load %arg0[%c0, %c0_0] : memref<32x8xf32, #tpu.memory_space<vmem>>, vector<32x8xf32>
    %c3_i32 = arith.constant 3 : i32
    %5 = tpu.dynamic_rotate %4 by %c3_i32 dim 0 : vector<32x8xf32>, i32 -> vector<32x8xf32>
    %c0_1 = arith.constant 0 : index
    %c0_2 = arith.constant 0 : index
    %c0_3 = arith.constant 0 : index
    %6 = vector.load %arg1[%c0_1, %c0_2, %c0_3] : memref<7x32x1xf32, #tpu.memory_space<vmem>>, vector<1x32x1xf32>
    %7 = vector.shape_cast %6 : vector<1x32x1xf32> to vector<32x1xf32>
    %8 = vector.broadcast %7 : vector<32x1xf32> to vector<32x8xf32>
    %9 = arith.mulf %5, %8 : vector<32x8xf32>
    %10 = arith.truncf %9 : vector<32x8xf32> to vector<32x8xbf16>
    %c0_4 = arith.constant 0 : index
    %c0_5 = arith.constant 0 : index
    %c0_6 = arith.constant 0 : index
    %11 = vector.load %arg3[%c0_4, %c0_5, %c0_6] : memref<7x8x256xbf16, #tpu.memory_space<vmem>>, vector<1x8x256xbf16>
    %12 = vector.shape_cast %11 : vector<1x8x256xbf16> to vector<8x256xbf16>
    %cst = arith.constant dense<0.000000e+00> : vector<32x256xf32>
    %13 = tpu.matmul %10, %12, %cst {dimension_numbers = #tpu.dot_dimension_numbers<[1], [0], [0], [1], [0, 0, 1, 1], [], []>} : vector<32x8xbf16>, vector<8x256xbf16>, vector<32x256xf32> -> vector<32x256xf32>
    %c2_i32 = arith.constant 2 : i32
    %14 = tpu.dynamic_rotate %4 by %c2_i32 dim 0 : vector<32x8xf32>, i32 -> vector<32x8xf32>
    %c1 = arith.constant 1 : index
    %c0_7 = arith.constant 0 : index
    %c0_8 = arith.constant 0 : index
    %15 = vector.load %arg1[%c1, %c0_7, %c0_8] : memref<7x32x1xf32, #tpu.memory_space<vmem>>, vector<1x32x1xf32>
    %16 = vector.shape_cast %15 : vector<1x32x1xf32> to vector<32x1xf32>
    %17 = vector.broadcast %16 : vector<32x1xf32> to vector<32x8xf32>
    %18 = arith.mulf %14, %17 : vector<32x8xf32>
    %19 = arith.truncf %18 : vector<32x8xf32> to vector<32x8xbf16>
    %c1_9 = arith.constant 1 : index
    %c0_10 = arith.constant 0 : index
    %c0_11 = arith.constant 0 : index
    %20 = vector.load %arg3[%c1_9, %c0_10, %c0_11] : memref<7x8x256xbf16, #tpu.memory_space<vmem>>, vector<1x8x256xbf16>
    %21 = vector.shape_cast %20 : vector<1x8x256xbf16> to vector<8x256xbf16>
    %cst_12 = arith.constant dense<0.000000e+00> : vector<32x256xf32>
    %22 = tpu.matmul %19, %21, %cst_12 {dimension_numbers = #tpu.dot_dimension_numbers<[1], [0], [0], [1], [0, 0, 1, 1], [], []>} : vector<32x8xbf16>, vector<8x256xbf16>, vector<32x256xf32> -> vector<32x256xf32>
    %23 = arith.addf %13, %22 : vector<32x256xf32>
    %c1_i32_13 = arith.constant 1 : i32
    %24 = tpu.dynamic_rotate %4 by %c1_i32_13 dim 0 : vector<32x8xf32>, i32 -> vector<32x8xf32>
    %c2 = arith.constant 2 : index
    %c0_14 = arith.constant 0 : index
    %c0_15 = arith.constant 0 : index
    %25 = vector.load %arg1[%c2, %c0_14, %c0_15] : memref<7x32x1xf32, #tpu.memory_space<vmem>>, vector<1x32x1xf32>
    %26 = vector.shape_cast %25 : vector<1x32x1xf32> to vector<32x1xf32>
    %27 = vector.broadcast %26 : vector<32x1xf32> to vector<32x8xf32>
    %28 = arith.mulf %24, %27 : vector<32x8xf32>
    %29 = arith.truncf %28 : vector<32x8xf32> to vector<32x8xbf16>
    %c2_16 = arith.constant 2 : index
    %c0_17 = arith.constant 0 : index
    %c0_18 = arith.constant 0 : index
    %30 = vector.load %arg3[%c2_16, %c0_17, %c0_18] : memref<7x8x256xbf16, #tpu.memory_space<vmem>>, vector<1x8x256xbf16>
    %31 = vector.shape_cast %30 : vector<1x8x256xbf16> to vector<8x256xbf16>
    %cst_19 = arith.constant dense<0.000000e+00> : vector<32x256xf32>
    %32 = tpu.matmul %29, %31, %cst_19 {dimension_numbers = #tpu.dot_dimension_numbers<[1], [0], [0], [1], [0, 0, 1, 1], [], []>} : vector<32x8xbf16>, vector<8x256xbf16>, vector<32x256xf32> -> vector<32x256xf32>
    %33 = arith.addf %23, %32 : vector<32x256xf32>
    %34 = arith.truncf %4 : vector<32x8xf32> to vector<32x8xbf16>
    %c3 = arith.constant 3 : index
    %c0_20 = arith.constant 0 : index
    %c0_21 = arith.constant 0 : index
    %35 = vector.load %arg3[%c3, %c0_20, %c0_21] : memref<7x8x256xbf16, #tpu.memory_space<vmem>>, vector<1x8x256xbf16>
    %36 = vector.shape_cast %35 : vector<1x8x256xbf16> to vector<8x256xbf16>
    %cst_22 = arith.constant dense<0.000000e+00> : vector<32x256xf32>
    %37 = tpu.matmul %34, %36, %cst_22 {dimension_numbers = #tpu.dot_dimension_numbers<[1], [0], [0], [1], [0, 0, 1, 1], [], []>} : vector<32x8xbf16>, vector<8x256xbf16>, vector<32x256xf32> -> vector<32x256xf32>
    %38 = arith.addf %33, %37 : vector<32x256xf32>
    %c31_i32 = arith.constant 31 : i32
    %39 = tpu.dynamic_rotate %4 by %c31_i32 dim 0 : vector<32x8xf32>, i32 -> vector<32x8xf32>
    %c4 = arith.constant 4 : index
    %c0_23 = arith.constant 0 : index
    %c0_24 = arith.constant 0 : index
    %40 = vector.load %arg1[%c4, %c0_23, %c0_24] : memref<7x32x1xf32, #tpu.memory_space<vmem>>, vector<1x32x1xf32>
    %41 = vector.shape_cast %40 : vector<1x32x1xf32> to vector<32x1xf32>
    %42 = vector.broadcast %41 : vector<32x1xf32> to vector<32x8xf32>
    %43 = arith.mulf %39, %42 : vector<32x8xf32>
    %44 = arith.truncf %43 : vector<32x8xf32> to vector<32x8xbf16>
    %c4_25 = arith.constant 4 : index
    %c0_26 = arith.constant 0 : index
    %c0_27 = arith.constant 0 : index
    %45 = vector.load %arg3[%c4_25, %c0_26, %c0_27] : memref<7x8x256xbf16, #tpu.memory_space<vmem>>, vector<1x8x256xbf16>
    %46 = vector.shape_cast %45 : vector<1x8x256xbf16> to vector<8x256xbf16>
    %cst_28 = arith.constant dense<0.000000e+00> : vector<32x256xf32>
    %47 = tpu.matmul %44, %46, %cst_28 {dimension_numbers = #tpu.dot_dimension_numbers<[1], [0], [0], [1], [0, 0, 1, 1], [], []>} : vector<32x8xbf16>, vector<8x256xbf16>, vector<32x256xf32> -> vector<32x256xf32>
    %48 = arith.addf %38, %47 : vector<32x256xf32>
    %c30_i32 = arith.constant 30 : i32
    %49 = tpu.dynamic_rotate %4 by %c30_i32 dim 0 : vector<32x8xf32>, i32 -> vector<32x8xf32>
    %c5 = arith.constant 5 : index
    %c0_29 = arith.constant 0 : index
    %c0_30 = arith.constant 0 : index
    %50 = vector.load %arg1[%c5, %c0_29, %c0_30] : memref<7x32x1xf32, #tpu.memory_space<vmem>>, vector<1x32x1xf32>
    %51 = vector.shape_cast %50 : vector<1x32x1xf32> to vector<32x1xf32>
    %52 = vector.broadcast %51 : vector<32x1xf32> to vector<32x8xf32>
    %53 = arith.mulf %49, %52 : vector<32x8xf32>
    %54 = arith.truncf %53 : vector<32x8xf32> to vector<32x8xbf16>
    %c5_31 = arith.constant 5 : index
    %c0_32 = arith.constant 0 : index
    %c0_33 = arith.constant 0 : index
    %55 = vector.load %arg3[%c5_31, %c0_32, %c0_33] : memref<7x8x256xbf16, #tpu.memory_space<vmem>>, vector<1x8x256xbf16>
    %56 = vector.shape_cast %55 : vector<1x8x256xbf16> to vector<8x256xbf16>
    %cst_34 = arith.constant dense<0.000000e+00> : vector<32x256xf32>
    %57 = tpu.matmul %54, %56, %cst_34 {dimension_numbers = #tpu.dot_dimension_numbers<[1], [0], [0], [1], [0, 0, 1, 1], [], []>} : vector<32x8xbf16>, vector<8x256xbf16>, vector<32x256xf32> -> vector<32x256xf32>
    %58 = arith.addf %48, %57 : vector<32x256xf32>
    %c29_i32 = arith.constant 29 : i32
    %59 = tpu.dynamic_rotate %4 by %c29_i32 dim 0 : vector<32x8xf32>, i32 -> vector<32x8xf32>
    %c6 = arith.constant 6 : index
    %c0_35 = arith.constant 0 : index
    %c0_36 = arith.constant 0 : index
    %60 = vector.load %arg1[%c6, %c0_35, %c0_36] : memref<7x32x1xf32, #tpu.memory_space<vmem>>, vector<1x32x1xf32>
    %61 = vector.shape_cast %60 : vector<1x32x1xf32> to vector<32x1xf32>
    %62 = vector.broadcast %61 : vector<32x1xf32> to vector<32x8xf32>
    %63 = arith.mulf %59, %62 : vector<32x8xf32>
    %64 = arith.truncf %63 : vector<32x8xf32> to vector<32x8xbf16>
    %c6_37 = arith.constant 6 : index
    %c0_38 = arith.constant 0 : index
    %c0_39 = arith.constant 0 : index
    %65 = vector.load %arg3[%c6_37, %c0_38, %c0_39] : memref<7x8x256xbf16, #tpu.memory_space<vmem>>, vector<1x8x256xbf16>
    %66 = vector.shape_cast %65 : vector<1x8x256xbf16> to vector<8x256xbf16>
    %cst_40 = arith.constant dense<0.000000e+00> : vector<32x256xf32>
    %67 = tpu.matmul %64, %66, %cst_40 {dimension_numbers = #tpu.dot_dimension_numbers<[1], [0], [0], [1], [0, 0, 1, 1], [], []>} : vector<32x8xbf16>, vector<8x256xbf16>, vector<32x256xf32> -> vector<32x256xf32>
    %68 = arith.addf %58, %67 : vector<32x256xf32>
    %c0_41 = arith.constant 0 : index
    %c0_42 = arith.constant 0 : index
    %69 = vector.load %arg4[%c0_41, %c0_42] : memref<1x256xf32, #tpu.memory_space<vmem>>, vector<1x256xf32>
    %70 = vector.broadcast %69 : vector<1x256xf32> to vector<32x256xf32>
    %71 = arith.addf %68, %70 : vector<32x256xf32>
    %cst_43 = arith.constant 0.000000e+00 : f32
    %72 = vector.broadcast %cst_43 : f32 to vector<32x256xf32>
    %73 = arith.maximumf %71, %72 : vector<32x256xf32>
    %c0_i32_44 = arith.constant 0 : i32
    %74 = tpu.memref_slice %arg19[%c0_i32_44] : memref<2x!tpu.dma_semaphore, #tpu.memory_space<semaphore_mem>> -> memref<1x!tpu.dma_semaphore, #tpu.memory_space<semaphore_mem>>
    %75 = tpu.memref_squeeze %74 : memref<1x!tpu.dma_semaphore, #tpu.memory_space<semaphore_mem>> -> memref<!tpu.dma_semaphore, #tpu.memory_space<semaphore_mem>>
    tpu.wait_dma2 semaphore(%75 : memref<!tpu.dma_semaphore, #tpu.memory_space<semaphore_mem>>) src(%arg5 : memref<1792x128xbf16, #tpu.memory_space<any>>) dst(%arg17 : memref<1792x128xbf16, #tpu.memory_space<vmem>>)
    %c3_i32_45 = arith.constant 3 : i32
    %76 = tpu.dynamic_rotate %73 by %c3_i32_45 dim 0 : vector<32x256xf32>, i32 -> vector<32x256xf32>
    %c0_46 = arith.constant 0 : index
    %c0_47 = arith.constant 0 : index
    %c0_48 = arith.constant 0 : index
    %77 = vector.load %arg1[%c0_46, %c0_47, %c0_48] : memref<7x32x1xf32, #tpu.memory_space<vmem>>, vector<1x32x1xf32>
    %78 = vector.shape_cast %77 : vector<1x32x1xf32> to vector<32x1xf32>
    %79 = vector.broadcast %78 : vector<32x1xf32> to vector<32x256xf32>
    %80 = arith.mulf %76, %79 : vector<32x256xf32>
    %81 = arith.truncf %80 : vector<32x256xf32> to vector<32x256xbf16>
    %c0_49 = arith.constant 0 : index
    %c0_50 = arith.constant 0 : index
    %82 = vector.load %arg16[%c0_49, %c0_50] : memref<32x1792xbf16, #tpu.memory_space<vmem>>, vector<32x256xbf16>
    tpu.vector_store %arg16[%c0_49, %c0_50], %81 {strides = array<i32>} : memref<32x1792xbf16, #tpu.memory_space<vmem>>, vector<32x256xbf16>,
    %c2_i32_51 = arith.constant 2 : i32
    %83 = tpu.dynamic_rotate %73 by %c2_i32_51 dim 0 : vector<32x256xf32>, i32 -> vector<32x256xf32>
    %c1_52 = arith.constant 1 : index
    %c0_53 = arith.constant 0 : index
    %c0_54 = arith.constant 0 : index
    %84 = vector.load %arg1[%c1_52, %c0_53, %c0_54] : memref<7x32x1xf32, #tpu.memory_space<vmem>>, vector<1x32x1xf32>
    %85 = vector.shape_cast %84 : vector<1x32x1xf32> to vector<32x1xf32>
    %86 = vector.broadcast %85 : vector<32x1xf32> to vector<32x256xf32>
    %87 = arith.mulf %83, %86 : vector<32x256xf32>
    %88 = arith.truncf %87 : vector<32x256xf32> to vector<32x256xbf16>
    %c0_55 = arith.constant 0 : index
    %c256 = arith.constant 256 : index
    %89 = vector.load %arg16[%c0_55, %c256] : memref<32x1792xbf16, #tpu.memory_space<vmem>>, vector<32x256xbf16>
    tpu.vector_store %arg16[%c0_55, %c256], %88 {strides = array<i32>} : memref<32x1792xbf16, #tpu.memory_space<vmem>>, vector<32x256xbf16>,
    %c1_i32_56 = arith.constant 1 : i32
    %90 = tpu.dynamic_rotate %73 by %c1_i32_56 dim 0 : vector<32x256xf32>, i32 -> vector<32x256xf32>
    %c2_57 = arith.constant 2 : index
    %c0_58 = arith.constant 0 : index
    %c0_59 = arith.constant 0 : index
    %91 = vector.load %arg1[%c2_57, %c0_58, %c0_59] : memref<7x32x1xf32, #tpu.memory_space<vmem>>, vector<1x32x1xf32>
    %92 = vector.shape_cast %91 : vector<1x32x1xf32> to vector<32x1xf32>
    %93 = vector.broadcast %92 : vector<32x1xf32> to vector<32x256xf32>
    %94 = arith.mulf %90, %93 : vector<32x256xf32>
    %95 = arith.truncf %94 : vector<32x256xf32> to vector<32x256xbf16>
    %c0_60 = arith.constant 0 : index
    %c512 = arith.constant 512 : index
    %96 = vector.load %arg16[%c0_60, %c512] : memref<32x1792xbf16, #tpu.memory_space<vmem>>, vector<32x256xbf16>
    tpu.vector_store %arg16[%c0_60, %c512], %95 {strides = array<i32>} : memref<32x1792xbf16, #tpu.memory_space<vmem>>, vector<32x256xbf16>,
    %97 = arith.truncf %73 : vector<32x256xf32> to vector<32x256xbf16>
    %c0_61 = arith.constant 0 : index
    %c768 = arith.constant 768 : index
    %98 = vector.load %arg16[%c0_61, %c768] : memref<32x1792xbf16, #tpu.memory_space<vmem>>, vector<32x256xbf16>
    tpu.vector_store %arg16[%c0_61, %c768], %97 {strides = array<i32>} : memref<32x1792xbf16, #tpu.memory_space<vmem>>, vector<32x256xbf16>,
    %c31_i32_62 = arith.constant 31 : i32
    %99 = tpu.dynamic_rotate %73 by %c31_i32_62 dim 0 : vector<32x256xf32>, i32 -> vector<32x256xf32>
    %c4_63 = arith.constant 4 : index
    %c0_64 = arith.constant 0 : index
    %c0_65 = arith.constant 0 : index
    %100 = vector.load %arg1[%c4_63, %c0_64, %c0_65] : memref<7x32x1xf32, #tpu.memory_space<vmem>>, vector<1x32x1xf32>
    %101 = vector.shape_cast %100 : vector<1x32x1xf32> to vector<32x1xf32>
    %102 = vector.broadcast %101 : vector<32x1xf32> to vector<32x256xf32>
    %103 = arith.mulf %99, %102 : vector<32x256xf32>
    %104 = arith.truncf %103 : vector<32x256xf32> to vector<32x256xbf16>
    %c0_66 = arith.constant 0 : index
    %c1024 = arith.constant 1024 : index
    %105 = vector.load %arg16[%c0_66, %c1024] : memref<32x1792xbf16, #tpu.memory_space<vmem>>, vector<32x256xbf16>
    tpu.vector_store %arg16[%c0_66, %c1024], %104 {strides = array<i32>} : memref<32x1792xbf16, #tpu.memory_space<vmem>>, vector<32x256xbf16>,
    %c30_i32_67 = arith.constant 30 : i32
    %106 = tpu.dynamic_rotate %73 by %c30_i32_67 dim 0 : vector<32x256xf32>, i32 -> vector<32x256xf32>
    %c5_68 = arith.constant 5 : index
    %c0_69 = arith.constant 0 : index
    %c0_70 = arith.constant 0 : index
    %107 = vector.load %arg1[%c5_68, %c0_69, %c0_70] : memref<7x32x1xf32, #tpu.memory_space<vmem>>, vector<1x32x1xf32>
    %108 = vector.shape_cast %107 : vector<1x32x1xf32> to vector<32x1xf32>
    %109 = vector.broadcast %108 : vector<32x1xf32> to vector<32x256xf32>
    %110 = arith.mulf %106, %109 : vector<32x256xf32>
    %111 = arith.truncf %110 : vector<32x256xf32> to vector<32x256xbf16>
    %c0_71 = arith.constant 0 : index
    %c1280 = arith.constant 1280 : index
    %112 = vector.load %arg16[%c0_71, %c1280] : memref<32x1792xbf16, #tpu.memory_space<vmem>>, vector<32x256xbf16>
    tpu.vector_store %arg16[%c0_71, %c1280], %111 {strides = array<i32>} : memref<32x1792xbf16, #tpu.memory_space<vmem>>, vector<32x256xbf16>,
    %c29_i32_72 = arith.constant 29 : i32
    %113 = tpu.dynamic_rotate %73 by %c29_i32_72 dim 0 : vector<32x256xf32>, i32 -> vector<32x256xf32>
    %c6_73 = arith.constant 6 : index
    %c0_74 = arith.constant 0 : index
    %c0_75 = arith.constant 0 : index
    %114 = vector.load %arg1[%c6_73, %c0_74, %c0_75] : memref<7x32x1xf32, #tpu.memory_space<vmem>>, vector<1x32x1xf32>
    %115 = vector.shape_cast %114 : vector<1x32x1xf32> to vector<32x1xf32>
    %116 = vector.broadcast %115 : vector<32x1xf32> to vector<32x256xf32>
    %117 = arith.mulf %113, %116 : vector<32x256xf32>
    %118 = arith.truncf %117 : vector<32x256xf32> to vector<32x256xbf16>
    %c0_76 = arith.constant 0 : index
    %c1536 = arith.constant 1536 : index
    %119 = vector.load %arg16[%c0_76, %c1536] : memref<32x1792xbf16, #tpu.memory_space<vmem>>, vector<32x256xbf16>
    tpu.vector_store %arg16[%c0_76, %c1536], %118 {strides = array<i32>} : memref<32x1792xbf16, #tpu.memory_space<vmem>>, vector<32x256xbf16>,
    %c0_77 = arith.constant 0 : index
    %c0_78 = arith.constant 0 : index
    %120 = vector.load %arg16[%c0_77, %c0_78] : memref<32x1792xbf16, #tpu.memory_space<vmem>>, vector<32x1792xbf16>
    %c0_79 = arith.constant 0 : index
    %c0_80 = arith.constant 0 : index
    %121 = vector.load %arg17[%c0_79, %c0_80] : memref<1792x128xbf16, #tpu.memory_space<vmem>>, vector<1792x128xbf16>
    %cst_81 = arith.constant dense<0.000000e+00> : vector<32x128xf32>
    %122 = tpu.matmul %120, %121, %cst_81 {dimension_numbers = #tpu.dot_dimension_numbers<[1], [0], [0], [1], [0, 0, 1, 1], [], []>} : vector<32x1792xbf16>, vector<1792x128xbf16>, vector<32x128xf32> -> vector<32x128xf32>
    %c0_82 = arith.constant 0 : index
    %c0_83 = arith.constant 0 : index
    %123 = vector.load %arg6[%c0_82, %c0_83] : memref<1x128xf32, #tpu.memory_space<vmem>>, vector<1x128xf32>
    %124 = vector.broadcast %123 : vector<1x128xf32> to vector<32x128xf32>
    %125 = arith.addf %122, %124 : vector<32x128xf32>
    %cst_84 = arith.constant 0.000000e+00 : f32
    %126 = vector.broadcast %cst_84 : f32 to vector<32x128xf32>
    %127 = arith.maximumf %125, %126 : vector<32x128xf32>
    %c1_i32_85 = arith.constant 1 : i32
    %128 = tpu.memref_slice %arg19[%c1_i32_85] : memref<2x!tpu.dma_semaphore, #tpu.memory_space<semaphore_mem>> -> memref<1x!tpu.dma_semaphore, #tpu.memory_space<semaphore_mem>>
    %129 = tpu.memref_squeeze %128 : memref<1x!tpu.dma_semaphore, #tpu.memory_space<semaphore_mem>> -> memref<!tpu.dma_semaphore, #tpu.memory_space<semaphore_mem>>
    tpu.wait_dma2 semaphore(%129 : memref<!tpu.dma_semaphore, #tpu.memory_space<semaphore_mem>>) src(%arg7 : memref<896x128xbf16, #tpu.memory_space<any>>) dst(%arg18 : memref<896x128xbf16, #tpu.memory_space<vmem>>)
    %c3_i32_86 = arith.constant 3 : i32
    %130 = tpu.dynamic_rotate %127 by %c3_i32_86 dim 0 : vector<32x128xf32>, i32 -> vector<32x128xf32>
    %c0_87 = arith.constant 0 : index
    %c0_88 = arith.constant 0 : index
    %c0_89 = arith.constant 0 : index
    %131 = vector.load %arg1[%c0_87, %c0_88, %c0_89] : memref<7x32x1xf32, #tpu.memory_space<vmem>>, vector<1x32x1xf32>
    %132 = vector.shape_cast %131 : vector<1x32x1xf32> to vector<32x1xf32>
    %133 = vector.broadcast %132 : vector<32x1xf32> to vector<32x128xf32>
    %134 = arith.mulf %130, %133 : vector<32x128xf32>
    %135 = arith.truncf %134 : vector<32x128xf32> to vector<32x128xbf16>
    %c0_90 = arith.constant 0 : index
    %c0_91 = arith.constant 0 : index
    %136 = vector.load %arg16[%c0_90, %c0_91] : memref<32x1792xbf16, #tpu.memory_space<vmem>>, vector<32x128xbf16>
    tpu.vector_store %arg16[%c0_90, %c0_91], %135 {strides = array<i32>} : memref<32x1792xbf16, #tpu.memory_space<vmem>>, vector<32x128xbf16>,
    %c2_i32_92 = arith.constant 2 : i32
    %137 = tpu.dynamic_rotate %127 by %c2_i32_92 dim 0 : vector<32x128xf32>, i32 -> vector<32x128xf32>
    %c1_93 = arith.constant 1 : index
    %c0_94 = arith.constant 0 : index
    %c0_95 = arith.constant 0 : index
    %138 = vector.load %arg1[%c1_93, %c0_94, %c0_95] : memref<7x32x1xf32, #tpu.memory_space<vmem>>, vector<1x32x1xf32>
    %139 = vector.shape_cast %138 : vector<1x32x1xf32> to vector<32x1xf32>
    %140 = vector.broadcast %139 : vector<32x1xf32> to vector<32x128xf32>
    %141 = arith.mulf %137, %140 : vector<32x128xf32>
    %142 = arith.truncf %141 : vector<32x128xf32> to vector<32x128xbf16>
    %c0_96 = arith.constant 0 : index
    %c128 = arith.constant 128 : index
    %143 = vector.load %arg16[%c0_96, %c128] : memref<32x1792xbf16, #tpu.memory_space<vmem>>, vector<32x128xbf16>
    tpu.vector_store %arg16[%c0_96, %c128], %142 {strides = array<i32>} : memref<32x1792xbf16, #tpu.memory_space<vmem>>, vector<32x128xbf16>,
    %c1_i32_97 = arith.constant 1 : i32
    %144 = tpu.dynamic_rotate %127 by %c1_i32_97 dim 0 : vector<32x128xf32>, i32 -> vector<32x128xf32>
    %c2_98 = arith.constant 2 : index
    %c0_99 = arith.constant 0 : index
    %c0_100 = arith.constant 0 : index
    %145 = vector.load %arg1[%c2_98, %c0_99, %c0_100] : memref<7x32x1xf32, #tpu.memory_space<vmem>>, vector<1x32x1xf32>
    %146 = vector.shape_cast %145 : vector<1x32x1xf32> to vector<32x1xf32>
    %147 = vector.broadcast %146 : vector<32x1xf32> to vector<32x128xf32>
    %148 = arith.mulf %144, %147 : vector<32x128xf32>
    %149 = arith.truncf %148 : vector<32x128xf32> to vector<32x128xbf16>
    %c0_101 = arith.constant 0 : index
    %c256_102 = arith.constant 256 : index
    %150 = vector.load %arg16[%c0_101, %c256_102] : memref<32x1792xbf16, #tpu.memory_space<vmem>>, vector<32x128xbf16>
    tpu.vector_store %arg16[%c0_101, %c256_102], %149 {strides = array<i32>} : memref<32x1792xbf16, #tpu.memory_space<vmem>>, vector<32x128xbf16>,
    %151 = arith.truncf %127 : vector<32x128xf32> to vector<32x128xbf16>
    %c0_103 = arith.constant 0 : index
    %c384 = arith.constant 384 : index
    %152 = vector.load %arg16[%c0_103, %c384] : memref<32x1792xbf16, #tpu.memory_space<vmem>>, vector<32x128xbf16>
    tpu.vector_store %arg16[%c0_103, %c384], %151 {strides = array<i32>} : memref<32x1792xbf16, #tpu.memory_space<vmem>>, vector<32x128xbf16>,
    %c31_i32_104 = arith.constant 31 : i32
    %153 = tpu.dynamic_rotate %127 by %c31_i32_104 dim 0 : vector<32x128xf32>, i32 -> vector<32x128xf32>
    %c4_105 = arith.constant 4 : index
    %c0_106 = arith.constant 0 : index
    %c0_107 = arith.constant 0 : index
    %154 = vector.load %arg1[%c4_105, %c0_106, %c0_107] : memref<7x32x1xf32, #tpu.memory_space<vmem>>, vector<1x32x1xf32>
    %155 = vector.shape_cast %154 : vector<1x32x1xf32> to vector<32x1xf32>
    %156 = vector.broadcast %155 : vector<32x1xf32> to vector<32x128xf32>
    %157 = arith.mulf %153, %156 : vector<32x128xf32>
    %158 = arith.truncf %157 : vector<32x128xf32> to vector<32x128xbf16>
    %c0_108 = arith.constant 0 : index
    %c512_109 = arith.constant 512 : index
    %159 = vector.load %arg16[%c0_108, %c512_109] : memref<32x1792xbf16, #tpu.memory_space<vmem>>, vector<32x128xbf16>
    tpu.vector_store %arg16[%c0_108, %c512_109], %158 {strides = array<i32>} : memref<32x1792xbf16, #tpu.memory_space<vmem>>, vector<32x128xbf16>,
    %c30_i32_110 = arith.constant 30 : i32
    %160 = tpu.dynamic_rotate %127 by %c30_i32_110 dim 0 : vector<32x128xf32>, i32 -> vector<32x128xf32>
    %c5_111 = arith.constant 5 : index
    %c0_112 = arith.constant 0 : index
    %c0_113 = arith.constant 0 : index
    %161 = vector.load %arg1[%c5_111, %c0_112, %c0_113] : memref<7x32x1xf32, #tpu.memory_space<vmem>>, vector<1x32x1xf32>
    %162 = vector.shape_cast %161 : vector<1x32x1xf32> to vector<32x1xf32>
    %163 = vector.broadcast %162 : vector<32x1xf32> to vector<32x128xf32>
    %164 = arith.mulf %160, %163 : vector<32x128xf32>
    %165 = arith.truncf %164 : vector<32x128xf32> to vector<32x128xbf16>
    %c0_114 = arith.constant 0 : index
    %c640 = arith.constant 640 : index
    %166 = vector.load %arg16[%c0_114, %c640] : memref<32x1792xbf16, #tpu.memory_space<vmem>>, vector<32x128xbf16>
    tpu.vector_store %arg16[%c0_114, %c640], %165 {strides = array<i32>} : memref<32x1792xbf16, #tpu.memory_space<vmem>>, vector<32x128xbf16>,
    %c29_i32_115 = arith.constant 29 : i32
    %167 = tpu.dynamic_rotate %127 by %c29_i32_115 dim 0 : vector<32x128xf32>, i32 -> vector<32x128xf32>
    %c6_116 = arith.constant 6 : index
    %c0_117 = arith.constant 0 : index
    %c0_118 = arith.constant 0 : index
    %168 = vector.load %arg1[%c6_116, %c0_117, %c0_118] : memref<7x32x1xf32, #tpu.memory_space<vmem>>, vector<1x32x1xf32>
    %169 = vector.shape_cast %168 : vector<1x32x1xf32> to vector<32x1xf32>
    %170 = vector.broadcast %169 : vector<32x1xf32> to vector<32x128xf32>
    %171 = arith.mulf %167, %170 : vector<32x128xf32>
    %172 = arith.truncf %171 : vector<32x128xf32> to vector<32x128xbf16>
    %c0_119 = arith.constant 0 : index
    %c768_120 = arith.constant 768 : index
    %173 = vector.load %arg16[%c0_119, %c768_120] : memref<32x1792xbf16, #tpu.memory_space<vmem>>, vector<32x128xbf16>
    tpu.vector_store %arg16[%c0_119, %c768_120], %172 {strides = array<i32>} : memref<32x1792xbf16, #tpu.memory_space<vmem>>, vector<32x128xbf16>,
    %c0_121 = arith.constant 0 : index
    %c0_122 = arith.constant 0 : index
    %174 = vector.load %arg16[%c0_121, %c0_122] : memref<32x1792xbf16, #tpu.memory_space<vmem>>, vector<32x896xbf16>
    %c0_123 = arith.constant 0 : index
    %c0_124 = arith.constant 0 : index
    %175 = vector.load %arg18[%c0_123, %c0_124] : memref<896x128xbf16, #tpu.memory_space<vmem>>, vector<896x128xbf16>
    %cst_125 = arith.constant dense<0.000000e+00> : vector<32x128xf32>
    %176 = tpu.matmul %174, %175, %cst_125 {dimension_numbers = #tpu.dot_dimension_numbers<[1], [0], [0], [1], [0, 0, 1, 1], [], []>} : vector<32x896xbf16>, vector<896x128xbf16>, vector<32x128xf32> -> vector<32x128xf32>
    %c0_126 = arith.constant 0 : index
    %c0_127 = arith.constant 0 : index
    %177 = vector.load %arg8[%c0_126, %c0_127] : memref<1x128xf32, #tpu.memory_space<vmem>>, vector<1x128xf32>
    %178 = vector.broadcast %177 : vector<1x128xf32> to vector<32x128xf32>
    %179 = arith.addf %176, %178 : vector<32x128xf32>
    %cst_128 = arith.constant 0.000000e+00 : f32
    %180 = vector.broadcast %cst_128 : f32 to vector<32x128xf32>
    %181 = arith.maximumf %179, %180 : vector<32x128xf32>
    %c0_129 = arith.constant 0 : index
    %c0_130 = arith.constant 0 : index
    %182 = vector.load %arg2[%c0_129, %c0_130] : memref<2x32xf32, #tpu.memory_space<vmem>>, vector<2x32xf32>
    %cst_131 = arith.constant dense<0.000000e+00> : vector<2x128xf32>
    %183 = tpu.matmul %182, %181, %cst_131 {dimension_numbers = #tpu.dot_dimension_numbers<[1], [0], [0], [1], [0, 0, 1, 1], [], []>} : vector<2x32xf32>, vector<32x128xf32>, vector<2x128xf32> -> vector<2x128xf32>
    %c0_132 = arith.constant 0 : index
    %c0_133 = arith.constant 0 : index
    %184 = vector.load %arg9[%c0_132, %c0_133] : memref<128x64xf32, #tpu.memory_space<vmem>>, vector<128x64xf32>
    %cst_134 = arith.constant dense<0.000000e+00> : vector<2x64xf32>
    %185 = tpu.matmul %183, %184, %cst_134 {dimension_numbers = #tpu.dot_dimension_numbers<[1], [0], [0], [1], [0, 0, 1, 1], [], []>} : vector<2x128xf32>, vector<128x64xf32>, vector<2x64xf32> -> vector<2x64xf32>
    %c0_135 = arith.constant 0 : index
    %c0_136 = arith.constant 0 : index
    %186 = vector.load %arg10[%c0_135, %c0_136] : memref<1x64xf32, #tpu.memory_space<vmem>>, vector<1x64xf32>
    %187 = vector.broadcast %186 : vector<1x64xf32> to vector<2x64xf32>
    %188 = arith.addf %185, %187 : vector<2x64xf32>
    %cst_137 = arith.constant 0.000000e+00 : f32
    %189 = vector.broadcast %cst_137 : f32 to vector<2x64xf32>
    %190 = arith.maximumf %188, %189 : vector<2x64xf32>
    %c0_138 = arith.constant 0 : index
    %c0_139 = arith.constant 0 : index
    %191 = vector.load %arg11[%c0_138, %c0_139] : memref<64x128xf32, #tpu.memory_space<vmem>>, vector<64x128xf32>
    %cst_140 = arith.constant dense<0.000000e+00> : vector<2x128xf32>
    %192 = tpu.matmul %190, %191, %cst_140 {dimension_numbers = #tpu.dot_dimension_numbers<[1], [0], [0], [1], [0, 0, 1, 1], [], []>} : vector<2x64xf32>, vector<64x128xf32>, vector<2x128xf32> -> vector<2x128xf32>
    %c0_141 = arith.constant 0 : index
    %c0_142 = arith.constant 0 : index
    %193 = vector.load %arg12[%c0_141, %c0_142] : memref<1x128xf32, #tpu.memory_space<vmem>>, vector<1x128xf32>
    %194 = vector.broadcast %193 : vector<1x128xf32> to vector<2x128xf32>
    %195 = arith.addf %192, %194 : vector<2x128xf32>
    %cst_143 = arith.constant 0.000000e+00 : f32
    %196 = vector.broadcast %cst_143 : f32 to vector<2x128xf32>
    %197 = arith.maximumf %195, %196 : vector<2x128xf32>
    %c0_144 = arith.constant 0 : index
    %c0_145 = arith.constant 0 : index
    %198 = vector.load %arg13[%c0_144, %c0_145] : memref<1x128xf32, #tpu.memory_space<vmem>>, vector<1x128xf32>
    %199 = vector.broadcast %198 : vector<1x128xf32> to vector<2x128xf32>
    %200 = arith.mulf %197, %199 : vector<2x128xf32>
    %cst_146 = arith.constant dense<0.000000e+00> : vector<2xf32>
    %201 = vector.multi_reduction <add>, %200, %cst_146 [1] : vector<2x128xf32> to vector<2xf32>
    %202 = vector.shape_cast %201 : vector<2xf32> to vector<2x1xf32>
    %c0_147 = arith.constant 0 : index
    %c0_148 = arith.constant 0 : index
    %203 = vector.load %arg14[%c0_147, %c0_148] : memref<1x1xf32, #tpu.memory_space<vmem>>, vector<1x1xf32>
    %204 = vector.broadcast %203 : vector<1x1xf32> to vector<2x1xf32>
    %205 = arith.addf %202, %204 : vector<2x1xf32>
    %206 = arith.negf %205 : vector<2x1xf32>
    %207 = math.exp %206 : vector<2x1xf32>
    %cst_149 = arith.constant 1.000000e+00 : f32
    %208 = vector.broadcast %cst_149 : f32 to vector<2x1xf32>
    %209 = arith.addf %208, %207 : vector<2x1xf32>
    %210 = arith.divf %208, %209 : vector<2x1xf32>
    %c0_150 = arith.constant 0 : index
    %c0_151 = arith.constant 0 : index
    %211 = vector.load %arg15[%c0_150, %c0_151] : memref<2x1xf32, #tpu.memory_space<vmem>>, vector<2x1xf32>
    tpu.vector_store %arg15[%c0_150, %c0_151], %210 {strides = array<i32>} : memref<2x1xf32, #tpu.memory_space<vmem>>, vector<2x1xf32>,
    return
  }
}

</mosaic_0001>

<bundles_post_ra>
// kernel: cnn_classifier_forward.1
= control target key start
LH: loop header
LB: loop body
LE: loop exit
PB: predicated region body
PF: predicated region fallthrough
CT: control target
= control target key end

     0   :  { %v4802_v0 = vmov 0   ;;  %vm176_vm0 = vcmask 1043456   ;;  %v84_v30 = vlaneseq  ;;  %vm169_vm2 = vcmask 64512   ;;  %s4803_s29 = smov [#allocation3]   ;;  %s4804_s19 = smov [#allocation4]   ;;  %s5830_s1 = inlined_call_operand.vmem [shape: f32[7,32,1], index: 1, kind: input, shape index: {}]   ;;  %s5831_s3 = inlined_call_operand.vmem [shape: bf16[7,8,256], index: 3, kind: input, shape index: {}]   ;;  %s5832_s0 = inlined_call_operand.vmem [shape: f32[32,8], index: 0, kind: input, shape index: {}]   ;;  %s5833_s5 = inlined_call_operand.hbm [shape: bf16[1792,128], index: 5, kind: input, shape index: {}]   ;;  %s5834_s7 = inlined_call_operand.hbm [shape: bf16[896,128], index: 7, kind: input, shape index: {}]   ;;  %s5835_s2 = inlined_call_operand.vmem [shape: f32[2,32], index: 2, kind: input, shape index: {}]   ;;  %s5836_s6 = inlined_call_operand.vmem [shape: f32[1,128], index: 6, kind: input, shape index: {}]   ;;  %s5837_s8 = inlined_call_operand.vmem [shape: f32[1,128], index: 8, kind: input, shape index: {}]   ;;  %s5838_s9 = inlined_call_operand.vmem [shape: f32[128,64], index: 9, kind: input, shape index: {}]   ;;  %s5839_s10 = inlined_call_operand.vmem [shape: f32[1,64], index: 10, kind: input, shape index: {}]   ;;  %s5840_s11 = inlined_call_operand.vmem [shape: f32[64,128], index: 11, kind: input, shape index: {}]   ;;  %s5841_s12 = inlined_call_operand.vmem [shape: f32[1,128], index: 12, kind: input, shape index: {}]   ;;  %s5842_s13 = inlined_call_operand.vmem [shape: f32[1,128], index: 13, kind: input, shape index: {}]   ;;  %s5843_s15 = inlined_call_operand.vmem [shape: f32[2,1], index: 15, kind: output, shape index: {}]   ;;  %s5844_s4 = inlined_call_operand.vmem [shape: f32[1,256], index: 4, kind: input, shape index: {}]   ;;  %s5845_s14 = inlined_call_operand.<no memory space> [shape: f32[1,1], index: 14, kind: input, shape index: {}]  }
   0x1   :  { %4733 = vset.pattern.permute.xlu2 %v4802_v0  ;;  %4732 = vset.pattern.permute.xlu1 %v4802_v0  ;;  %v3581_v1 = vld [vmem:[%s5830_s1 + $0x30] sm:$0xff]  ;;  %v3579_v2 = vld [vmem:[%s5830_s1 + $0x20] sm:$0xff]  ;;  %v3582_v4 = vld [vmem:[%s5830_s1 + $0x38] sm:$0xff]  ;;  %s56_s28 = sshll.u32 %s5833_s5, 4  ;;  %s58_s30 = sshll.u32 %s4803_s29, 4  ;;  %s57_s28 = int_to_ptr.hbm [resolvable:$true] %s56_s28  ;;  %s59_s30 = int_to_ptr.vmem [resolvable:$true] %s58_s30 }
   0x2   :  { %v91_v3 = vld [vmem:[%s5830_s1] sm:$0xff]  ;;  %4731 = vset.pattern.permute.xlu0 %v4802_v0  ;;  %148 = vperm.xlu1 %4732, %v3581_v1   ;;  %v3580_v5 = vld [vmem:[%s5830_s1 + $0x28] sm:$0xff]  ;;  %v93_v9 = vld [vmem:[%s5830_s1 + $0x10] sm:$0xff]  ;;  %v4968_v36 = vshrl.u32 %v84_v30, 7  ;;  %61 = dma.hbm_to_vmem [thread:$0]  %s57_s28, 14336, %s59_s30, [#allocation5] }
   0x3   :  { %138 = vperm.xlu0 %4731, %v3579_v2   ;;  %97 = vperm.xlu2 %4733, %v91_v3   ;;  %v92_v6 = vld [vmem:[%s5830_s1 + $0x8] sm:$0xff]  ;;  %v3592_v8 = vld [vmem:[%s5830_s1 + $0x40] sm:$0xff]  ;;  %v3594_v10 = vld [vmem:[%s5830_s1 + $0x50] sm:$0xff]  ;;  %s70_s18 = sshll.u32 %s5834_s7, 4  ;;  %s72_s20 = sshll.u32 %s4804_s19, 4  ;;  %s71_s18 = int_to_ptr.hbm [resolvable:$true] %s70_s18  ;;  %s73_s20 = int_to_ptr.vmem [resolvable:$true] %s72_s20 }
   0x4   :  { %v3593_v7 = vld [vmem:[%s5830_s1 + $0x48] sm:$0xff]  ;;  %v94_v11 = vld [vmem:[%s5830_s1 + $0x18] sm:$0xff]  ;;  %v3606_v14 = vld [vmem:[%s5830_s1 + $0x80] sm:$0xff]  ;;  %vm86_vm1 = vcmp.lt.s32.totalorder %v4968_v36, 3  ;;  %vm126_vm3 = vcmp.lt.s32.totalorder %v4968_v36, 2  ;;  %vm280_vm4 = vcmp.lt.s32.totalorder %v4968_v36, 1 }
   0x5   :  { %v3595_v12 = vld [vmem:[%s5830_s1 + $0x58] sm:$0xff]  ;;  %v3607_v13 = vld [vmem:[%s5830_s1 + $0x88] sm:$0xff]  ;;  %v3608_v15 = vld [vmem:[%s5830_s1 + $0x90] sm:$0xff]  ;;  %vm452_vm5 = vcmp.lt.s32.totalorder %v4968_v36, 7  ;;  %vm557_vm6 = vcmp.lt.s32.totalorder %v4968_v36, 6  ;;  %vm662_vm7 = vcmp.lt.s32.totalorder %v4968_v36, 5 }
   0x6   :  { %v3615_v16 = vld [vmem:[%s5830_s1 + $0xa0] sm:$0xff]  ;;  %v3609_v17 = vld [vmem:[%s5830_s1 + $0x98] sm:$0xff]  ;;  %v3616_v18 = vld [vmem:[%s5830_s1 + $0xa8] sm:$0xff]  ;;  %75 = dma.hbm_to_vmem [thread:$0]  %s71_s18, 7168, %s73_s20, [#allocation5 + $0x1] }
   0x7   :  { %v3625_v19 = vld [vmem:[%s5830_s1 + $0xc8] sm:$0xff]  ;;  %v3624_v20 = vld [vmem:[%s5830_s1 + $0xc0] sm:$0xff]  ;;  %v3617_v21 = vld [vmem:[%s5830_s1 + $0xb0] sm:$0xff] }
   0x8   :  { %v3626_v22 = vld [vmem:[%s5830_s1 + $0xd0] sm:$0xff]  ;;  %v3618_v23 = vld [vmem:[%s5830_s1 + $0xb8] sm:$0xff]  ;;  %v121_v25 = vld [vmem:[%s5831_s3] sm:$0xff] }
   0x9   :  { %v3627_v24 = vld [vmem:[%s5830_s1 + $0xd8] sm:$0xff]  ;;  %v222_v26 = vunpack.c.l.b16 %v121_v25  ;;  %v223_v27 = vunpack.c.h.b16 %v121_v25  ;;  %v3583_v33 = vld [vmem:[%s5831_s3 + $0x8] sm:$0xff]  ;;  %v4973_v37 = vld [vmem:[%s5832_s0] sm:$0xff] }
   0xa   :  { %153 = vperm.xlu1 %4732, %v3582_v4   ;;  %v165_v34 = vunpack.c.l.b16 %v3583_v33  ;;  %v166_v35 = vunpack.c.h.b16 %v3583_v33  ;;  %v4978_v38 = vld [vmem:[%s5832_s0 + $0x18] sm:$0xff]  ;;  %v4983_v39 = vld [vmem:[%s5832_s0 + $0x8] sm:$0xff]  ;;  %v80_v43 = vrot.slane %v4973_v37, 5  ;;  %v3596_v49 = vld [vmem:[%s5831_s3 + $0x10] sm:$0xff]  ;;  %v122_v63 = vrot.slane %v4973_v37, 6 }
   0xb   :  { %143 = vperm.xlu0 %4731, %v3580_v5   ;;  %102 = vperm.xlu2 %4733, %v92_v6   ;;  %v224_v28 = vpack.c.b16 %v222_v26, %v222_v26  ;;  %v225_v29 = vpack.c.b16 %v223_v27, %v223_v27  ;;  %v83_v44 = vrot.slane %v4978_v38, 5  ;;  %v81_v47 = vrot.slane %v4983_v39, 5  ;;  %v3601_v2 = vld [vmem:[%s5831_s3 + $0x18] sm:$0xff] }
   0xc   :  { %v167_v40 = vpack.c.b16 %v165_v34, %v165_v34  ;;  %v168_v41 = vpack.c.b16 %v166_v35, %v166_v35  ;;  %v319_v51 = vunpack.c.l.b16 %v3596_v49  ;;  %v320_v52 = vunpack.c.h.b16 %v3596_v49 }
   0xd   :  { %v233_v31 = vsel %vm176_vm0, %v224_v28, 0  ;;  %v236_v32 = vsel %vm176_vm0, %v225_v29, 0  ;;  %v90_v48 = vsel %vm86_vm1, %v83_v44, %v80_v43  ;;  %v89_v50 = vsel %vm86_vm1, %v80_v43, %v81_v47 }
   0xe   :  { %245 = vmatpush.bf16.msra.mxu2 %v233_v31  ;;  %264 = vmatpush.bf16.msra.mxu3 %v236_v32  ;;  %v178_v45 = vsel %vm176_vm0, %v167_v40, 0  ;;  %v181_v46 = vsel %vm176_vm0, %v168_v41, 0  ;;  %v321_v55 = vpack.c.b16 %v319_v51, %v319_v51  ;;  %v322_v56 = vpack.c.b16 %v320_v52, %v320_v52 }
   0xf   :  { %190 = vmatpush.bf16.msra.mxu0 %v178_v45  ;;  %209 = vmatpush.bf16.msra.mxu1 %v181_v46  ;;  %v123_v62 = vrot.slane %v4983_v39, 6  ;;  %v125_v1 = vrot.slane %v4978_v38, 6  ;;  %v386_v3 = vunpack.c.l.b16 %v3601_v2  ;;  %v387_v4 = vunpack.c.h.b16 %v3601_v2  ;;  %v3619_v45 = vld [vmem:[%s5831_s3 + $0x28] sm:$0xff] }
  0x10   :  { %v330_v58 = vsel %vm176_vm0, %v321_v55, 0  ;;  %v333_v59 = vsel %vm176_vm0, %v322_v56, 0  ;;  %v597_v46 = vunpack.c.h.b16 %v3619_v45  ;;  %v277_v49 = vrot.slane %v4983_v39, 7 }
  0x11   :  { %v130_v5 = vsel %vm126_vm3, %v125_v1, %v122_v63  ;;  %v129_v6 = vsel %vm126_vm3, %v122_v63, %v123_v62 }
  0x12   :  { %297 = vperm.xlu1 %4732, %v3593_v7   ;;  %v388_v7 = vpack.c.b16 %v386_v3, %v386_v3  ;;  %v599_v51 = vpack.c.b16 %v597_v46, %v597_v46 }
  0x13   :  { %292 = vperm.xlu0 %4731, %v3592_v8   ;;  %107 = vperm.xlu2 %4733, %v93_v9   ;;  %v389_v8 = vpack.c.b16 %v387_v4, %v387_v4 }
  0x14   :  { %342 = vmatpush.bf16.msrb.mxu0 %v330_v58  ;;  %361 = vmatpush.bf16.msrb.mxu1 %v333_v59  ;;  %v381_v59 = vpack.c.bf16 %v4983_v39, %v4973_v37 }
  0x1a   :  { %302 = vperm.xlu1 %4732, %v3594_v10   ;;  %v397_v10 = vsel %vm176_vm0, %v388_v7, 0 }
  0x1b   :  { %112 = vperm.xlu0 %4731, %v94_v11   ;;  %307 = vperm.xlu2 %4733, %v3595_v12   ;;  %v400_v11 = vsel %vm176_vm0, %v389_v8, 0 }
  0x1c   :  { %409 = vmatpush.bf16.msrb.mxu2 %v397_v10  ;;  %428 = vmatpush.bf16.msrb.mxu3 %v400_v11 }
  0x22   :  { %469 = vperm.xlu1 %4732, %v3607_v13  }
  0x23   :  { %464 = vperm.xlu0 %4731, %v3606_v14   ;;  %474 = vperm.xlu2 %4733, %v3608_v15  }
  0x2a   :  { %569 = vperm.xlu1 %4732, %v3615_v16   ;;  %v5020_v16 = vld [vmem:[%s5832_s0 + $0x10] sm:$0xff] }
  0x2b   :  { %479 = vperm.xlu0 %4731, %v3609_v17   ;;  %574 = vperm.xlu2 %4733, %v3616_v18   ;;  %v3610_v17 = vld [vmem:[%s5831_s3 + $0x20] sm:$0xff] }
  0x2c   :  { %v491_v18 = vunpack.c.l.b16 %v3610_v17 }
  0x32   :  { %679 = vperm.xlu1 %4732, %v3625_v19   ;;  %v492_v19 = vunpack.c.h.b16 %v3610_v17 }
  0x33   :  { %674 = vperm.xlu0 %4731, %v3624_v20   ;;  %579 = vperm.xlu2 %4733, %v3617_v21   ;;  %v82_v20 = vrot.slane %v5020_v16, 5  ;;  %v124_v21 = vrot.slane %v5020_v16, 6 }
  0x35   :  { %v88_v27 = vsel %vm86_vm1, %v81_v47, %v82_v20  ;;  %v128_v28 = vsel %vm126_vm3, %v123_v62, %v124_v21  ;;  %v127_v29 = vsel %vm126_vm3, %v124_v21, %v125_v1  ;;  %v87_v32 = vsel %vm86_vm1, %v82_v20, %v83_v44 }
  0x36   :  { %v596_v44 = vunpack.c.l.b16 %v3619_v45  ;;  %v279_v47 = vrot.slane %v4978_v38, 7  ;;  %v278_v1 = vrot.slane %v5020_v16, 7  ;;  %v553_v20 = vrot.slane %v4973_v37, 2 }
  0x38   :  { %v281_v7 = vsel %vm280_vm4, %v278_v1, %v279_v47  ;;  %v282_v8 = vsel %vm280_vm4, %v277_v49, %v278_v1 }
  0x3a   :  { %684 = vperm.xlu1 %4732, %v3626_v22  }
  0x3b   :  { %584 = vperm.xlu0 %4731, %v3618_v23   ;;  %689 = vperm.xlu2 %4733, %v3627_v24   ;;  %v493_v23 = vpack.c.b16 %v491_v18, %v491_v18  ;;  %v494_v24 = vpack.c.b16 %v492_v19, %v492_v19  ;;  %v449_v18 = vrot.slane %v4983_v39, 1  ;;  %v448_v19 = vrot.slane %v4973_v37, 1 }
  0x3d   :  { %v502_v25 = vsel %vm176_vm0, %v493_v23, 0  ;;  %v505_v26 = vsel %vm176_vm0, %v494_v24, 0  ;;  %v554_v23 = vrot.slane %v4983_v39, 2  ;;  %v555_v24 = vrot.slane %v5020_v16, 2 }
  0x5d   :  { %v98_v42 = vpop.permute.xlu2 %97 }
  0x5e   :  { %v115_v53 = vmul.f32 %v98_v42, %v90_v48  ;;  %v276_v48 = vrot.slane %v4973_v37, 7 }
  0x60   :  { %v283_v55 = vsel %vm280_vm4, %v276_v48, %v277_v49  ;;  %v284_v56 = vsel %vm280_vm4, %v279_v47, %v276_v48 }
  0x65   :  { %v103_v54 = vpop.permute.xlu2 %102 }
  0x66   :  { %v116_v57 = vmul.f32 %v103_v54, %v89_v50  ;;  %v598_v50 = vpack.c.b16 %v596_v44, %v596_v44 }
  0x68   :  { %v119_v60 = vpack.c.bf16 %v116_v57, %v115_v53  ;;  %v607_v52 = vsel %vm176_vm0, %v598_v50, 0  ;;  %v610_v53 = vsel %vm176_vm0, %v599_v51, 0 }
  0x6a   :  { %3588 = vmatmul.msk.bf16.vlgmr.msra.gmra.mxu2 %vm169_vm2, %v119_v60  ;;  %3590 = vmatmul.msk.bf16.vlgmr.msra.gmra.mxu3 %vm169_vm2, %v119_v60 }
  0x6b   :  { %619 = vmatpush.bf16.msra.mxu2 %v607_v52  ;;  %638 = vmatpush.bf16.msra.mxu3 %v610_v53 }
  0x6d   :  { %v108_v30 = vpop.permute.xlu2 %107 }
  0x6e   :  { %v117_v33 = vmul.f32 %v108_v30, %v88_v27 }
  0x74   :  { %v149_v15 = vpop.permute.xlu1 %148 }
  0x75   :  { %v139_v61 = vpop.permute.xlu0 %138  ;;  %v158_v34 = vmul.f32 %v149_v15, %v128_v28  ;;  %v560_v28 = vsel %vm557_vm6, %v553_v20, %v554_v23 }
  0x76   :  { %v156_v12 = vmul.f32 %v139_v61, %v130_v5  ;;  %v3628_v61 = vld [vmem:[%s5831_s3 + $0x30] sm:$0xff] }
  0x77   :  { %v701_v62 = vunpack.c.l.b16 %v3628_v61  ;;  %v702_v63 = vunpack.c.h.b16 %v3628_v61 }
  0x79   :  { %v703_v3 = vpack.c.b16 %v701_v62, %v701_v62  ;;  %v704_v4 = vpack.c.b16 %v702_v63, %v702_v63 }
  0x7b   :  { %v712_v5 = vsel %vm176_vm0, %v703_v3, 0 }
  0x7c   :  { %v154_v31 = vpop.permute.xlu1 %153 }
  0x7d   :  { %v144_v9 = vpop.permute.xlu0 %143  ;;  %v159_v35 = vmul.f32 %v154_v31, %v127_v29  ;;  %v559_v29 = vsel %vm557_vm6, %v554_v23, %v555_v24 }
  0x7e   :  { %v157_v13 = vmul.f32 %v144_v9, %v129_v6  ;;  %v715_v6 = vsel %vm176_vm0, %v704_v4, 0  ;;  %v308_v9 = vpop.permute.xlu2 %307 }
  0x7f   :  { %v161_v42 = vpack.c.bf16 %v159_v35, %v158_v34  ;;  %v313_v10 = vmul.f32 %v308_v9, %v281_v7 }
  0x80   :  { %v160_v14 = vpack.c.bf16 %v157_v13, %v156_v12  ;;  %v382_v13 = vpack.c.bf16 %v4978_v38, %v5020_v16 }
  0x82   :  { %3584 = vmatmul.msk.bf16.vlgmr.msra.gmra.mxu0 %vm169_vm2, %v160_v14  ;;  %3586 = vmatmul.msk.bf16.vlgmr.msra.gmra.mxu1 %vm169_vm2, %v160_v14 }
  0x83   :  { %514 = vmatpush.bf16.msra.mxu0 %v502_v25  ;;  %533 = vmatpush.bf16.msra.mxu1 %v505_v26  ;;  %v455_v26 = vsel %vm452_vm5, %v448_v19, %v449_v18 }
  0x84   :  { %v298_v54 = vpop.permute.xlu1 %297 }
  0x85   :  { %v293_v22 = vpop.permute.xlu0 %292  ;;  %v311_v57 = vmul.f32 %v298_v54, %v283_v55 }
  0x86   :  { %v310_v58 = vmul.f32 %v293_v22, %v284_v56  ;;  %v475_v17 = vpop.permute.xlu2 %474  ;;  %v450_v22 = vrot.slane %v5020_v16, 1  ;;  %v659_v56 = vrot.slane %v4983_v39, 3  ;;  %v661_v39 = vrot.slane %v4978_v38, 3 }
  0x88   :  { %v314_v60 = vpack.c.bf16 %v311_v57, %v310_v58  ;;  %v454_v25 = vsel %vm452_vm5, %v449_v18, %v450_v22  ;;  %v660_v57 = vrot.slane %v5020_v16, 3  ;;  %v658_v58 = vrot.slane %v4973_v37, 3 }
  0x8a   :  { %v665_v61 = vsel %vm662_vm7, %v658_v58, %v659_v56  ;;  %v663_v37 = vsel %vm662_vm7, %v660_v57, %v661_v39  ;;  %v666_v3 = vsel %vm662_vm7, %v661_v39, %v658_v58 }
  0x8c   :  { %v303_v2 = vpop.permute.xlu1 %302 }
  0x8d   :  { %v113_v40 = vpop.permute.xlu0 %112  ;;  %v312_v11 = vmul.f32 %v303_v2, %v282_v8 }
  0x8e   :  { %v118_v41 = vmul.f32 %v113_v40, %v87_v32 }
  0x8f   :  { %v315_v14 = vpack.c.bf16 %v313_v10, %v312_v11 }
  0x90   :  { %v120_v43 = vpack.c.bf16 %v118_v41, %v117_v33  ;;  %v575_v33 = vpop.permute.xlu2 %574 }
  0x91   :  { %v588_v34 = vmul.f32 %v575_v33, %v559_v29 }
  0x92   :  { %3585 = vmatmul.msk.bf16.gmra.mxu0 %vm169_vm2, %v161_v42  ;;  %3587 = vmatmul.msk.bf16.gmra.mxu1 %vm169_vm2, %v161_v42  ;;  %v451_v42 = vrot.slane %v4978_v38, 1 }
  0x93   :  { %3589 = vmatmul.msk.bf16.gmra.mxu2 %vm169_vm2, %v120_v43  ;;  %3591 = vmatmul.msk.bf16.gmra.mxu3 %vm169_vm2, %v120_v43  ;;  %v556_v43 = vrot.slane %v4978_v38, 2 }
  0x94   :  { %v470_v15 = vpop.permute.xlu1 %469  ;;  %v456_v45 = vsel %vm452_vm5, %v451_v42, %v448_v19  ;;  %v453_v47 = vsel %vm452_vm5, %v450_v22, %v451_v42 }
  0x95   :  { %v465_v12 = vpop.permute.xlu0 %464  ;;  %v483_v30 = vmul.f32 %v470_v15, %v454_v25  ;;  %v561_v46 = vsel %vm557_vm6, %v556_v43, %v553_v20  ;;  %v558_v49 = vsel %vm557_vm6, %v555_v24, %v556_v43  ;;  %v484_v52 = vmul.f32 %v475_v17, %v453_v47 }
  0x96   :  { %v482_v31 = vmul.f32 %v465_v12, %v455_v26 }
  0x98   :  { %v486_v35 = vpack.c.bf16 %v483_v30, %v482_v31  ;;  %v580_v48 = vpop.permute.xlu2 %579 }
  0x99   :  { %v589_v53 = vmul.f32 %v580_v48, %v558_v49 }
  0x9c   :  { %v570_v27 = vpop.permute.xlu1 %569 }
  0x9d   :  { %v480_v21 = vpop.permute.xlu0 %479  ;;  %v587_v32 = vmul.f32 %v570_v27, %v560_v28 }
  0x9e   :  { %v485_v50 = vmul.f32 %v480_v21, %v456_v45 }
  0x9f   :  { %v591_v41 = vpack.c.bf16 %v588_v34, %v587_v32 }
  0xa0   :  { %v487_v54 = vpack.c.bf16 %v485_v50, %v484_v52  ;;  %v690_v2 = vpop.permute.xlu2 %689 }
  0xa2   :  { %3597 = vmatmul.msk.bf16.vlgmr.msrb.gmra.mxu0 %vm169_vm2, %v314_v60  ;;  %3599 = vmatmul.msk.bf16.vlgmr.msrb.gmra.mxu1 %vm169_vm2, %v314_v60  ;;  %v664_v60 = vsel %vm662_vm7, %v659_v56, %v660_v57 }
  0xa3   :  { %3602 = vmatmul.msk.bf16.vlgmr.msrb.gmra.mxu2 %vm169_vm2, %v381_v59  ;;  %3604 = vmatmul.msk.bf16.vlgmr.msrb.gmra.mxu3 %vm169_vm2, %v381_v59 }
  0xa4   :  { %724 = vmatpush.bf16.msrb.mxu0 %v712_v5  ;;  %743 = vmatpush.bf16.msrb.mxu1 %v715_v6  ;;  %v680_v59 = vpop.permute.xlu1 %679  ;;  %v695_v5 = vmul.f32 %v690_v2, %v666_v3 }
  0xa5   :  { %v675_v40 = vpop.permute.xlu0 %674  ;;  %v693_v62 = vmul.f32 %v680_v59, %v664_v60 }
  0xa6   :  { %v692_v63 = vmul.f32 %v675_v40, %v665_v61 }
  0xa8   :  { %v696_v1 = vpack.c.bf16 %v693_v62, %v692_v63 }
  0xac   :  { %v685_v16 = vpop.permute.xlu1 %684 }
  0xad   :  { %v585_v44 = vpop.permute.xlu0 %584  ;;  %v694_v4 = vmul.f32 %v685_v16, %v663_v37  ;;  %v763_v37 = vld [vmem:[%s5844_s4] sm:$0x3] }
  0xae   :  { %v590_v51 = vmul.f32 %v585_v44, %v561_v46 }
  0xaf   :  { %v697_v6 = vpack.c.bf16 %v695_v5, %v694_v4  ;;  %v20_v4 = vstv %s5845_s14 }
  0xb0   :  { %v592_v55 = vpack.c.bf16 %v590_v51, %v589_v53  ;;  %21 = vst [vmem:[#allocation6] sm:$0x1] %v20_v4 }
  0xb2   :  { %3598 = vmatmul.msk.bf16.gmra.mxu0 %vm169_vm2, %v315_v14  ;;  %3600 = vmatmul.msk.bf16.gmra.mxu1 %vm169_vm2, %v315_v14 }
  0xb3   :  { %3603 = vmatmul.msk.bf16.gmra.mxu2 %vm169_vm2, %v382_v13  ;;  %3605 = vmatmul.msk.bf16.gmra.mxu3 %vm169_vm2, %v382_v13 }
  0xc2   :  { %3611 = vmatmul.msk.bf16.vlgmr.msra.gmra.mxu0 %vm169_vm2, %v486_v35  ;;  %3613 = vmatmul.msk.bf16.vlgmr.msra.gmra.mxu1 %vm169_vm2, %v486_v35 }
  0xc3   :  { %3620 = vmatmul.msk.bf16.vlgmr.msra.gmra.mxu2 %vm169_vm2, %v591_v41  ;;  %3622 = vmatmul.msk.bf16.vlgmr.msra.gmra.mxu3 %vm169_vm2, %v591_v41 }
  0xd2   :  { %3612 = vmatmul.msk.bf16.gmra.mxu0 %vm169_vm2, %v487_v54  ;;  %3614 = vmatmul.msk.bf16.gmra.mxu1 %vm169_vm2, %v487_v54 }
  0xd3   :  { %3621 = vmatmul.msk.bf16.gmra.mxu2 %vm169_vm2, %v592_v55  ;;  %3623 = vmatmul.msk.bf16.gmra.mxu3 %vm169_vm2, %v592_v55 }
  0xe2   :  { %3629 = vmatmul.msk.bf16.vlgmr.msrb.gmra.mxu0 %vm169_vm2, %v696_v1  ;;  %3631 = vmatmul.msk.bf16.vlgmr.msrb.gmra.mxu1 %vm169_vm2, %v696_v1 }
  0xed   :  { %v247_v38 = vpop.f32.mrf.mxu2  ;;  %v266_v7 = vpop.f32.mrf.mxu3 }
  0xf2   :  { %3630 = vmatmul.msk.bf16.gmra.mxu0 %vm169_vm2, %v697_v6  ;;  %3632 = vmatmul.msk.bf16.gmra.mxu1 %vm169_vm2, %v697_v6 }
  0xf5   :  { %v249_v12 = vpop.f32.mrf.mxu2  ;;  %v268_v13 = vpop.f32.mrf.mxu3 }
  0xff   :  { %v192_v8 = vpop.f32.mrf.mxu0  ;;  %v211_v9 = vpop.f32.mrf.mxu1 }
 0x100   :  { %v248_v10 = vadd.f32 %v247_v38, %v192_v8  ;;  %v267_v11 = vadd.f32 %v266_v7, %v211_v9  ;;  %v765_v8 = vperm.slane %v763_v37, 0  ;;  %v766_v9 = vperm.slane %v763_v37, 1 }
 0x107   :  { %v194_v14 = vpop.f32.mrf.mxu0  ;;  %v213_v15 = vpop.f32.mrf.mxu1 }
 0x108   :  { %v250_v17 = vadd.f32 %v249_v12, %v194_v14  ;;  %v269_v18 = vadd.f32 %v268_v13, %v213_v15 }
 0x10f   :  { %v197_v19 = vpop.f32.mrf.mxu0  ;;  %v216_v20 = vpop.f32.mrf.mxu1 }
 0x116   :  { %v252_v21 = vpop.f32.mrf.mxu2  ;;  %v271_v22 = vpop.f32.mrf.mxu3 }
 0x117   :  { %v253_v23 = vadd.f32 %v252_v21, %v197_v19  ;;  %v272_v24 = vadd.f32 %v271_v22, %v216_v20  ;;  %v5137_v25 = vpop.f32.mrf.mxu0  ;;  %v5139_v26 = vpop.f32.mrf.mxu1 }
 0x11e   :  { %v5141_v31 = vpop.f32.mrf.mxu2  ;;  %v5143_v32 = vpop.f32.mrf.mxu3 }
 0x11f   :  { %v344_v27 = vpop.f32.mrf.mxu0  ;;  %v363_v28 = vpop.f32.mrf.mxu1 }
 0x120   :  { %v373_v29 = vadd.f32 %v344_v27, %v248_v10  ;;  %v374_v30 = vadd.f32 %v363_v28, %v267_v11 }
 0x126   :  { %v411_v41 = vpop.f32.mrf.mxu2  ;;  %v430_v42 = vpop.f32.mrf.mxu3 }
 0x127   :  { %v346_v33 = vpop.f32.mrf.mxu0  ;;  %v365_v34 = vpop.f32.mrf.mxu1  ;;  %v440_v39 = vadd.f32 %v411_v41, %v373_v29  ;;  %v441_v16 = vadd.f32 %v430_v42, %v374_v30 }
 0x128   :  { %v375_v35 = vadd.f32 %v346_v33, %v250_v17  ;;  %v376_v40 = vadd.f32 %v365_v34, %v269_v18 }
 0x12e   :  { %v413_v47 = vpop.f32.mrf.mxu2  ;;  %v432_v48 = vpop.f32.mrf.mxu3 }
 0x12f   :  { %v349_v43 = vpop.f32.mrf.mxu0  ;;  %v368_v45 = vpop.f32.mrf.mxu1  ;;  %v442_v14 = vadd.f32 %v413_v47, %v375_v35  ;;  %v443_v15 = vadd.f32 %v432_v48, %v376_v40 }
 0x130   :  { %v377_v44 = vadd.f32 %v349_v43, %v253_v23  ;;  %v378_v46 = vadd.f32 %v368_v45, %v272_v24 }
 0x136   :  { %v416_v53 = vpop.f32.mrf.mxu2  ;;  %v435_v54 = vpop.f32.mrf.mxu3 }
 0x137   :  { %v5145_v49 = vpop.f32.mrf.mxu0  ;;  %v5147_v50 = vpop.f32.mrf.mxu1  ;;  %v444_v41 = vadd.f32 %v416_v53, %v377_v44  ;;  %v445_v42 = vadd.f32 %v435_v54, %v378_v46 }
 0x13e   :  { %v418_v57 = vpop.f32.mrf.mxu2  ;;  %v437_v58 = vpop.f32.mrf.mxu3 }
 0x13f   :  { %v516_v51 = vpop.f32.mrf.mxu0  ;;  %v535_v52 = vpop.f32.mrf.mxu1 }
 0x140   :  { %v545_v2 = vadd.f32 %v516_v51, %v440_v39  ;;  %v546_v3 = vadd.f32 %v535_v52, %v441_v16  ;;  %v255_v51 = vadd.f32 %v5141_v31, %v5137_v25  ;;  %v274_v52 = vadd.f32 %v5143_v32, %v5139_v26 }
 0x142   :  { %v379_v44 = vadd.f32 %v5145_v49, %v255_v51  ;;  %v380_v46 = vadd.f32 %v5147_v50, %v274_v52 }
 0x146   :  { %v621_v61 = vpop.f32.mrf.mxu2  ;;  %v640_v62 = vpop.f32.mrf.mxu3 }
 0x147   :  { %v518_v55 = vpop.f32.mrf.mxu0  ;;  %v537_v56 = vpop.f32.mrf.mxu1  ;;  %v650_v5 = vadd.f32 %v621_v61, %v545_v2  ;;  %v651_v6 = vadd.f32 %v640_v62, %v546_v3 }
 0x148   :  { %v547_v19 = vadd.f32 %v518_v55, %v442_v14  ;;  %v548_v20 = vadd.f32 %v537_v56, %v443_v15 }
 0x14e   :  { %v623_v38 = vpop.f32.mrf.mxu2  ;;  %v642_v7 = vpop.f32.mrf.mxu3 }
 0x14f   :  { %v521_v59 = vpop.f32.mrf.mxu0  ;;  %v540_v60 = vpop.f32.mrf.mxu1  ;;  %v652_v23 = vadd.f32 %v623_v38, %v547_v19  ;;  %v653_v24 = vadd.f32 %v642_v7, %v548_v20 }
 0x150   :  { %v549_v43 = vadd.f32 %v521_v59, %v444_v41  ;;  %v550_v45 = vadd.f32 %v540_v60, %v445_v42  ;;  %v446_v59 = vadd.f32 %v418_v57, %v379_v44  ;;  %v447_v60 = vadd.f32 %v437_v58, %v380_v46 }
 0x156   :  { %v626_v33 = vpop.f32.mrf.mxu2  ;;  %v645_v34 = vpop.f32.mrf.mxu3 }
 0x157   :  { %v523_v63 = vpop.f32.mrf.mxu0  ;;  %v542_v1 = vpop.f32.mrf.mxu1  ;;  %v654_v55 = vadd.f32 %v626_v33, %v549_v43  ;;  %v655_v56 = vadd.f32 %v645_v34, %v550_v45 }
 0x158   :  { %v551_v25 = vadd.f32 %v523_v63, %v446_v59  ;;  %v552_v31 = vadd.f32 %v542_v1, %v447_v60 }
 0x15e   :  { %v628_v37 = vpop.f32.mrf.mxu2  ;;  %v647_v2 = vpop.f32.mrf.mxu3 }
 0x15f   :  { %v726_v10 = vpop.f32.mrf.mxu0  ;;  %v745_v11 = vpop.f32.mrf.mxu1  ;;  %v656_v32 = vadd.f32 %v628_v37, %v551_v25  ;;  %v657_v4 = vadd.f32 %v647_v2, %v552_v31 }
 0x160   :  { %v755_v12 = vadd.f32 %v726_v10, %v650_v5  ;;  %v756_v13 = vadd.f32 %v745_v11, %v651_v6 }
 0x162   :  { %v769_v17 = vadd.f32 %v765_v8, %v755_v12  ;;  %v770_v18 = vadd.f32 %v766_v9, %v756_v13 }
 0x164   :  { %v5155_v21 = vmax.f32 %v769_v17, 0.0  ;;  %v5157_v22 = vmax.f32 %v770_v18, 0.0 }
 0x167   :  { %v728_v27 = vpop.f32.mrf.mxu0  ;;  %v747_v28 = vpop.f32.mrf.mxu1 }
 0x168   :  { %v757_v29 = vadd.f32 %v728_v27, %v652_v23  ;;  %v758_v30 = vadd.f32 %v747_v28, %v653_v24 }
 0x16a   :  { %v771_v35 = vadd.f32 %v765_v8, %v757_v29  ;;  %v772_v40 = vadd.f32 %v766_v9, %v758_v30 }
 0x16c   :  { %v5159_v47 = vmax.f32 %v771_v35, 0.0  ;;  %v5161_v48 = vmax.f32 %v772_v40, 0.0 }
 0x16f   :  { %v731_v61 = vpop.f32.mrf.mxu0  ;;  %v750_v62 = vpop.f32.mrf.mxu1 }
 0x170   :  { %v759_v53 = vadd.f32 %v731_v61, %v654_v55  ;;  %v760_v54 = vadd.f32 %v750_v62, %v655_v56 }
 0x172   :  { %v773_v39 = vadd.f32 %v765_v8, %v759_v53  ;;  %v774_v16 = vadd.f32 %v766_v9, %v760_v54 }
 0x174   :  { %v5169_v3 = vmax.f32 %v773_v39, 0.0  ;;  %v5171_v26 = vmax.f32 %v774_v16, 0.0 }
 0x177   :  { %v733_v5 = vpop.f32.mrf.mxu0  ;;  %v752_v49 = vpop.f32.mrf.mxu1 }
 0x178   :  { %v761_v6 = vadd.f32 %v733_v5, %v656_v32  ;;  %v762_v50 = vadd.f32 %v752_v49, %v657_v4 }
 0x17a   :  { %v775_v38 = vadd.f32 %v765_v8, %v761_v6  ;;  %v776_v7 = vadd.f32 %v766_v9, %v762_v50 }
 0x17c   :  { %v5173_v57 = vmax.f32 %v775_v38, 0.0  ;;  %v5175_v58 = vmax.f32 %v776_v7, 0.0 }
 0x17d   :  { %4798 = dma.done.wait [#allocation5], 14336 }
 0x17e   :  { %4799 = vsyncadd [#allocation5], 4294952960  ;;  %4736 = vset.pattern.permute.xlu2 %v4802_v0  ;;  %4735 = vset.pattern.permute.xlu1 %v4802_v0  ;;  %v3637_v63 = vld [vmem:[%s5830_s1 + $0x40] sm:$0xff]  ;;  %v807_v1 = vld [vmem:[%s5830_s1 + $0x10] sm:$0xff]  ;;  %v901_v61 = vrot.slane %v5155_v21, 7  ;;  %v902_v62 = vrot.slane %v5157_v22, 7 }
 0x17f   :  { %4734 = vset.pattern.permute.xlu0 %v4802_v0  ;;  %v805_v8 = vld [vmem:[%s5830_s1] sm:$0xff]  ;;  %923 = vperm.xlu2 %4736, %v3637_v63   ;;  %v3638_v9 = vld [vmem:[%s5830_s1 + $0x48] sm:$0xff]  ;;  %v808_v10 = vld [vmem:[%s5830_s1 + $0x18] sm:$0xff]  ;;  %v907_v44 = vrot.slane %v5173_v57, 7  ;;  %v908_v46 = vrot.slane %v5175_v58, 7  ;;  %v903_v6 = vrot.slane %v5159_v47, 7 }
 0x180   :  { %821 = vperm.xlu1 %4735, %v807_v1   ;;  %811 = vperm.xlu0 %4734, %v805_v8   ;;  %v806_v11 = vld [vmem:[%s5830_s1 + $0x8] sm:$0xff]  ;;  %v3639_v12 = vld [vmem:[%s5830_s1 + $0x50] sm:$0xff]  ;;  %v3633_v14 = vld [vmem:[%s5830_s1 + $0x20] sm:$0xff]  ;;  %v904_v50 = vrot.slane %v5161_v48, 7 }
 0x181   :  { %v3634_v13 = vld [vmem:[%s5830_s1 + $0x28] sm:$0xff]  ;;  %v3636_v15 = vld [vmem:[%s5830_s1 + $0x38] sm:$0xff]  ;;  %v3635_v17 = vld [vmem:[%s5830_s1 + $0x30] sm:$0xff]  ;;  %v915_v39 = vsel %vm280_vm4, %v907_v44, %v901_v61  ;;  %v916_v16 = vsel %vm280_vm4, %v908_v46, %v902_v62  ;;  %v913_v8 = vsel %vm280_vm4, %v901_v61, %v903_v6  ;;  %v789_v61 = vrot.slane %v5155_v21, 5 }
 0x182   :  { %v3640_v18 = vld [vmem:[%s5830_s1 + $0x58] sm:$0xff]  ;;  %v3643_v19 = vld [vmem:[%s5830_s1 + $0x90] sm:$0xff]  ;;  %v3642_v20 = vld [vmem:[%s5830_s1 + $0x88] sm:$0xff] }
 0x183   :  { %v3641_v23 = vld [vmem:[%s5830_s1 + $0x80] sm:$0xff]  ;;  %v3650_v24 = vld [vmem:[%s5830_s1 + $0xc8] sm:$0xff]  ;;  %v3644_v28 = vld [vmem:[%s5830_s1 + $0x98] sm:$0xff] }
 0x184   :  { %v3649_v27 = vld [vmem:[%s5830_s1 + $0xc0] sm:$0xff]  ;;  %v3651_v29 = vld [vmem:[%s5830_s1 + $0xd0] sm:$0xff]  ;;  %v3646_v30 = vld [vmem:[%s5830_s1 + $0xa8] sm:$0xff] }
 0x185   :  { %v3645_v33 = vld [vmem:[%s5830_s1 + $0xa0] sm:$0xff]  ;;  %v3648_v34 = vld [vmem:[%s5830_s1 + $0xb8] sm:$0xff]  ;;  %v3647_v41 = vld [vmem:[%s5830_s1 + $0xb0] sm:$0xff] }
 0x186   :  { %v3652_v42 = vld [vmem:[%s5830_s1 + $0xd8] sm:$0xff]  ;;  %v4552_v43 = vld [vmem:[#allocation3 + $0x30] sm:$0xff]  ;;  %v4551_v51 = vld [vmem:[#allocation3 + $0x28] sm:$0xff] }
 0x187   :  { %928 = vperm.xlu2 %4736, %v3638_v9   ;;  %v4553_v35 = vld [vmem:[#allocation3 + $0x38] sm:$0xff]  ;;  %v4560_v45 = vld [vmem:[#allocation3 + $0x70] sm:$0xff]  ;;  %v4559_v52 = vld [vmem:[#allocation3 + $0x68] sm:$0xff]  ;;  %v914_v9 = vsel %vm280_vm4, %v902_v62, %v904_v50 }
 0x188   :  { %826 = vperm.xlu1 %4735, %v808_v10   ;;  %816 = vperm.xlu0 %4734, %v806_v11   ;;  %v4561_v40 = vld [vmem:[#allocation3 + $0x78] sm:$0xff]  ;;  %v4550_v53 = vld [vmem:[#allocation3 + $0x20] sm:$0xff]  ;;  %v4568_v59 = vld [vmem:[#allocation3 + $0xb0] sm:$0xff] }
 0x189   :  { %2201 = vmatpush.bf16.msrb.mxu2 %v4553_v35  ;;  %2220 = vmatpush.bf16.msrb.mxu3 %v4561_v40  ;;  %v4569_v55 = vld [vmem:[#allocation3 + $0xb8] sm:$0xff]  ;;  %v4558_v54 = vld [vmem:[#allocation3 + $0x60] sm:$0xff]  ;;  %v4576_v60 = vld [vmem:[#allocation3 + $0xf0] sm:$0xff] }
 0x18a   :  { %v4577_v56 = vld [vmem:[#allocation3 + $0xf8] sm:$0xff]  ;;  %2239 = vmatpush.bf16.msra.mxu0 %v4569_v55  ;;  %v4567_v25 = vld [vmem:[#allocation3 + $0xa8] sm:$0xff]  ;;  %v4548_v38 = vld [vmem:[#allocation3 + $0x10] sm:$0xff]  ;;  %v793_v55 = vrot.slane %v5169_v3, 5 }
 0x18b   :  { %2258 = vmatpush.bf16.msra.mxu1 %v4577_v56  ;;  %v4549_v37 = vld [vmem:[#allocation3 + $0x18] sm:$0xff]  ;;  %v4575_v32 = vld [vmem:[#allocation3 + $0xe8] sm:$0xff]  ;;  %v4556_v7 = vld [vmem:[#allocation3 + $0x50] sm:$0xff]  ;;  %v794_v56 = vrot.slane %v5171_v26, 5 }
 0x18c   :  { %v4557_v2 = vld [vmem:[#allocation3 + $0x58] sm:$0xff]  ;;  %v4566_v63 = vld [vmem:[#allocation3 + $0xa0] sm:$0xff]  ;;  %v4547_v10 = vld [vmem:[#allocation3 + $0x8] sm:$0xff] }
 0x18d   :  { %2202 = vmatpush.bf16.msrb.mxu2 %v4552_v43  ;;  %2221 = vmatpush.bf16.msrb.mxu3 %v4560_v45  ;;  %v4574_v1 = vld [vmem:[#allocation3 + $0xe0] sm:$0xff]  ;;  %v4555_v11 = vld [vmem:[#allocation3 + $0x48] sm:$0xff]  ;;  %v849_v43 = vrot.slane %v5169_v3, 6  ;;  %v850_v45 = vrot.slane %v5171_v26, 6 }
 0x18e   :  { %2240 = vmatpush.bf16.msra.mxu0 %v4568_v59  ;;  %v796_v59 = vrot.slane %v5175_v58, 5 }
 0x18f   :  { %933 = vperm.xlu2 %4736, %v3639_v12   ;;  %2259 = vmatpush.bf16.msra.mxu1 %v4576_v60  ;;  %v4565_v12 = vld [vmem:[#allocation3 + $0x98] sm:$0xff]  ;;  %v852_v60 = vrot.slane %v5175_v58, 6 }
 0x190   :  { %872 = vperm.xlu1 %4735, %v3634_v13   ;;  %867 = vperm.xlu0 %4734, %v3633_v14   ;;  %v4573_v14 = vld [vmem:[#allocation3 + $0xd8] sm:$0xff] }
 0x191   :  { %2203 = vmatpush.bf16.msrb.mxu2 %v4551_v51  ;;  %2222 = vmatpush.bf16.msrb.mxu3 %v4559_v52  ;;  %v4593_v51 = vld [vmem:[#allocation3 + $0x178] sm:$0xff]  ;;  %v851_v52 = vrot.slane %v5173_v57, 6 }
 0x192   :  { %2241 = vmatpush.bf16.msra.mxu0 %v4567_v25  ;;  %v4570_v25 = vld [vmem:[#allocation3 + $0xc0] sm:$0xff] }
 0x193   :  { %2260 = vmatpush.bf16.msra.mxu1 %v4575_v32  ;;  %v853_v32 = vsel %vm126_vm3, %v849_v43, %v851_v52 }
 0x195   :  { %2204 = vmatpush.bf16.msrb.mxu2 %v4550_v53  ;;  %2223 = vmatpush.bf16.msrb.mxu3 %v4558_v54  ;;  %v790_v53 = vrot.slane %v5157_v22, 5  ;;  %v795_v54 = vrot.slane %v5173_v57, 5 }
 0x196   :  { %2242 = vmatpush.bf16.msra.mxu0 %v4566_v63 }
 0x197   :  { %882 = vperm.xlu2 %4736, %v3636_v15   ;;  %2261 = vmatpush.bf16.msra.mxu1 %v4574_v1  ;;  %v970_v1 = vrot.slane %v5171_v26, 1 }
 0x198   :  { %877 = vperm.xlu1 %4735, %v3635_v17   ;;  %938 = vperm.xlu0 %4734, %v3640_v18   ;;  %v905_v18 = vrot.slane %v5169_v3, 7 }
 0x199   :  { %2205 = vmatpush.bf16.msrb.mxu2 %v4549_v37  ;;  %2224 = vmatpush.bf16.msrb.mxu3 %v4557_v2  ;;  %v4584_v37 = vld [vmem:[#allocation3 + $0x130] sm:$0xff]  ;;  %v4562_v2 = vld [vmem:[#allocation3 + $0x80] sm:$0xff] }
 0x19a   :  { %2243 = vmatpush.bf16.msra.mxu0 %v4565_v12  ;;  %v4601_v12 = vld [vmem:[#allocation3 + $0x1b8] sm:$0xff] }
 0x19b   :  { %2262 = vmatpush.bf16.msra.mxu1 %v4573_v14 }
 0x19d   :  { %2206 = vmatpush.bf16.msrb.mxu2 %v4548_v38  ;;  %2225 = vmatpush.bf16.msrb.mxu3 %v4556_v7  ;;  %v969_v38 = vrot.slane %v5169_v3, 1 }
 0x19f   :  { %997 = vperm.xlu2 %4736, %v3643_v19   ;;  %v906_v19 = vrot.slane %v5171_v26, 7 }
 0x1a0   :  { %992 = vperm.xlu1 %4735, %v3642_v20   ;;  %987 = vperm.xlu0 %4734, %v3641_v23   ;;  %v4546_v23 = vld [vmem:[#allocation3] sm:$0xff] }
 0x1a1   :  { %2207 = vmatpush.bf16.msrb.mxu2 %v4547_v10  ;;  %2226 = vmatpush.bf16.msrb.mxu3 %v4555_v11  ;;  %v4583_v10 = vld [vmem:[#allocation3 + $0x128] sm:$0xff] }
 0x1a2   :  { %v4591_v11 = vld [vmem:[#allocation3 + $0x168] sm:$0xff] }
 0x1a5   :  { %2208 = vmatpush.bf16.msrb.mxu2 %v4546_v23  ;;  %v4609_v23 = vld [vmem:[#allocation3 + $0x1f8] sm:$0xff] }
 0x1a7   :  { %1104 = vperm.xlu2 %4736, %v3650_v24   ;;  %v4554_v24 = vld [vmem:[#allocation3 + $0x40] sm:$0xff] }
 0x1a8   :  { %1099 = vperm.xlu1 %4735, %v3649_v27   ;;  %1002 = vperm.xlu0 %4734, %v3644_v28   ;;  %v4564_v27 = vld [vmem:[#allocation3 + $0x90] sm:$0xff] }
 0x1a9   :  { %v4572_v28 = vld [vmem:[#allocation3 + $0xd0] sm:$0xff]  ;;  %2227 = vmatpush.bf16.msrb.mxu3 %v4554_v24  ;;  %2244 = vmatpush.bf16.msra.mxu0 %v4564_v27 }
 0x1aa   :  { %2263 = vmatpush.bf16.msra.mxu1 %v4572_v28 }
 0x1ad   :  { %2296 = vmatpush.bf16.msra.mxu3 %v4593_v51  ;;  %v797_v51 = vsel %vm86_vm1, %v793_v55, %v795_v54 }
 0x1af   :  { %1109 = vperm.xlu2 %4736, %v3651_v29   ;;  %v911_v29 = vsel %vm280_vm4, %v903_v6, %v905_v18  ;;  %v803_v6 = vsel %vm86_vm1, %v795_v54, %v789_v61 }
 0x1b0   :  { %1048 = vperm.xlu1 %4735, %v3646_v30   ;;  %1043 = vperm.xlu0 %4734, %v3645_v33   ;;  %v912_v30 = vsel %vm280_vm4, %v904_v50, %v906_v19  ;;  %v804_v50 = vsel %vm86_vm1, %v796_v59, %v790_v53 }
 0x1b7   :  { %1058 = vperm.xlu2 %4736, %v3648_v34   ;;  %v4585_v34 = vld [vmem:[#allocation3 + $0x138] sm:$0xff] }
 0x1b8   :  { %1053 = vperm.xlu1 %4735, %v3647_v41   ;;  %1114 = vperm.xlu0 %4734, %v3652_v42   ;;  %v4563_v41 = vld [vmem:[#allocation3 + $0x88] sm:$0xff] }
 0x1b9   :  { %v4571_v42 = vld [vmem:[#allocation3 + $0xc8] sm:$0xff]  ;;  %2277 = vmatpush.bf16.msra.mxu2 %v4585_v34  ;;  %2245 = vmatpush.bf16.msra.mxu0 %v4563_v41  ;;  %v4590_v34 = vld [vmem:[#allocation3 + $0x160] sm:$0xff]  ;;  %v4600_v41 = vld [vmem:[#allocation3 + $0x1b0] sm:$0xff] }
 0x1ba   :  { %2264 = vmatpush.bf16.msra.mxu1 %v4571_v42 }
 0x1bd   :  { %2278 = vmatpush.bf16.msra.mxu2 %v4584_v37  ;;  %2246 = vmatpush.bf16.msra.mxu0 %v4562_v2 }
 0x1be   :  { %2265 = vmatpush.bf16.msra.mxu1 %v4570_v25  ;;  %v1079_v25 = vrot.slane %v5159_v47, 3 }
 0x1c1   :  { %2279 = vmatpush.bf16.msra.mxu2 %v4583_v10  ;;  %2315 = vmatpush.bf16.msrb.mxu0 %v4601_v12  ;;  %v848_v12 = vrot.slane %v5161_v48, 6 }
 0x1c2   :  { %2334 = vmatpush.bf16.msrb.mxu1 %v4609_v23  ;;  %v4598_v23 = vld [vmem:[#allocation3 + $0x1a0] sm:$0xff] }
 0x1c5   :  { %2316 = vmatpush.bf16.msrb.mxu0 %v4600_v41 }
 0x1d9   :  { %v924_v31 = vpop.permute.xlu2 %923 }
 0x1da   :  { %v941_v4 = vmul.f32 %v924_v31, %v915_v39  ;;  %v942_v5 = vmul.f32 %v924_v31, %v916_v16  ;;  %v791_v39 = vrot.slane %v5159_v47, 5  ;;  %v792_v16 = vrot.slane %v5161_v48, 5  ;;  %v4592_v31 = vld [vmem:[#allocation3 + $0x170] sm:$0xff] }
 0x1db   :  { %2297 = vmatpush.bf16.msra.mxu3 %v4592_v31  ;;  %v1080_v31 = vrot.slane %v5161_v48, 3 }
 0x1dc   :  { %v949_v49 = vpack.c.bf16 %v942_v5, %v941_v4  ;;  %v854_v4 = vsel %vm126_vm3, %v850_v45, %v852_v60  ;;  %v799_v5 = vsel %vm86_vm1, %v791_v39, %v793_v55  ;;  %v801_v37 = vsel %vm86_vm1, %v789_v61, %v791_v39 }
 0x1dd   :  { %v802_v2 = vsel %vm86_vm1, %v790_v53, %v792_v16  ;;  %v1081_v55 = vrot.slane %v5169_v3, 3  ;;  %v845_v61 = vrot.slane %v5155_v21, 6  ;;  %v846_v39 = vrot.slane %v5157_v22, 6 }
 0x1de   :  { %953 = vst [vmem:[#allocation2 + $0x10] sm:$0xff] %v949_v49  ;;  %v800_v49 = vsel %vm86_vm1, %v792_v16, %v794_v56 }
 0x1df   :  { %2298 = vmatpush.bf16.msra.mxu3 %v4591_v11  ;;  %v847_v11 = vrot.slane %v5159_v47, 6 }
 0x1e1   :  { %v929_v13 = vpop.permute.xlu2 %928 }
 0x1e2   :  { %v943_v15 = vmul.f32 %v929_v13, %v913_v8  ;;  %v944_v17 = vmul.f32 %v929_v13, %v914_v9  ;;  %v971_v8 = vrot.slane %v5173_v57, 1  ;;  %v972_v9 = vrot.slane %v5175_v58, 1 }
 0x1e3   :  { %2299 = vmatpush.bf16.msra.mxu3 %v4590_v34  ;;  %v860_v34 = vsel %vm126_vm3, %v852_v60, %v846_v39 }
 0x1e4   :  { %v950_v20 = vpack.c.bf16 %v944_v17, %v943_v15  ;;  %v973_v42 = vsel %vm452_vm5, %v969_v38, %v971_v8 }
 0x1e6   :  { %954 = vst [vmem:[#allocation2 + $0x48] sm:$0xff] %v950_v20 }
 0x1e9   :  { %v934_v33 = vpop.permute.xlu2 %933 }
 0x1ea   :  { %v945_v35 = vmul.f32 %v934_v33, %v911_v29  ;;  %v946_v40 = vmul.f32 %v934_v33, %v912_v30  ;;  %v4582_v33 = vld [vmem:[#allocation3 + $0x120] sm:$0xff] }
 0x1eb   :  { %2280 = vmatpush.bf16.msra.mxu2 %v4582_v33  ;;  %v859_v33 = vsel %vm126_vm3, %v851_v52, %v845_v61 }
 0x1ec   :  { %v951_v62 = vpack.c.bf16 %v946_v40, %v945_v35  ;;  %v974_v35 = vsel %vm452_vm5, %v970_v1, %v972_v9  ;;  %v4608_v40 = vld [vmem:[#allocation3 + $0x1f0] sm:$0xff] }
 0x1ed   :  { %2335 = vmatpush.bf16.msrb.mxu1 %v4608_v40  ;;  %v4587_v40 = vld [vmem:[#allocation3 + $0x148] sm:$0xff] }
 0x1ee   :  { %955 = vst [vmem:[#allocation2 + $0x80] sm:$0xff] %v951_v62  ;;  %v798_v62 = vsel %vm86_vm1, %v794_v56, %v796_v59  ;;  %v1082_v59 = vrot.slane %v5171_v26, 3 }
 0x1f1   :  { %v883_v7 = vpop.permute.xlu2 %882 }
 0x1f2   :  { %v822_v63 = vpop.permute.xlu1 %821  ;;  %v891_v13 = vmul.f32 %v883_v7, %v853_v32  ;;  %v892_v14 = vmul.f32 %v883_v7, %v854_v4  ;;  %v812_v20 = vpop.permute.xlu0 %811  ;;  %v4581_v32 = vld [vmem:[#allocation3 + $0x118] sm:$0xff]  ;;  %v4607_v7 = vld [vmem:[#allocation3 + $0x1e8] sm:$0xff] }
 0x1f3   :  { %v833_v15 = vmul.f32 %v822_v63, %v799_v5  ;;  %v834_v17 = vmul.f32 %v822_v63, %v800_v49  ;;  %v829_v24 = vmul.f32 %v812_v20, %v803_v6  ;;  %v830_v27 = vmul.f32 %v812_v20, %v804_v50  ;;  %v4589_v4 = vld [vmem:[#allocation3 + $0x158] sm:$0xff]  ;;  %v4599_v5 = vld [vmem:[#allocation3 + $0x1a8] sm:$0xff]  ;;  %2281 = vmatpush.bf16.msra.mxu2 %v4581_v32  ;;  %v4588_v20 = vld [vmem:[#allocation3 + $0x150] sm:$0xff] }
 0x1f4   :  { %v896_v28 = vpack.c.bf16 %v892_v14, %v891_v13  ;;  %2317 = vmatpush.bf16.msrb.mxu0 %v4599_v5  ;;  %2336 = vmatpush.bf16.msrb.mxu1 %v4607_v7  ;;  %v4605_v32 = vld [vmem:[#allocation3 + $0x1d8] sm:$0xff]  ;;  %v1084_v5 = vrot.slane %v5175_v58, 3  ;;  %v4586_v7 = vld [vmem:[#allocation3 + $0x140] sm:$0xff] }
 0x1f5   :  { %v839_v29 = vpack.c.bf16 %v834_v17, %v833_v15  ;;  %v837_v30 = vpack.c.bf16 %v830_v27, %v829_v24  ;;  %2300 = vmatpush.bf16.msra.mxu3 %v4589_v4  ;;  %v4580_v17 = vld [vmem:[#allocation3 + $0x110] sm:$0xff]  ;;  %v1087_v24 = vsel %vm662_vm7, %v1079_v25, %v1081_v55  ;;  %v4606_v27 = vld [vmem:[#allocation3 + $0x1e0] sm:$0xff] }
 0x1f6   :  { %900 = vst [vmem:[#allocation2 + $0xb0] sm:$0xff] %v896_v28  ;;  %v1088_v28 = vsel %vm662_vm7, %v1080_v31, %v1082_v59 }
 0x1f7   :  { %843 = vst [vmem:[#allocation2 + $0x70] sm:$0xff] %v839_v29  ;;  %v857_v29 = vsel %vm126_vm3, %v845_v61, %v847_v11  ;;  %2282 = vmatpush.bf16.msra.mxu2 %v4580_v17  ;;  %v1083_v61 = vrot.slane %v5173_v57, 3 }
 0x1f8   :  { %841 = vst [vmem:[#allocation2] sm:$0xff] %v837_v30  ;;  %v858_v30 = vsel %vm126_vm3, %v846_v39, %v848_v12  ;;  %2318 = vmatpush.bf16.msrb.mxu0 %v4598_v23  ;;  %2337 = vmatpush.bf16.msrb.mxu1 %v4606_v27  ;;  %v1027_v23 = vrot.slane %v5173_v57, 2 }
 0x1f9   :  { %v998_v54 = vpop.permute.xlu2 %997  ;;  %2301 = vmatpush.bf16.msra.mxu3 %v4588_v20 }
 0x1fa   :  { %v827_v56 = vpop.permute.xlu1 %826  ;;  %v1009_v53 = vmul.f32 %v998_v54, %v973_v42  ;;  %v1010_v16 = vmul.f32 %v998_v54, %v974_v35  ;;  %v817_v50 = vpop.permute.xlu0 %816  ;;  %v4579_v35 = vld [vmem:[#allocation3 + $0x108] sm:$0xff] }
 0x1fb   :  { %v835_v49 = vmul.f32 %v827_v56, %v797_v51  ;;  %v836_v6 = vmul.f32 %v827_v56, %v798_v62  ;;  %v831_v63 = vmul.f32 %v817_v50, %v801_v37  ;;  %v832_v10 = vmul.f32 %v817_v50, %v802_v2  ;;  %v4597_v51 = vld [vmem:[#allocation3 + $0x198] sm:$0xff]  ;;  %2283 = vmatpush.bf16.msra.mxu2 %v4579_v35  ;;  %v4578_v50 = vld [vmem:[#allocation3 + $0x100] sm:$0xff] }
 0x1fc   :  { %v1015_v13 = vpack.c.bf16 %v1010_v16, %v1009_v53  ;;  %2319 = vmatpush.bf16.msrb.mxu0 %v4597_v51  ;;  %2338 = vmatpush.bf16.msrb.mxu1 %v4605_v32  ;;  %v855_v16 = vsel %vm126_vm3, %v847_v11, %v849_v43  ;;  %v909_v43 = vsel %vm280_vm4, %v905_v18, %v907_v44  ;;  %v4604_v11 = vld [vmem:[#allocation3 + $0x1d0] sm:$0xff]  ;;  %v1022_v18 = vrot.slane %v5157_v22, 2 }
 0x1fd   :  { %v840_v14 = vpack.c.bf16 %v836_v6, %v835_v49  ;;  %v838_v15 = vpack.c.bf16 %v832_v10, %v831_v63  ;;  %v856_v49 = vsel %vm126_vm3, %v848_v12, %v850_v45  ;;  %v1021_v6 = vrot.slane %v5155_v21, 2  ;;  %2302 = vmatpush.bf16.msra.mxu3 %v4587_v40  ;;  %v4596_v63 = vld [vmem:[#allocation3 + $0x190] sm:$0xff]  ;;  %v4625_v40 = vld [vmem:[#allocation3 + $0x278] sm:$0xff] }
 0x1fe   :  { %1019 = vst [vmem:[#allocation2 + $0x90] sm:$0xff] %v1015_v13  ;;  %v910_v45 = vsel %vm280_vm4, %v906_v19, %v908_v46  ;;  %v957_v12 = vpack.c.bf16 %v5157_v22, %v5155_v21  ;;  %v1085_v44 = vsel %vm662_vm7, %v1081_v55, %v1083_v61  ;;  %v1086_v46 = vsel %vm662_vm7, %v1082_v59, %v1084_v5  ;;  %v4617_v59 = vld [vmem:[#allocation3 + $0x238] sm:$0xff] }
 0x1ff   :  { %844 = vst [vmem:[#allocation2 + $0xa8] sm:$0xff] %v840_v14  ;;  %v3655_v10 = vld [vmem:[#allocation2] sm:$0xf]  ;;  %v4518_v13 = vld [vmem:[#allocation2 + $0x4] sm:$0xf]  ;;  %v958_v14 = vpack.c.bf16 %v5161_v48, %v5159_v47  ;;  %2284 = vmatpush.bf16.msra.mxu2 %v4578_v50 }
 0x200   :  { %842 = vst [vmem:[#allocation2 + $0x38] sm:$0xff] %v838_v15  ;;  %2320 = vmatpush.bf16.msrb.mxu0 %v4596_v63  ;;  %2339 = vmatpush.bf16.msrb.mxu1 %v4604_v11 }
 0x201   :  { %v1105_v41 = vpop.permute.xlu2 %1104  ;;  %2303 = vmatpush.bf16.msra.mxu3 %v4586_v7  ;;  %961 = vst [vmem:[#allocation2 + $0x18] sm:$0xff] %v957_v12  ;;  %v4624_v7 = vld [vmem:[#allocation3 + $0x270] sm:$0xff] }
 0x202   :  { %v873_v42 = vpop.permute.xlu1 %872  ;;  %v1119_v62 = vmul.f32 %v1105_v41, %v1087_v24  ;;  %v1120_v37 = vmul.f32 %v1105_v41, %v1088_v28  ;;  %v868_v56 = vpop.permute.xlu0 %867  ;;  %v1028_v24 = vrot.slane %v5175_v58, 2  ;;  %v967_v28 = vrot.slane %v5159_v47, 1  ;;  %962 = vst [vmem:[#allocation2 + $0x50] sm:$0xff] %v958_v14 }
 0x203   :  { %v887_v2 = vmul.f32 %v873_v42, %v857_v29  ;;  %v888_v54 = vmul.f32 %v873_v42, %v858_v30  ;;  %v885_v4 = vmul.f32 %v868_v56, %v859_v33  ;;  %v886_v52 = vmul.f32 %v868_v56, %v860_v34  ;;  %v4595_v30 = vld [vmem:[#allocation3 + $0x188] sm:$0xff] }
 0x204   :  { %v1126_v60 = vpack.c.bf16 %v1120_v37, %v1119_v62  ;;  %v968_v29 = vrot.slane %v5161_v48, 1  ;;  %v4603_v33 = vld [vmem:[#allocation3 + $0x1c8] sm:$0xff]  ;;  %2321 = vmatpush.bf16.msrb.mxu0 %v4595_v30  ;;  %v966_v56 = vrot.slane %v5157_v22, 1  ;;  %v1036_v50 = vsel %vm557_vm6, %v1028_v24, %v1022_v18 }
 0x205   :  { %v894_v39 = vpack.c.bf16 %v888_v54, %v887_v2  ;;  %v893_v53 = vpack.c.bf16 %v886_v52, %v885_v4  ;;  %v965_v2 = vrot.slane %v5155_v21, 1  ;;  %2340 = vmatpush.bf16.msrb.mxu1 %v4603_v33  ;;  %v4616_v52 = vld [vmem:[#allocation3 + $0x230] sm:$0xff] }
 0x206   :  { %1130 = vst [vmem:[#allocation2 + $0x68] sm:$0xff] %v1126_v60  ;;  %v4594_v60 = vld [vmem:[#allocation3 + $0x180] sm:$0xff] }
 0x207   :  { %898 = vst [vmem:[#allocation2 + $0x40] sm:$0xff] %v894_v39  ;;  %v4525_v15 = vld [vmem:[#allocation2 + $0x34] sm:$0xf0]  ;;  %v3657_v17 = vld [vmem:[#allocation2 + $0x38] sm:$0xf0]  ;;  %v4602_v39 = vld [vmem:[#allocation3 + $0x1c0] sm:$0xff] }
 0x208   :  { %897 = vst [vmem:[#allocation2 + $0x8] sm:$0xff] %v893_v53  ;;  %v3656_v19 = vor.u32 %v4525_v15, %v3655_v10  ;;  %v3660_v20 = vor.u32 %v4518_v13, %v3657_v17  ;;  %v975_v13 = vsel %vm452_vm5, %v967_v28, %v969_v38  ;;  %2322 = vmatpush.bf16.msrb.mxu0 %v4594_v60 }
 0x209   :  { %v1110_v55 = vpop.permute.xlu2 %1109  ;;  %v978_v38 = vsel %vm452_vm5, %v966_v56, %v968_v29  ;;  %2341 = vmatpush.bf16.msrb.mxu1 %v4602_v39  ;;  %v960_v60 = vpack.c.bf16 %v5175_v58, %v5173_v57 }
 0x20a   :  { %v878_v27 = vpop.permute.xlu1 %877  ;;  %2209 = vmatmul.bf16.vlgmr.msrb.gmra.mxu2 %v3656_v19  ;;  %2228 = vmatmul.bf16.vlgmr.msrb.gmra.mxu3 %v3660_v20  ;;  %v1121_v34 = vmul.f32 %v1110_v55, %v1085_v44  ;;  %v1122_v41 = vmul.f32 %v1110_v55, %v1086_v46  ;;  %v939_v35 = vpop.permute.xlu0 %938  ;;  %v1077_v20 = vrot.slane %v5155_v21, 3  ;;  %v4623_v55 = vld [vmem:[#allocation3 + $0x268] sm:$0xff] }
 0x20b   :  { %v889_v42 = vmul.f32 %v878_v27, %v855_v16  ;;  %v890_v51 = vmul.f32 %v878_v27, %v856_v49  ;;  %v947_v62 = vmul.f32 %v939_v35, %v909_v43  ;;  %v948_v37 = vmul.f32 %v939_v35, %v910_v45  ;;  %2353 = vmatpush.bf16.msrb.mxu2 %v4617_v59  ;;  %v4633_v27 = vld [vmem:[#allocation3 + $0x2b8] sm:$0xff]  ;;  %v4532_v35 = vld [vmem:[#allocation2 + $0x74] sm:$0xf] }
 0x20c   :  { %v1127_v54 = vpack.c.bf16 %v1122_v41, %v1121_v34  ;;  %2372 = vmatpush.bf16.msrb.mxu3 %v4625_v40  ;;  %v1035_v49 = vsel %vm557_vm6, %v1027_v23, %v1021_v6  ;;  %v976_v43 = vsel %vm452_vm5, %v968_v29, %v970_v1  ;;  %v977_v45 = vsel %vm452_vm5, %v965_v2, %v967_v28  ;;  %v4615_v1 = vld [vmem:[#allocation3 + $0x228] sm:$0xff]  ;;  %v4641_v28 = vld [vmem:[#allocation3 + $0x2f8] sm:$0xff]  ;;  %v3711_v29 = vld [vmem:[#allocation2 + $0x70] sm:$0xf] }
 0x20d   :  { %v895_v32 = vpack.c.bf16 %v890_v51, %v889_v42  ;;  %v952_v4 = vpack.c.bf16 %v948_v37, %v947_v62  ;;  %v1078_v34 = vrot.slane %v5157_v22, 3  ;;  %v4614_v41 = vld [vmem:[#allocation3 + $0x220] sm:$0xff]  ;;  %v4632_v51 = vld [vmem:[#allocation3 + $0x2b0] sm:$0xff]  ;;  %v1089_v39 = vsel %vm662_vm7, %v1077_v20, %v1079_v25  ;;  %964 = vst [vmem:[#allocation2 + $0xc0] sm:$0xff] %v960_v60  ;;  %v4657_v22 = vld [vmem:[#allocation3 + $0x378] sm:$0xff] }
 0x20e   :  { %1131 = vst [vmem:[#allocation2 + $0xa0] sm:$0xff] %v1127_v54  ;;  %v4526_v53 = vld [vmem:[#allocation2 + $0x3c] sm:$0xf0]  ;;  %v3665_v16 = vld [vmem:[#allocation2 + $0x40] sm:$0xf0]  ;;  %v980_v25 = vsel %vm452_vm5, %v972_v9, %v966_v56  ;;  %v4628_v60 = vld [vmem:[#allocation3 + $0x290] sm:$0xff] }
 0x20f   :  { %899 = vst [vmem:[#allocation2 + $0x78] sm:$0xff] %v895_v32  ;;  %v3663_v63 = vld [vmem:[#allocation2 + $0x8] sm:$0xf]  ;;  %v4519_v10 = vld [vmem:[#allocation2 + $0xc] sm:$0xf]  ;;  %2354 = vmatpush.bf16.msrb.mxu2 %v4616_v52  ;;  %v4622_v40 = vld [vmem:[#allocation3 + $0x260] sm:$0xff]  ;;  %v959_v52 = vpack.c.bf16 %v5171_v26, %v5169_v3 }
 0x210   :  { %956 = vst [vmem:[#allocation2 + $0xb8] sm:$0xff] %v952_v4  ;;  %v3664_v11 = vor.u32 %v4526_v53, %v3663_v63  ;;  %v3668_v12 = vor.u32 %v4519_v10, %v3665_v16  ;;  %2373 = vmatpush.bf16.msrb.mxu3 %v4624_v7  ;;  %v4539_v54 = vld [vmem:[#allocation2 + $0xa4] sm:$0xf0]  ;;  %v3713_v32 = vld [vmem:[#allocation2 + $0xa8] sm:$0xf0]  ;;  %v4640_v4 = vld [vmem:[#allocation3 + $0x2f0] sm:$0xff]  ;;  %v1090_v53 = vsel %vm662_vm7, %v1078_v34, %v1080_v31 }
 0x211   :  { %v1059_v14 = vpop.permute.xlu2 %1058  ;;  %v979_v16 = vsel %vm452_vm5, %v971_v8, %v965_v2  ;;  %v4613_v7 = vld [vmem:[#allocation3 + $0x218] sm:$0xff]  ;;  %v4631_v10 = vld [vmem:[#allocation3 + $0x2a8] sm:$0xff]  ;;  %963 = vst [vmem:[#allocation2 + $0x88] sm:$0xff] %v959_v52  ;;  %v4618_v52 = vld [vmem:[#allocation3 + $0x240] sm:$0xff] }
 0x212   :  { %v993_v15 = vpop.permute.xlu1 %992  ;;  %2247 = vmatmul.bf16.vlgmr.msra.gmra.mxu0 %v3664_v11  ;;  %2266 = vmatmul.bf16.vlgmr.msra.gmra.mxu1 %v3668_v12  ;;  %v1067_v17 = vmul.f32 %v1059_v14, %v1035_v49  ;;  %v1068_v44 = vmul.f32 %v1059_v14, %v1036_v50  ;;  %v988_v19 = vpop.permute.xlu0 %987  ;;  %v3712_v49 = vor.u32 %v4539_v54, %v3711_v29  ;;  %v4621_v63 = vld [vmem:[#allocation3 + $0x258] sm:$0xff]  ;;  %v4639_v11 = vld [vmem:[#allocation3 + $0x2e8] sm:$0xff]  ;;  %v4540_v12 = vld [vmem:[#allocation2 + $0xac] sm:$0xf0]  ;;  %v1026_v14 = vrot.slane %v5171_v26, 2 }
 0x213   :  { %v1007_v46 = vmul.f32 %v993_v15, %v975_v13  ;;  %v1008_v59 = vmul.f32 %v993_v15, %v976_v43  ;;  %v1005_v30 = vmul.f32 %v988_v19, %v977_v45  ;;  %v1006_v33 = vmul.f32 %v988_v19, %v978_v38  ;;  %2355 = vmatpush.bf16.msrb.mxu2 %v4615_v1  ;;  %v4612_v15 = vld [vmem:[#allocation3 + $0x210] sm:$0xff]  ;;  %v4611_v29 = vld [vmem:[#allocation3 + $0x208] sm:$0xff] }
 0x214   :  { %v1072_v42 = vpack.c.bf16 %v1068_v44, %v1067_v17  ;;  %2374 = vmatpush.bf16.msrb.mxu3 %v4623_v55  ;;  %2391 = vmatpush.bf16.msra.mxu0 %v4633_v27  ;;  %v3716_v50 = vor.u32 %v4532_v35, %v3713_v32  ;;  %v1023_v43 = vrot.slane %v5159_v47, 2  ;;  %v1024_v45 = vrot.slane %v5161_v48, 2  ;;  %v3721_v17 = vld [vmem:[#allocation2 + $0xb0] sm:$0xf0]  ;;  %v4638_v55 = vld [vmem:[#allocation3 + $0x2e0] sm:$0xff] }
 0x215   :  { %v1014_v62 = vpack.c.bf16 %v1008_v59, %v1007_v46  ;;  %v1013_v37 = vpack.c.bf16 %v1006_v33, %v1005_v30  ;;  %2410 = vmatpush.bf16.msra.mxu1 %v4641_v28  ;;  %v1025_v38 = vrot.slane %v5169_v3, 2  ;;  %v4620_v44 = vld [vmem:[#allocation3 + $0x250] sm:$0xff]  ;;  %v4630_v46 = vld [vmem:[#allocation3 + $0x2a0] sm:$0xff] }
 0x216   :  { %1076 = vst [vmem:[#allocation2 + $0xd0] sm:$0xff] %v1072_v42  ;;  %v3719_v19 = vld [vmem:[#allocation2 + $0x78] sm:$0xf]  ;;  %v4533_v48 = vld [vmem:[#allocation2 + $0x7c] sm:$0xf]  ;;  %v1032_v26 = vsel %vm557_vm6, %v1024_v45, %v1026_v14  ;;  %v1033_v27 = vsel %vm557_vm6, %v1021_v6, %v1023_v43  ;;  %v1034_v30 = vsel %vm557_vm6, %v1022_v18, %v1024_v45  ;;  %v4610_v32 = vld [vmem:[#allocation3 + $0x200] sm:$0xff] }
 0x217   :  { %1018 = vst [vmem:[#allocation2 + $0x58] sm:$0xff] %v1014_v62  ;;  %2356 = vmatpush.bf16.msrb.mxu2 %v4614_v41  ;;  %v1031_v3 = vsel %vm557_vm6, %v1023_v43, %v1025_v38  ;;  %v3720_v28 = vor.u32 %v4540_v12, %v3719_v19  ;;  %v3724_v59 = vor.u32 %v4533_v48, %v3721_v17  ;;  %v4629_v6 = vld [vmem:[#allocation3 + $0x298] sm:$0xff]  ;;  %v3671_v54 = vld [vmem:[#allocation2 + $0x10] sm:$0xf]  ;;  %v4527_v18 = vld [vmem:[#allocation2 + $0x44] sm:$0xf0] }
 0x218   :  { %1017 = vst [vmem:[#allocation2 + $0x20] sm:$0xff] %v1013_v37  ;;  %2375 = vmatpush.bf16.msrb.mxu3 %v4622_v40  ;;  %2392 = vmatpush.bf16.msra.mxu0 %v4632_v51  ;;  %v4619_v40 = vld [vmem:[#allocation3 + $0x248] sm:$0xff]  ;;  %v4637_v51 = vld [vmem:[#allocation3 + $0x2d8] sm:$0xff]  ;;  %v4528_v45 = vld [vmem:[#allocation2 + $0x4c] sm:$0xf0] }
 0x219   :  { %2411 = vmatpush.bf16.msra.mxu1 %v4640_v4  ;;  %v4655_v17 = vld [vmem:[#allocation3 + $0x368] sm:$0xff]  ;;  %v4541_v19 = vld [vmem:[#allocation2 + $0xb4] sm:$0xf0]  ;;  %v4534_v48 = vld [vmem:[#allocation2 + $0x84] sm:$0xf] }
 0x21a   :  { %v1100_v31 = vpop.permute.xlu1 %1099  ;;  %2214 = vmatmul.bf16.gmra.mxu2 %v3712_v49  ;;  %2233 = vmatmul.bf16.gmra.mxu3 %v3716_v50  ;;  %v1003_v13 = vpop.permute.xlu0 %1002  ;;  %v4636_v49 = vld [vmem:[#allocation3 + $0x2d0] sm:$0xff]  ;;  %v3672_v50 = vor.u32 %v4527_v18, %v3671_v54  ;;  %v4650_v54 = vld [vmem:[#allocation3 + $0x340] sm:$0xff] }
 0x21b   :  { %v1117_v8 = vmul.f32 %v1100_v31, %v1089_v39  ;;  %v1118_v2 = vmul.f32 %v1100_v31, %v1090_v53  ;;  %v1011_v9 = vmul.f32 %v1003_v13, %v979_v16  ;;  %v1012_v56 = vmul.f32 %v1003_v13, %v980_v25  ;;  %2357 = vmatpush.bf16.msrb.mxu2 %v4613_v7  ;;  %v4520_v53 = vld [vmem:[#allocation2 + $0x14] sm:$0xf]  ;;  %v3673_v16 = vld [vmem:[#allocation2 + $0x48] sm:$0xf0] }
 0x21c   :  { %2376 = vmatpush.bf16.msrb.mxu3 %v4621_v63  ;;  %2393 = vmatpush.bf16.msra.mxu0 %v4631_v10  ;;  %v1029_v25 = vsel %vm557_vm6, %v1025_v38, %v1027_v23  ;;  %v1030_v31 = vsel %vm557_vm6, %v1026_v14, %v1028_v24  ;;  %v3676_v7 = vor.u32 %v4520_v53, %v3673_v16  ;;  %v4649_v24 = vld [vmem:[#allocation3 + $0x338] sm:$0xff]  ;;  %v4634_v38 = vld [vmem:[#allocation3 + $0x2c0] sm:$0xff] }
 0x21d   :  { %v1125_v1 = vpack.c.bf16 %v1118_v2, %v1117_v8  ;;  %v1016_v47 = vpack.c.bf16 %v1012_v56, %v1011_v9  ;;  %2412 = vmatpush.bf16.msra.mxu1 %v4639_v11  ;;  %v1091_v63 = vsel %vm662_vm7, %v1083_v61, %v1077_v20  ;;  %v1092_v23 = vsel %vm662_vm7, %v1084_v5, %v1078_v34  ;;  %v4627_v8 = vld [vmem:[#allocation3 + $0x288] sm:$0xff]  ;;  %v3679_v61 = vld [vmem:[#allocation2 + $0x18] sm:$0xf]  ;;  %v4521_v20 = vld [vmem:[#allocation2 + $0x1c] sm:$0xf] }
 0x21e   :  { %v4635_v2 = vld [vmem:[#allocation3 + $0x2c8] sm:$0xff]  ;;  %v3681_v11 = vld [vmem:[#allocation2 + $0x50] sm:$0xf0]  ;;  %v4626_v9 = vld [vmem:[#allocation3 + $0x280] sm:$0xff]  ;;  %v3680_v14 = vor.u32 %v4528_v45, %v3679_v61 }
 0x21f   :  { %1129 = vst [vmem:[#allocation2 + $0x30] sm:$0xff] %v1125_v1  ;;  %2358 = vmatpush.bf16.msrb.mxu2 %v4612_v15  ;;  %v4648_v5 = vld [vmem:[#allocation3 + $0x330] sm:$0xff]  ;;  %v3684_v15 = vor.u32 %v4521_v20, %v3681_v11  ;;  %v4647_v1 = vld [vmem:[#allocation3 + $0x328] sm:$0xff]  ;;  %v3689_v18 = vld [vmem:[#allocation2 + $0x58] sm:$0xf0] }
 0x220   :  { %1020 = vst [vmem:[#allocation2 + $0xc8] sm:$0xff] %v1016_v47  ;;  %2377 = vmatpush.bf16.msrb.mxu3 %v4620_v44  ;;  %2394 = vmatpush.bf16.msra.mxu0 %v4630_v46  ;;  %v4656_v56 = vld [vmem:[#allocation3 + $0x370] sm:$0xff]  ;;  %v4646_v44 = vld [vmem:[#allocation3 + $0x320] sm:$0xff] }
 0x221   :  { %2413 = vmatpush.bf16.msra.mxu1 %v4638_v55  ;;  %v3727_v46 = vld [vmem:[#allocation2 + $0x80] sm:$0xf]  ;;  %v3729_v55 = vld [vmem:[#allocation2 + $0xb8] sm:$0xf0] }
 0x222   :  { %v1049_v33 = vpop.permute.xlu1 %1048  ;;  %2252 = vmatmul.bf16.gmra.mxu0 %v3720_v28  ;;  %2271 = vmatmul.bf16.gmra.mxu1 %v3724_v59  ;;  %v1044_v35 = vpop.permute.xlu0 %1043  ;;  %v4654_v47 = vld [vmem:[#allocation3 + $0x360] sm:$0xff]  ;;  %v4653_v28 = vld [vmem:[#allocation3 + $0x358] sm:$0xff]  ;;  %v3735_v59 = vld [vmem:[#allocation2 + $0x88] sm:$0xf] }
 0x223   :  { %v1063_v41 = vmul.f32 %v1049_v33, %v1031_v3  ;;  %v1064_v42 = vmul.f32 %v1049_v33, %v1032_v26  ;;  %v1061_v62 = vmul.f32 %v1044_v35, %v1033_v27  ;;  %v1062_v37 = vmul.f32 %v1044_v35, %v1034_v30  ;;  %2359 = vmatpush.bf16.msrb.mxu2 %v4611_v29  ;;  %v4645_v27 = vld [vmem:[#allocation3 + $0x318] sm:$0xff]  ;;  %v4535_v30 = vld [vmem:[#allocation2 + $0x8c] sm:$0xf]  ;;  %v4542_v33 = vld [vmem:[#allocation2 + $0xbc] sm:$0xf0] }
 0x224   :  { %2378 = vmatpush.bf16.msrb.mxu3 %v4619_v40  ;;  %2395 = vmatpush.bf16.msra.mxu0 %v4629_v6  ;;  %v3728_v3 = vor.u32 %v4541_v19, %v3727_v46  ;;  %v3732_v26 = vor.u32 %v4534_v48, %v3729_v55  ;;  %v3737_v29 = vld [vmem:[#allocation2 + $0xc0] sm:$0xf0]  ;;  %v3736_v35 = vor.u32 %v4542_v33, %v3735_v59  ;;  %v4643_v6 = vld [vmem:[#allocation3 + $0x308] sm:$0xff] }
 0x225   :  { %v1070_v4 = vpack.c.bf16 %v1064_v42, %v1063_v41  ;;  %v1069_v39 = vpack.c.bf16 %v1062_v37, %v1061_v62  ;;  %2414 = vmatpush.bf16.msra.mxu1 %v4637_v51  ;;  %v4644_v41 = vld [vmem:[#allocation3 + $0x310] sm:$0xff]  ;;  %v3740_v40 = vor.u32 %v4535_v30, %v3737_v29  ;;  %v4651_v51 = vld [vmem:[#allocation3 + $0x348] sm:$0xff]  ;;  %v4642_v62 = vld [vmem:[#allocation3 + $0x300] sm:$0xff] }
 0x226   :  { %v4652_v42 = vld [vmem:[#allocation3 + $0x350] sm:$0xff]  ;;  %v4529_v37 = vld [vmem:[#allocation2 + $0x54] sm:$0xf0] }
 0x227   :  { %1074 = vst [vmem:[#allocation2 + $0x60] sm:$0xff] %v1070_v4  ;;  %2360 = vmatpush.bf16.msrb.mxu2 %v4610_v32  ;;  %v3687_v32 = vld [vmem:[#allocation2 + $0x20] sm:$0xf]  ;;  %v4522_v4 = vld [vmem:[#allocation2 + $0x24] sm:$0xf] }
 0x228   :  { %1073 = vst [vmem:[#allocation2 + $0x28] sm:$0xff] %v1069_v39  ;;  %2379 = vmatpush.bf16.msrb.mxu3 %v4618_v52  ;;  %2396 = vmatpush.bf16.msra.mxu0 %v4628_v60  ;;  %v3688_v52 = vor.u32 %v4529_v37, %v3687_v32  ;;  %v3692_v60 = vor.u32 %v4522_v4, %v3689_v18  ;;  %v3703_v20 = vld [vmem:[#allocation2 + $0x30] sm:$0xf] }
 0x229   :  { %2415 = vmatpush.bf16.msra.mxu1 %v4636_v49 }
 0x22a   :  { %v1054_v10 = vpop.permute.xlu1 %1053  ;;  %2285 = vmatmul.bf16.vlgmr.msra.gmra.mxu2 %v3672_v50  ;;  %2304 = vmatmul.bf16.vlgmr.msra.gmra.mxu3 %v3676_v7  ;;  %v1115_v13 = vpop.permute.xlu0 %1114  ;;  %v3745_v7 = vld [vmem:[#allocation2 + $0xc8] sm:$0xf0] }
 0x22b   :  { %v1065_v21 = vmul.f32 %v1054_v10, %v1029_v25  ;;  %v1066_v57 = vmul.f32 %v1054_v10, %v1030_v31  ;;  %v1123_v43 = vmul.f32 %v1115_v13, %v1091_v63  ;;  %v1124_v58 = vmul.f32 %v1115_v13, %v1092_v23  ;;  %2429 = vmatpush.bf16.msra.mxu2 %v4649_v24  ;;  %v4543_v31 = vld [vmem:[#allocation2 + $0xc4] sm:$0xf0]  ;;  %v3743_v63 = vld [vmem:[#allocation2 + $0x90] sm:$0xf]  ;;  %v4536_v23 = vld [vmem:[#allocation2 + $0x94] sm:$0xf] }
 0x22c   :  { %2397 = vmatpush.bf16.msra.mxu0 %v4627_v8  ;;  %2448 = vmatpush.bf16.msra.mxu3 %v4657_v22  ;;  %v3744_v10 = vor.u32 %v4543_v31, %v3743_v63  ;;  %v3748_v24 = vor.u32 %v4536_v23, %v3745_v7  ;;  %v4524_v22 = vld [vmem:[#allocation2 + $0x34] sm:$0xf] }
 0x22d   :  { %v1071_v34 = vpack.c.bf16 %v1066_v57, %v1065_v21  ;;  %v1128_v12 = vpack.c.bf16 %v1124_v58, %v1123_v43  ;;  %2416 = vmatpush.bf16.msra.mxu1 %v4635_v2  ;;  %v4544_v21 = vld [vmem:[#allocation2 + $0xcc] sm:$0xf0]  ;;  %v3753_v57 = vld [vmem:[#allocation2 + $0xd0] sm:$0xf0]  ;;  %v4531_v43 = vld [vmem:[#allocation2 + $0x64] sm:$0xf0] }
 0x22e   :  { %v4530_v39 = vld [vmem:[#allocation2 + $0x5c] sm:$0xf0]  ;;  %v3697_v49 = vld [vmem:[#allocation2 + $0x60] sm:$0xf0]  ;;  %v3705_v58 = vld [vmem:[#allocation2 + $0x68] sm:$0xf0]  ;;  %v3704_v45 = vor.u32 %v4531_v43, %v3703_v20 }
 0x22f   :  { %1075 = vst [vmem:[#allocation2 + $0x98] sm:$0xff] %v1071_v34  ;;  %2430 = vmatpush.bf16.msra.mxu2 %v4648_v5  ;;  %v3695_v53 = vld [vmem:[#allocation2 + $0x28] sm:$0xf]  ;;  %v4523_v16 = vld [vmem:[#allocation2 + $0x2c] sm:$0xf]  ;;  %v3708_v11 = vor.u32 %v4524_v22, %v3705_v58 }
 0x230   :  { %1132 = vst [vmem:[#allocation2 + $0xd8] sm:$0xff] %v1128_v12  ;;  %2398 = vmatpush.bf16.msra.mxu0 %v4626_v9  ;;  %2449 = vmatpush.bf16.msra.mxu3 %v4656_v56  ;;  %v3696_v50 = vor.u32 %v4530_v39, %v3695_v53  ;;  %v3700_v25 = vor.u32 %v4523_v16, %v3697_v49  ;;  %v3759_v9 = vld [vmem:[#allocation2 + $0xa0] sm:$0xf]  ;;  %v4538_v56 = vld [vmem:[#allocation2 + $0xa4] sm:$0xf] }
 0x231   :  { %2417 = vmatpush.bf16.msra.mxu1 %v4634_v38 }
 0x232   :  { %2323 = vmatmul.bf16.vlgmr.msrb.gmra.mxu0 %v3680_v14  ;;  %2342 = vmatmul.bf16.vlgmr.msrb.gmra.mxu1 %v3684_v15  ;;  %v4737_v14 = vld [vmem:[%s5836_s6] ss:$0 sm:$0xff] }
 0x233   :  { %2431 = vmatpush.bf16.msra.mxu2 %v4647_v1 }
 0x234   :  { %2450 = vmatpush.bf16.msra.mxu3 %v4655_v17 }
 0x236   :  { %v3751_v8 = vld [vmem:[#allocation2 + $0x98] sm:$0xf]  ;;  %v4537_v2 = vld [vmem:[#allocation2 + $0x9c] sm:$0xf] }
 0x237   :  { %2432 = vmatpush.bf16.msra.mxu2 %v4646_v44  ;;  %v3752_v13 = vor.u32 %v4544_v21, %v3751_v8  ;;  %v3756_v61 = vor.u32 %v4537_v2, %v3753_v57  ;;  %v4545_v5 = vld [vmem:[#allocation2 + $0xd4] sm:$0xf0]  ;;  %v3761_v34 = vld [vmem:[#allocation2 + $0xd8] sm:$0xf0] }
 0x238   :  { %2451 = vmatpush.bf16.msra.mxu3 %v4654_v47  ;;  %v3760_v12 = vor.u32 %v4545_v5, %v3759_v9  ;;  %v3764_v38 = vor.u32 %v4538_v56, %v3761_v34 }
 0x23a   :  { %2290 = vmatmul.bf16.gmra.mxu2 %v3728_v3  ;;  %2309 = vmatmul.bf16.gmra.mxu3 %v3732_v26 }
 0x23b   :  { %2433 = vmatpush.bf16.msra.mxu2 %v4645_v27 }
 0x23c   :  { %2452 = vmatpush.bf16.msra.mxu3 %v4653_v28 }
 0x23f   :  { %2434 = vmatpush.bf16.msra.mxu2 %v4644_v41 }
 0x240   :  { %2453 = vmatpush.bf16.msra.mxu3 %v4652_v42 }
 0x242   :  { %2328 = vmatmul.bf16.gmra.mxu0 %v3736_v35  ;;  %2347 = vmatmul.bf16.gmra.mxu1 %v3740_v40 }
 0x243   :  { %2435 = vmatpush.bf16.msra.mxu2 %v4643_v6 }
 0x244   :  { %2454 = vmatpush.bf16.msra.mxu3 %v4651_v51 }
 0x247   :  { %2436 = vmatpush.bf16.msra.mxu2 %v4642_v62 }
 0x248   :  { %2455 = vmatpush.bf16.msra.mxu3 %v4650_v54 }
 0x24a   :  { %2361 = vmatmul.bf16.vlgmr.msrb.gmra.mxu2 %v3688_v52  ;;  %2380 = vmatmul.bf16.vlgmr.msrb.gmra.mxu3 %v3692_v60 }
 0x252   :  { %2399 = vmatmul.bf16.vlgmr.msra.gmra.mxu0 %v3696_v50  ;;  %2418 = vmatmul.bf16.vlgmr.msra.gmra.mxu1 %v3700_v25 }
 0x25a   :  { %2366 = vmatmul.bf16.gmra.mxu2 %v3744_v10  ;;  %2385 = vmatmul.bf16.gmra.mxu3 %v3748_v24 }
 0x262   :  { %2404 = vmatmul.bf16.gmra.mxu0 %v3752_v13  ;;  %2423 = vmatmul.bf16.gmra.mxu1 %v3756_v61 }
 0x26a   :  { %2437 = vmatmul.bf16.vlgmr.msra.gmra.mxu2 %v3704_v45  ;;  %2456 = vmatmul.bf16.vlgmr.msra.gmra.mxu3 %v3708_v11 }
 0x27a   :  { %2442 = vmatmul.bf16.gmra.mxu2 %v3760_v12  ;;  %2461 = vmatmul.bf16.gmra.mxu3 %v3764_v38 }
 0x28d   :  { %v2210_v15 = vpop.f32.mrf.mxu2  ;;  %v2229_v1 = vpop.f32.mrf.mxu3 }
 0x28e   :  { %v2211_v17 = vadd.f32 %v4737_v14, %v2210_v15 }
 0x28f   :  { %v2248_v44 = vpop.f32.mrf.mxu0  ;;  %v2267_v47 = vpop.f32.mrf.mxu1 }
 0x290   :  { %v2230_v46 = vadd.f32 %v2229_v1, %v2211_v17 }
 0x292   :  { %v2249_v19 = vadd.f32 %v2248_v44, %v2230_v46 }
 0x294   :  { %v2268_v48 = vadd.f32 %v2267_v47, %v2249_v19 }
 0x295   :  { %v2212_v55 = vpop.f32.mrf.mxu2  ;;  %v2231_v3 = vpop.f32.mrf.mxu3 }
 0x296   :  { %v2213_v26 = vadd.f32 %v4737_v14, %v2212_v55 }
 0x297   :  { %v2250_v28 = vpop.f32.mrf.mxu0  ;;  %v2269_v30 = vpop.f32.mrf.mxu1 }
 0x298   :  { %v2232_v27 = vadd.f32 %v2231_v3, %v2213_v26 }
 0x29a   :  { %v2251_v59 = vadd.f32 %v2250_v28, %v2232_v27 }
 0x29c   :  { %v2270_v33 = vadd.f32 %v2269_v30, %v2251_v59 }
 0x29d   :  { %v2215_v29 = vpop.f32.mrf.mxu2  ;;  %v2234_v41 = vpop.f32.mrf.mxu3 }
 0x29e   :  { %v2216_v42 = vadd.f32 %v4737_v14, %v2215_v29 }
 0x29f   :  { %v2253_v40 = vpop.f32.mrf.mxu0  ;;  %v2272_v37 = vpop.f32.mrf.mxu1 }
 0x2a0   :  { %v2235_v35 = vadd.f32 %v2234_v41, %v2216_v42 }
 0x2a2   :  { %v2254_v45 = vadd.f32 %v2253_v40, %v2235_v35 }
 0x2a4   :  { %v2273_v9 = vadd.f32 %v2272_v37, %v2254_v45 }
 0x2a5   :  { %v2217_v6 = vpop.f32.mrf.mxu2  ;;  %v2236_v51 = vpop.f32.mrf.mxu3 }
 0x2a6   :  { %v2218_v62 = vadd.f32 %v4737_v14, %v2217_v6 }
 0x2a7   :  { %v2255_v18 = vpop.f32.mrf.mxu0  ;;  %v2274_v39 = vpop.f32.mrf.mxu1 }
 0x2a8   :  { %v2237_v54 = vadd.f32 %v2236_v51, %v2218_v62 }
 0x2aa   :  { %v2256_v15 = vadd.f32 %v2255_v18, %v2237_v54 }
 0x2ad   :  { %v2286_v32 = vpop.f32.mrf.mxu2  ;;  %v2305_v4 = vpop.f32.mrf.mxu3 }
 0x2ae   :  { %v2287_v52 = vadd.f32 %v2286_v32, %v2268_v48  ;;  %v2275_v48 = vadd.f32 %v2274_v39, %v2256_v15 }
 0x2af   :  { %v2324_v50 = vpop.f32.mrf.mxu0  ;;  %v2343_v31 = vpop.f32.mrf.mxu1 }
 0x2b0   :  { %v2306_v60 = vadd.f32 %v2305_v4, %v2287_v52 }
 0x2b2   :  { %v2325_v43 = vadd.f32 %v2324_v50, %v2306_v60 }
 0x2b4   :  { %v2344_v34 = vadd.f32 %v2343_v31, %v2325_v43 }
 0x2b5   :  { %v2288_v53 = vpop.f32.mrf.mxu2  ;;  %v2307_v16 = vpop.f32.mrf.mxu3 }
 0x2b6   :  { %v2289_v49 = vadd.f32 %v2288_v53, %v2270_v33 }
 0x2b7   :  { %v2326_v23 = vpop.f32.mrf.mxu0  ;;  %v2345_v8 = vpop.f32.mrf.mxu1 }
 0x2b8   :  { %v2308_v25 = vadd.f32 %v2307_v16, %v2289_v49 }
 0x2ba   :  { %v2327_v38 = vadd.f32 %v2326_v23, %v2308_v25 }
 0x2bc   :  { %v2346_v47 = vadd.f32 %v2345_v8, %v2327_v38 }
 0x2bd   :  { %v2291_v7 = vpop.f32.mrf.mxu2  ;;  %v2310_v63 = vpop.f32.mrf.mxu3 }
 0x2be   :  { %v2292_v14 = vadd.f32 %v2291_v7, %v2273_v9 }
 0x2bf   :  { %v2329_v2 = vpop.f32.mrf.mxu0  ;;  %v2348_v13 = vpop.f32.mrf.mxu1 }
 0x2c0   :  { %v2311_v19 = vadd.f32 %v2310_v63, %v2292_v14 }
 0x2c2   :  { %v2330_v26 = vadd.f32 %v2329_v2, %v2311_v19 }
 0x2c4   :  { %v2349_v41 = vadd.f32 %v2348_v13, %v2330_v26 }
 0x2c5   :  { %v2293_v10 = vpop.f32.mrf.mxu2  ;;  %v2312_v24 = vpop.f32.mrf.mxu3 }
 0x2c6   :  { %v2294_v27 = vadd.f32 %v2293_v10, %v2275_v48 }
 0x2c7   :  { %v2331_v22 = vpop.f32.mrf.mxu0  ;;  %v2350_v58 = vpop.f32.mrf.mxu1 }
 0x2c8   :  { %v2313_v42 = vadd.f32 %v2312_v24, %v2294_v27 }
 0x2ca   :  { %v2332_v37 = vadd.f32 %v2331_v22, %v2313_v42 }
 0x2cc   :  { %v2351_v39 = vadd.f32 %v2350_v58, %v2332_v37 }
 0x2cd   :  { %v2362_v21 = vpop.f32.mrf.mxu2  ;;  %v2381_v57 = vpop.f32.mrf.mxu3 }
 0x2ce   :  { %v2363_v56 = vadd.f32 %v2362_v21, %v2344_v34 }
 0x2cf   :  { %v2400_v12 = vpop.f32.mrf.mxu0  ;;  %v2419_v17 = vpop.f32.mrf.mxu1 }
 0x2d0   :  { %v2382_v1 = vadd.f32 %v2381_v57, %v2363_v56 }
 0x2d2   :  { %v2401_v55 = vadd.f32 %v2400_v12, %v2382_v1 }
 0x2d4   :  { %v2420_v59 = vadd.f32 %v2419_v17, %v2401_v55 }
 0x2d5   :  { %v2364_v61 = vpop.f32.mrf.mxu2  ;;  %v2383_v20 = vpop.f32.mrf.mxu3 }
 0x2d6   :  { %v2365_v3 = vadd.f32 %v2364_v61, %v2346_v47 }
 0x2d7   :  { %v2402_v28 = vpop.f32.mrf.mxu0  ;;  %v2421_v40 = vpop.f32.mrf.mxu1 }
 0x2d8   :  { %v2384_v30 = vadd.f32 %v2383_v20, %v2365_v3 }
 0x2da   :  { %v2403_v6 = vadd.f32 %v2402_v28, %v2384_v30 }
 0x2dc   :  { %v2422_v32 = vadd.f32 %v2421_v40, %v2403_v6 }
 0x2dd   :  { %v2367_v11 = vpop.f32.mrf.mxu2  ;;  %v2386_v5 = vpop.f32.mrf.mxu3 }
 0x2de   :  { %v2368_v51 = vadd.f32 %v2367_v11, %v2349_v41 }
 0x2df   :  { %v2405_v18 = vpop.f32.mrf.mxu0  ;;  %v2424_v25 = vpop.f32.mrf.mxu1 }
 0x2e0   :  { %v2387_v4 = vadd.f32 %v2386_v5, %v2368_v51 }
 0x2e2   :  { %v2406_v16 = vadd.f32 %v2405_v18, %v2387_v4 }
 0x2e4   :  { %v2425_v7 = vadd.f32 %v2424_v25, %v2406_v16 }
 0x2e5   :  { %v2369_v44 = vpop.f32.mrf.mxu2  ;;  %v2388_v46 = vpop.f32.mrf.mxu3 }
 0x2e6   :  { %v2370_v49 = vadd.f32 %v2369_v44, %v2351_v39 }
 0x2e7   :  { %v2407_v8 = vpop.f32.mrf.mxu0  ;;  %v2426_v13 = vpop.f32.mrf.mxu1 }
 0x2e8   :  { %v2389_v63 = vadd.f32 %v2388_v46, %v2370_v49 }
 0x2ea   :  { %v2408_v2 = vadd.f32 %v2407_v8, %v2389_v63 }
 0x2ec   :  { %v2427_v61 = vadd.f32 %v2426_v13, %v2408_v2 }
 0x2ed   :  { %v2438_v33 = vpop.f32.mrf.mxu2  ;;  %v2457_v29 = vpop.f32.mrf.mxu3 }
 0x2ee   :  { %v2439_v35 = vadd.f32 %v2438_v33, %v2420_v59 }
 0x2f0   :  { %v2458_v62 = vadd.f32 %v2457_v29, %v2439_v35 }
 0x2f2   :  { %v5515_v54 = vmax.f32 %v2458_v62, 0.0 }
 0x2f5   :  { %v2440_v52 = vpop.f32.mrf.mxu2  ;;  %v2459_v60 = vpop.f32.mrf.mxu3 }
 0x2f6   :  { %v2441_v53 = vadd.f32 %v2440_v52, %v2422_v32 }
 0x2f8   :  { %v2460_v50 = vadd.f32 %v2459_v60, %v2441_v53 }
 0x2fa   :  { %v5517_v31 = vmax.f32 %v2460_v50, 0.0 }
 0x2fd   :  { %v2443_v23 = vpop.f32.mrf.mxu2  ;;  %v2462_v10 = vpop.f32.mrf.mxu3 }
 0x2fe   :  { %v2444_v24 = vadd.f32 %v2443_v23, %v2425_v7 }
 0x300   :  { %v2463_v21 = vadd.f32 %v2462_v10, %v2444_v24 }
 0x302   :  { %v5519_v57 = vmax.f32 %v2463_v21, 0.0 }
 0x305   :  { %v2445_v20 = vpop.f32.mrf.mxu2  ;;  %v2464_v43 = vpop.f32.mrf.mxu3 }
 0x306   :  { %v2446_v22 = vadd.f32 %v2445_v20, %v2427_v61 }
 0x308   :  { %v2465_v58 = vadd.f32 %v2464_v43, %v2446_v22 }
 0x30a   :  { %v5521_v45 = vmax.f32 %v2465_v58, 0.0 }
 0x30b   :  { %4800 = dma.done.wait [#allocation5 + $0x1], 7168 }
 0x30c   :  { %4801 = vsyncadd [#allocation5 + $0x1], 4294960128  ;;  %4740 = vset.pattern.permute.xlu2 %v4802_v0  ;;  %4739 = vset.pattern.permute.xlu1 %v4802_v0  ;;  %v4217_v11 = vld [vmem:[%s5830_s1 + $0x40] sm:$0xff]  ;;  %v4218_v9 = vld [vmem:[%s5830_s1 + $0x48] sm:$0xff]  ;;  %v2519_v39 = vrot.slane %v5515_v54, 6  ;;  %v2522_v53 = vrot.slane %v5521_v45, 6 }
 0x30d   :  { %4738 = vset.pattern.permute.xlu0 %v4802_v0  ;;  %v4213_v5 = vld [vmem:[%s5830_s1 + $0x20] sm:$0xff]  ;;  %v4214_v0 = vld [vmem:[%s5830_s1 + $0x28] sm:$0xff]  ;;  %v4219_v12 = vld [vmem:[%s5830_s1 + $0x50] sm:$0xff]  ;;  %v2520_v2 = vrot.slane %v5517_v31, 6  ;;  %vm3425_vm8 = vcmask 261120   ;;  %vm3502_vm9 = vcmask 523264  }
 0x30e   :  { %v2483_v34 = vld [vmem:[%s5830_s1] sm:$0xff]  ;;  %2577 = vperm.xlu0 %4738, %v4217_v11   ;;  %2533 = vperm.xlu2 %4740, %v4213_v5   ;;  %v2484_v56 = vld [vmem:[%s5830_s1 + $0x8] sm:$0xff]  ;;  %v2485_v38 = vld [vmem:[%s5830_s1 + $0x10] sm:$0xff]  ;;  %v2526_v7 = vsel %vm126_vm3, %v2522_v53, %v2519_v39  ;;  %v2607_v5 = vpack.c.bf16 %v5515_v54, %v5515_v54  ;;  %vm3532_vm10 = vcmask 1041408   ;;  %vm3560_vm13 = vcmask 1024  }
 0x30f   :  { %2489 = vperm.xlu1 %4739, %v2483_v34   ;;  %v4220_v14 = vld [vmem:[%s5830_s1 + $0x58] sm:$0xff]  ;;  %v4215_v17 = vld [vmem:[%s5830_s1 + $0x30] sm:$0xff]  ;;  %v4229_v44 = vld [vmem:[%s5830_s1 + $0xc0] sm:$0xff]  ;;  %v2525_v22 = vsel %vm126_vm3, %v2519_v39, %v2520_v2  ;;  %v2608_v34 = vpack.c.bf16 %v5517_v31, %v5517_v31  ;;  %v2609_v39 = vpack.c.bf16 %v5519_v57, %v5519_v57 }
 0x310   :  { %v2486_v15 = vld [vmem:[%s5830_s1 + $0x18] sm:$0xff]  ;;  %v4221_v46 = vld [vmem:[%s5830_s1 + $0x80] sm:$0xff]  ;;  %v4230_v47 = vld [vmem:[%s5830_s1 + $0xc8] sm:$0xff]  ;;  %2611 = vst [vmem:[#allocation2 + $0xc] sm:$0xf] %v2607_v5 }
 0x311   :  { %v4216_v1 = vld [vmem:[%s5830_s1 + $0x38] sm:$0xff]  ;;  %v4222_v19 = vld [vmem:[%s5830_s1 + $0x88] sm:$0xff]  ;;  %v4225_v55 = vld [vmem:[%s5830_s1 + $0xa0] sm:$0xff]  ;;  %2612 = vst [vmem:[#allocation2 + $0x44] sm:$0xf] %v2608_v34 }
 0x312   :  { %v4226_v48 = vld [vmem:[%s5830_s1 + $0xa8] sm:$0xff]  ;;  %v4231_v3 = vld [vmem:[%s5830_s1 + $0xd0] sm:$0xff]  ;;  %v4232_v27 = vld [vmem:[%s5830_s1 + $0xd8] sm:$0xff]  ;;  %2613 = vst [vmem:[#allocation2 + $0x7c] sm:$0xf] %v2609_v39  ;;  %v2618_v39 = vrot.slane %v5521_v45, 1 }
 0x313   :  { %v4223_v26 = vld [vmem:[%s5830_s1 + $0x90] sm:$0xff]  ;;  %v4224_v28 = vld [vmem:[%s5830_s1 + $0x98] sm:$0xff]  ;;  %v4685_v41 = vld [vmem:[#allocation4 + $0x68] sm:$0xff] }
 0x314   :  { %v4228_v59 = vld [vmem:[%s5830_s1 + $0xb8] sm:$0xff]  ;;  %v4227_v30 = vld [vmem:[%s5830_s1 + $0xb0] sm:$0xff]  ;;  %v4684_v35 = vld [vmem:[#allocation4 + $0x60] sm:$0xff] }
 0x315   :  { %v4687_v33 = vld [vmem:[#allocation4 + $0x78] sm:$0xff]  ;;  %v4686_v29 = vld [vmem:[#allocation4 + $0x70] sm:$0xff]  ;;  %v4677_v4 = vld [vmem:[#allocation4 + $0x28] sm:$0xff] }
 0x316   :  { %2582 = vperm.xlu0 %4738, %v4218_v9   ;;  %2538 = vperm.xlu2 %4740, %v4214_v0   ;;  %v4679_v42 = vld [vmem:[#allocation4 + $0x38] sm:$0xff]  ;;  %v4678_v51 = vld [vmem:[#allocation4 + $0x30] sm:$0xff]  ;;  %v4693_v52 = vld [vmem:[#allocation4 + $0xa8] sm:$0xff] }
 0x317   :  { %2494 = vperm.xlu1 %4739, %v2484_v56   ;;  %3306 = vmatpush.bf16.msrb.mxu1 %v4687_v33  ;;  %v4695_v40 = vld [vmem:[#allocation4 + $0xb8] sm:$0xff]  ;;  %v4694_v37 = vld [vmem:[#allocation4 + $0xb0] sm:$0xff]  ;;  %v4701_v60 = vld [vmem:[#allocation4 + $0xe8] sm:$0xff]  ;;  %v2476_v56 = vrot.slane %v5517_v31, 5 }
 0x318   :  { %3287 = vmatpush.bf16.msrb.mxu0 %v4679_v42  ;;  %3325 = vmatpush.bf16.msrb.mxu2 %v4695_v40  ;;  %v4703_v6 = vld [vmem:[#allocation4 + $0xf8] sm:$0xff]  ;;  %v4702_v32 = vld [vmem:[#allocation4 + $0xf0] sm:$0xff]  ;;  %v4676_v16 = vld [vmem:[#allocation4 + $0x20] sm:$0xff]  ;;  %v2478_v42 = vrot.slane %v5521_v45, 5 }
 0x319   :  { %3344 = vmatpush.bf16.msrb.mxu3 %v4703_v6  ;;  %v4683_v62 = vld [vmem:[#allocation4 + $0x58] sm:$0xff]  ;;  %v4682_v18 = vld [vmem:[#allocation4 + $0x50] sm:$0xff]  ;;  %v4681_v49 = vld [vmem:[#allocation4 + $0x48] sm:$0xff] }
 0x31a   :  { %v4692_v50 = vld [vmem:[#allocation4 + $0xa0] sm:$0xff]  ;;  %v4675_v63 = vld [vmem:[#allocation4 + $0x18] sm:$0xff]  ;;  %v4674_v61 = vld [vmem:[#allocation4 + $0x10] sm:$0xff] }
 0x31b   :  { %3307 = vmatpush.bf16.msrb.mxu1 %v4686_v29  ;;  %v4700_v25 = vld [vmem:[#allocation4 + $0xe0] sm:$0xff]  ;;  %v4691_v10 = vld [vmem:[#allocation4 + $0x98] sm:$0xff]  ;;  %v4690_v20 = vld [vmem:[#allocation4 + $0x90] sm:$0xff] }
 0x31c   :  { %3288 = vmatpush.bf16.msrb.mxu0 %v4678_v51  ;;  %3326 = vmatpush.bf16.msrb.mxu2 %v4694_v37  ;;  %v4680_v23 = vld [vmem:[#allocation4 + $0x40] sm:$0xff]  ;;  %v4699_v21 = vld [vmem:[#allocation4 + $0xd8] sm:$0xff]  ;;  %v4698_v43 = vld [vmem:[#allocation4 + $0xd0] sm:$0xff] }
 0x31d   :  { %3345 = vmatpush.bf16.msrb.mxu3 %v4702_v32  ;;  %v4673_v58 = vld [vmem:[#allocation4 + $0x8] sm:$0xff]  ;;  %v4710_v40 = vld [vmem:[#allocation4 + $0x130] sm:$0xff] }
 0x31e   :  { %2587 = vperm.xlu0 %4738, %v4219_v12   ;;  %2499 = vperm.xlu2 %4740, %v2485_v38   ;;  %v4689_v11 = vld [vmem:[#allocation4 + $0x88] sm:$0xff]  ;;  %v2477_v12 = vrot.slane %v5519_v57, 5  ;;  %v4718_v6 = vld [vmem:[#allocation4 + $0x170] sm:$0xff] }
 0x31f   :  { %2592 = vperm.xlu1 %4739, %v4220_v14   ;;  %3308 = vmatpush.bf16.msrb.mxu1 %v4685_v41  ;;  %v4697_v38 = vld [vmem:[#allocation4 + $0xc8] sm:$0xff]  ;;  %v2475_v41 = vrot.slane %v5515_v54, 5 }
 0x320   :  { %3289 = vmatpush.bf16.msrb.mxu0 %v4677_v4  ;;  %3327 = vmatpush.bf16.msrb.mxu2 %v4693_v52  ;;  %v4717_v52 = vld [vmem:[#allocation4 + $0x168] sm:$0xff] }
 0x321   :  { %3346 = vmatpush.bf16.msrb.mxu3 %v4701_v60  ;;  %v2482_v4 = vsel %vm86_vm1, %v2478_v42, %v2475_v41  ;;  %v4725_v60 = vld [vmem:[#allocation4 + $0x1a8] sm:$0xff] }
 0x323   :  { %3309 = vmatpush.bf16.msrb.mxu1 %v4684_v35 }
 0x324   :  { %3290 = vmatpush.bf16.msrb.mxu0 %v4676_v16  ;;  %3328 = vmatpush.bf16.msrb.mxu2 %v4692_v50  ;;  %v2610_v16 = vpack.c.bf16 %v5521_v45, %v5521_v45 }
 0x325   :  { %3347 = vmatpush.bf16.msrb.mxu3 %v4700_v25 }
 0x326   :  { %2504 = vperm.xlu0 %4738, %v2486_v15   ;;  %2548 = vperm.xlu2 %4740, %v4216_v1   ;;  %v4672_v15 = vld [vmem:[#allocation4] sm:$0xff]  ;;  %2614 = vst [vmem:[#allocation2 + $0xb4] sm:$0xf] %v2610_v16 }
 0x327   :  { %2543 = vperm.xlu1 %4739, %v4215_v17   ;;  %3310 = vmatpush.bf16.msrb.mxu1 %v4683_v62  ;;  %v4688_v1 = vld [vmem:[#allocation4 + $0x80] sm:$0xff]  ;;  %v2480_v17 = vsel %vm86_vm1, %v2476_v56, %v2477_v12  ;;  %v4726_v62 = vld [vmem:[#allocation4 + $0x1b0] sm:$0xff] }
 0x328   :  { %3291 = vmatpush.bf16.msrb.mxu0 %v4675_v63  ;;  %3329 = vmatpush.bf16.msrb.mxu2 %v4691_v10  ;;  %v2615_v10 = vrot.slane %v5515_v54, 1 }
 0x329   :  { %3348 = vmatpush.bf16.msrb.mxu3 %v4699_v21 }
 0x32b   :  { %3311 = vmatpush.bf16.msrb.mxu1 %v4682_v18  ;;  %v4709_v18 = vld [vmem:[#allocation4 + $0x128] sm:$0xff] }
 0x32c   :  { %3292 = vmatpush.bf16.msrb.mxu0 %v4674_v61  ;;  %3330 = vmatpush.bf16.msrb.mxu2 %v4690_v20  ;;  %v4708_v61 = vld [vmem:[#allocation4 + $0x120] sm:$0xff] }
 0x32d   :  { %3349 = vmatpush.bf16.msrb.mxu3 %v4698_v43  ;;  %v4716_v20 = vld [vmem:[#allocation4 + $0x160] sm:$0xff] }
 0x32e   :  { %2717 = vperm.xlu0 %4738, %v4229_v44   ;;  %2629 = vperm.xlu2 %4740, %v4221_v46   ;;  %v4696_v44 = vld [vmem:[#allocation4 + $0xc0] sm:$0xff] }
 0x32f   :  { %2722 = vperm.xlu1 %4739, %v4230_v47   ;;  %3312 = vmatpush.bf16.msrb.mxu1 %v4681_v49  ;;  %v4711_v47 = vld [vmem:[#allocation4 + $0x138] sm:$0xff] }
 0x330   :  { %3293 = vmatpush.bf16.msrb.mxu0 %v4673_v58  ;;  %3331 = vmatpush.bf16.msrb.mxu2 %v4689_v11  ;;  %v2481_v11 = vsel %vm86_vm1, %v2475_v41, %v2476_v56 }
 0x331   :  { %3350 = vmatpush.bf16.msrb.mxu3 %v4697_v38  ;;  %v4723_v38 = vld [vmem:[#allocation4 + $0x198] sm:$0xff] }
 0x333   :  { %3313 = vmatpush.bf16.msrb.mxu1 %v4680_v23  ;;  %v2564_v23 = vrot.slane %v5517_v31, 7 }
 0x334   :  { %3294 = vmatpush.bf16.msrb.mxu0 %v4672_v15  ;;  %3332 = vmatpush.bf16.msrb.mxu2 %v4688_v1 }
 0x335   :  { %3351 = vmatpush.bf16.msrb.mxu3 %v4696_v44  ;;  %v4666_v44 = vld [vmem:[#allocation2 + $0x7c] sm:$0xf] }
 0x336   :  { %2634 = vperm.xlu0 %4738, %v4222_v19   ;;  %2678 = vperm.xlu2 %4740, %v4226_v48   ;;  %v4719_v19 = vld [vmem:[#allocation4 + $0x178] sm:$0xff] }
 0x337   :  { %2673 = vperm.xlu1 %4739, %v4225_v55   ;;  %v4727_v48 = vld [vmem:[#allocation4 + $0x1b8] sm:$0xff]  ;;  %3382 = vmatpush.bf16.msra.mxu1 %v4719_v19  ;;  %v2660_v19 = vrot.slane %v5517_v31, 2 }
 0x338   :  { %3363 = vmatpush.bf16.msra.mxu0 %v4711_v47  ;;  %3401 = vmatpush.bf16.msra.mxu2 %v4727_v48  ;;  %v2661_v48 = vrot.slane %v5519_v57, 2 }
 0x33a   :  { %v2664_v41 = vsel %vm557_vm6, %v2660_v19, %v2661_v48 }
 0x33b   :  { %3383 = vmatpush.bf16.msra.mxu1 %v4718_v6 }
 0x33c   :  { %3364 = vmatpush.bf16.msra.mxu0 %v4710_v40  ;;  %3402 = vmatpush.bf16.msra.mxu2 %v4726_v62  ;;  %v4713_v40 = vld [vmem:[#allocation4 + $0x148] sm:$0xff] }
 0x33e   :  { %2727 = vperm.xlu0 %4738, %v4231_v3   ;;  %2639 = vperm.xlu2 %4740, %v4223_v26   ;;  %v4659_v3 = vld [vmem:[#allocation2 + $0xc] sm:$0xf]  ;;  %v4245_v26 = vld [vmem:[#allocation2 + $0x40] sm:$0xf0] }
 0x33f   :  { %2732 = vperm.xlu1 %4739, %v4232_v27   ;;  %v2563_v27 = vrot.slane %v5515_v54, 7  ;;  %v4248_v33 = vor.u32 %v4659_v3, %v4245_v26  ;;  %3384 = vmatpush.bf16.msra.mxu1 %v4717_v52 }
 0x340   :  { %3365 = vmatpush.bf16.msra.mxu0 %v4709_v18  ;;  %3403 = vmatpush.bf16.msra.mxu2 %v4725_v60  ;;  %v2617_v60 = vrot.slane %v5519_v57, 1 }
 0x341   :  { %3352 = vmatmul.bf16.vlgmr.msrb.gmra.mxu3 %v4248_v33  ;;  %v2569_v43 = vsel %vm280_vm4, %v2563_v27, %v2564_v23  ;;  %v4722_v33 = vld [vmem:[#allocation4 + $0x190] sm:$0xff] }
 0x343   :  { %3385 = vmatpush.bf16.msra.mxu1 %v4716_v20 }
 0x344   :  { %3366 = vmatpush.bf16.msra.mxu0 %v4708_v61  ;;  %v2619_v61 = vsel %vm452_vm5, %v2617_v60, %v2618_v39 }
 0x346   :  { %2644 = vperm.xlu0 %4738, %v4224_v28   ;;  %2688 = vperm.xlu2 %4740, %v4228_v59   ;;  %v2566_v28 = vrot.slane %v5521_v45, 7  ;;  %v2521_v59 = vrot.slane %v5519_v57, 6 }
 0x347   :  { %2683 = vperm.xlu1 %4739, %v4227_v30  }
 0x348   :  { %v2570_v37 = vsel %vm280_vm4, %v2566_v28, %v2563_v27  ;;  %v2523_v32 = vsel %vm126_vm3, %v2521_v59, %v2522_v53  ;;  %v4706_v27 = vld [vmem:[#allocation4 + $0x110] sm:$0xff] }
 0x368   :  { %v2534_v24 = vpop.permute.xlu2 %2533 }
 0x369   :  { %v2551_v8 = vmul.f32 %v2534_v24, %v2526_v7  ;;  %v2616_v24 = vrot.slane %v5517_v31, 1 }
 0x36b   :  { %v2555_v13 = vpack.c.bf16 %v2551_v8, %v2551_v8  ;;  %v2621_v58 = vsel %vm452_vm5, %v2615_v10, %v2616_v24 }
 0x36d   :  { %2559 = vst [vmem:[#allocation2 + $0x4] sm:$0xf] %v2555_v13 }
 0x370   :  { %v2539_v9 = vpop.permute.xlu2 %2538 }
 0x371   :  { %v2552_v0 = vmul.f32 %v2539_v9, %v2525_v22  ;;  %v4724_v22 = vld [vmem:[#allocation4 + $0x1a0] sm:$0xff]  ;;  %v4707_v9 = vld [vmem:[#allocation4 + $0x118] sm:$0xff] }
 0x372   :  { %3404 = vmatpush.bf16.msra.mxu2 %v4724_v22  ;;  %3367 = vmatpush.bf16.msra.mxu0 %v4707_v9  ;;  %v2524_v22 = vsel %vm126_vm3, %v2520_v2, %v2521_v59  ;;  %v2704_v9 = vrot.slane %v5517_v31, 3  ;;  %v2705_v2 = vrot.slane %v5519_v57, 3 }
 0x373   :  { %v2556_v14 = vpack.c.bf16 %v2552_v0, %v2552_v0  ;;  %v4715_v0 = vld [vmem:[#allocation4 + $0x158] sm:$0xff] }
 0x374   :  { %v4658_v30 = vld [vmem:[#allocation2 + $0x4] sm:$0xf]  ;;  %3386 = vmatpush.bf16.msra.mxu1 %v4715_v0  ;;  %v2659_v0 = vrot.slane %v5515_v54, 2 }
 0x375   :  { %2560 = vst [vmem:[#allocation2 + $0x3c] sm:$0xf] %v2556_v14 }
 0x376   :  { %3405 = vmatpush.bf16.msra.mxu2 %v4723_v38  ;;  %3368 = vmatpush.bf16.msra.mxu0 %v4706_v27  ;;  %v2662_v38 = vrot.slane %v5521_v45, 2 }
 0x378   :  { %v2500_v46 = vpop.permute.xlu2 %2499 }
 0x379   :  { %v2509_v55 = vmul.f32 %v2500_v46, %v2480_v17  ;;  %v2565_v17 = vrot.slane %v5519_v57, 7  ;;  %v4273_v46 = vld [vmem:[#allocation2 + $0xb0] sm:$0xf0] }
 0x37a   :  { %v4276_v56 = vor.u32 %v4666_v44, %v4273_v46  ;;  %3406 = vmatpush.bf16.msra.mxu2 %v4722_v33  ;;  %v2708_v44 = vsel %vm662_vm7, %v2704_v9, %v2705_v2 }
 0x37b   :  { %v2513_v29 = vpack.c.bf16 %v2509_v55, %v2509_v55  ;;  %v2567_v6 = vsel %vm280_vm4, %v2565_v17, %v2566_v28 }
 0x37c   :  { %v4237_v35 = vld [vmem:[#allocation2 + $0x38] sm:$0xf0]  ;;  %3357 = vmatmul.bf16.gmra.mxu3 %v4276_v56 }
 0x37d   :  { %2517 = vst [vmem:[#allocation2 + $0x70] sm:$0xf] %v2513_v29  ;;  %v4240_v51 = vor.u32 %v4658_v30, %v4237_v35  ;;  %v4714_v30 = vld [vmem:[#allocation4 + $0x150] sm:$0xff]  ;;  %v2568_v29 = vsel %vm280_vm4, %v2564_v23, %v2565_v17  ;;  %v4705_v35 = vld [vmem:[#allocation4 + $0x108] sm:$0xff]  ;;  %v4720_v23 = vld [vmem:[#allocation4 + $0x180] sm:$0xff]  ;;  %v2666_v17 = vsel %vm557_vm6, %v2662_v38, %v2659_v0 }
 0x37e   :  { %3387 = vmatpush.bf16.msra.mxu1 %v4714_v30  ;;  %3369 = vmatpush.bf16.msra.mxu0 %v4705_v35 }
 0x37f   :  { %3314 = vmatmul.bf16.vlgmr.msrb.gmra.mxu1 %v4240_v51  ;;  %v4721_v51 = vld [vmem:[#allocation4 + $0x188] sm:$0xff] }
 0x380   :  { %v2578_v49 = vpop.permute.xlu0 %2577  ;;  %v2549_v53 = vpop.permute.xlu2 %2548  ;;  %3407 = vmatpush.bf16.msra.mxu2 %v4721_v51 }
 0x381   :  { %v2595_v50 = vmul.f32 %v2578_v49, %v2570_v37  ;;  %v2554_v25 = vmul.f32 %v2549_v53, %v2523_v32  ;;  %v2490_v7 = vpop.permute.xlu1 %2489 }
 0x382   :  { %v2507_v63 = vmul.f32 %v2490_v7, %v2482_v4  ;;  %3388 = vmatpush.bf16.msra.mxu1 %v4713_v40  ;;  %v4712_v7 = vld [vmem:[#allocation4 + $0x140] sm:$0xff] }
 0x383   :  { %v2599_v8 = vpack.c.bf16 %v2595_v50, %v2595_v50  ;;  %v2558_v21 = vpack.c.bf16 %v2554_v25, %v2554_v25  ;;  %v4704_v25 = vld [vmem:[#allocation4 + $0x100] sm:$0xff] }
 0x384   :  { %v2511_v13 = vpack.c.bf16 %v2507_v63, %v2507_v63  ;;  %3370 = vmatpush.bf16.msra.mxu0 %v4704_v25  ;;  %3408 = vmatpush.bf16.msra.mxu2 %v4720_v23  ;;  %v4263_v35 = vld [vmem:[#allocation2 + $0x70] sm:$0xf] }
 0x385   :  { %2603 = vst [vmem:[#allocation2 + $0x8] sm:$0xf] %v2599_v8 }
 0x386   :  { %2562 = vst [vmem:[#allocation2 + $0xac] sm:$0xf] %v2558_v21  ;;  %3389 = vmatpush.bf16.msra.mxu1 %v4712_v7 }
 0x387   :  { %2515 = vst [vmem:[#allocation2] sm:$0xf] %v2511_v13  ;;  %v2479_v13 = vsel %vm86_vm1, %v2477_v12, %v2478_v42 }
 0x388   :  { %v2583_v5 = vpop.permute.xlu0 %2582  ;;  %v2630_v34 = vpop.permute.xlu2 %2629 }
 0x389   :  { %v2596_v14 = vmul.f32 %v2583_v5, %v2569_v43  ;;  %v2647_v15 = vmul.f32 %v2630_v34, %v2621_v58  ;;  %v2495_v1 = vpop.permute.xlu1 %2494  ;;  %v2703_v5 = vrot.slane %v5515_v54, 3 }
 0x38a   :  { %v2508_v47 = vmul.f32 %v2495_v1, %v2481_v11 }
 0x38b   :  { %v2600_v55 = vpack.c.bf16 %v2596_v14, %v2596_v14  ;;  %v2651_v3 = vpack.c.bf16 %v2647_v15, %v2647_v15  ;;  %v2709_v1 = vsel %vm662_vm7, %v2703_v5, %v2704_v9 }
 0x38c   :  { %v2512_v26 = vpack.c.bf16 %v2508_v47, %v2508_v47  ;;  %v4243_v53 = vld [vmem:[#allocation2 + $0x8] sm:$0xf] }
 0x38d   :  { %2604 = vst [vmem:[#allocation2 + $0x40] sm:$0xf] %v2600_v55 }
 0x38e   :  { %2655 = vst [vmem:[#allocation2 + $0x10] sm:$0xf] %v2651_v3  ;;  %v4235_v8 = vld [vmem:[#allocation2] sm:$0xf] }
 0x38f   :  { %2516 = vst [vmem:[#allocation2 + $0x38] sm:$0xf] %v2512_v26 }
 0x390   :  { %v2588_v62 = vpop.permute.xlu0 %2587  ;;  %v2679_v37 = vpop.permute.xlu2 %2678 }
 0x391   :  { %v2597_v32 = vmul.f32 %v2588_v62, %v2568_v29  ;;  %v2692_v4 = vmul.f32 %v2679_v37, %v2664_v41  ;;  %v2593_v18 = vpop.permute.xlu1 %2592  ;;  %v4265_v37 = vld [vmem:[#allocation2 + $0xa8] sm:$0xf0] }
 0x392   :  { %v2598_v52 = vmul.f32 %v2593_v18, %v2567_v6  ;;  %v2665_v18 = vsel %vm557_vm6, %v2659_v0, %v2660_v19 }
 0x393   :  { %v2601_v16 = vpack.c.bf16 %v2597_v32, %v2597_v32  ;;  %v2696_v49 = vpack.c.bf16 %v2692_v4, %v2692_v4  ;;  %v2620_v32 = vsel %vm452_vm5, %v2616_v24, %v2617_v60 }
 0x394   :  { %v2602_v50 = vpack.c.bf16 %v2598_v52, %v2598_v52  ;;  %v4662_v28 = vld [vmem:[#allocation2 + $0x3c] sm:$0xf0] }
 0x395   :  { %2605 = vst [vmem:[#allocation2 + $0x78] sm:$0xf] %v2601_v16  ;;  %v4244_v63 = vor.u32 %v4662_v28, %v4243_v53 }
 0x396   :  { %2700 = vst [vmem:[#allocation2 + $0x4c] sm:$0xf] %v2696_v49  ;;  %v4661_v21 = vld [vmem:[#allocation2 + $0x34] sm:$0xf0] }
 0x397   :  { %2606 = vst [vmem:[#allocation2 + $0xb0] sm:$0xf] %v2602_v50  ;;  %v4236_v20 = vor.u32 %v4661_v21, %v4235_v8  ;;  %3333 = vmatmul.bf16.vlgmr.msrb.gmra.mxu2 %v4244_v63  ;;  %v2706_v50 = vrot.slane %v5521_v45, 3 }
 0x398   :  { %v2505_v12 = vpop.permute.xlu0 %2504  ;;  %v2640_v42 = vpop.permute.xlu2 %2639 }
 0x399   :  { %3295 = vmatmul.bf16.vlgmr.msrb.gmra.mxu0 %v4236_v20  ;;  %v2510_v43 = vmul.f32 %v2505_v12, %v2479_v13  ;;  %v2649_v58 = vmul.f32 %v2640_v42, %v2619_v61  ;;  %v2544_v11 = vpop.permute.xlu1 %2543  ;;  %v2707_v24 = vsel %vm662_vm7, %v2705_v2, %v2706_v50  ;;  %v2710_v31 = vsel %vm662_vm7, %v2706_v50, %v2703_v5  ;;  %v4251_v61 = vld [vmem:[#allocation2 + $0x10] sm:$0xf] }
 0x39a   :  { %v2553_v34 = vmul.f32 %v2544_v11, %v2524_v22  ;;  %v2622_v11 = vsel %vm452_vm5, %v2618_v39, %v2615_v10  ;;  %v2663_v5 = vsel %vm557_vm6, %v2661_v48, %v2662_v38 }
 0x39b   :  { %v2514_v14 = vpack.c.bf16 %v2510_v43, %v2510_v43  ;;  %v2653_v15 = vpack.c.bf16 %v2649_v58, %v2649_v58 }
 0x39c   :  { %v2557_v59 = vpack.c.bf16 %v2553_v34, %v2553_v34  ;;  %v4271_v27 = vld [vmem:[#allocation2 + $0x78] sm:$0xf] }
 0x39d   :  { %2518 = vst [vmem:[#allocation2 + $0xa8] sm:$0xf] %v2514_v14  ;;  %v4253_v42 = vld [vmem:[#allocation2 + $0x48] sm:$0xf0] }
 0x39e   :  { %2657 = vst [vmem:[#allocation2 + $0x80] sm:$0xf] %v2653_v15  ;;  %v4669_v30 = vld [vmem:[#allocation2 + $0xac] sm:$0xf0] }
 0x39f   :  { %2561 = vst [vmem:[#allocation2 + $0x74] sm:$0xf] %v2557_v59  ;;  %v4272_v51 = vor.u32 %v4669_v30, %v4271_v27 }
 0x3a0   :  { %v2718_v46 = vpop.permute.xlu0 %2717  ;;  %v2689_v47 = vpop.permute.xlu2 %2688 }
 0x3a1   :  { %v2735_v56 = vmul.f32 %v2718_v46, %v2709_v1  ;;  %v2694_v55 = vmul.f32 %v2689_v47, %v2666_v17  ;;  %v2723_v3 = vpop.permute.xlu1 %2722 }
 0x3a2   :  { %v2736_v26 = vmul.f32 %v2723_v3, %v2708_v44 }
 0x3a3   :  { %v2739_v33 = vpack.c.bf16 %v2735_v56, %v2735_v56  ;;  %v2698_v29 = vpack.c.bf16 %v2694_v55, %v2694_v55 }
 0x3a4   :  { %v2740_v41 = vpack.c.bf16 %v2736_v26, %v2736_v26  ;;  %v4668_v40 = vld [vmem:[#allocation2 + $0xa4] sm:$0xf0] }
 0x3a5   :  { %2743 = vst [vmem:[#allocation2 + $0x18] sm:$0xf] %v2739_v33  ;;  %v4264_v6 = vor.u32 %v4668_v40, %v4263_v35  ;;  %v4279_v39 = vld [vmem:[#allocation2 + $0x80] sm:$0xf] }
 0x3a6   :  { %2702 = vst [vmem:[#allocation2 + $0xbc] sm:$0xf] %v2698_v29  ;;  %v4665_v62 = vld [vmem:[#allocation2 + $0x74] sm:$0xf] }
 0x3a7   :  { %2744 = vst [vmem:[#allocation2 + $0x50] sm:$0xf] %v2740_v41  ;;  %v4268_v4 = vor.u32 %v4665_v62, %v4265_v37  ;;  %3338 = vmatmul.bf16.gmra.mxu2 %v4272_v51  ;;  %v3464_v37 = vld [vmem:[%s5838_s9 + $0x78] sm:$0xff] }
 0x3a8   :  { %v2635_v52 = vpop.permute.xlu0 %2634  ;;  %3469 = vmatpush.msrb.mxu0 %v3464_v37 }
 0x3a9   :  { %3300 = vmatmul.bf16.gmra.mxu0 %v4264_v6  ;;  %3319 = vmatmul.bf16.gmra.mxu1 %v4268_v4  ;;  %v2648_v16 = vmul.f32 %v2635_v52, %v2620_v32  ;;  %v2674_v49 = vpop.permute.xlu1 %2673  ;;  %v3463_v32 = vld [vmem:[%s5838_s9 + $0x70] sm:$0xff]  ;;  %v4741_v4 = vld [vmem:[%s5837_s8] ss:$0 sm:$0xff]  ;;  %v3462_v52 = vld [vmem:[%s5838_s9 + $0x68] sm:$0xff] }
 0x3aa   :  { %v2691_v53 = vmul.f32 %v2674_v49, %v2665_v18  ;;  %3470 = vmatpush.msrb.mxu0 %v3463_v32  ;;  %v3492_v32 = vld [vmem:[%s5840_s11 + $0x10] sm:$0xff] }
 0x3ab   :  { %v2652_v28 = vpack.c.bf16 %v2648_v16, %v2648_v16 }
 0x3ac   :  { %v2695_v25 = vpack.c.bf16 %v2691_v53, %v2691_v53  ;;  %v4259_v23 = vld [vmem:[#allocation2 + $0x18] sm:$0xf]  ;;  %v3461_v53 = vld [vmem:[%s5838_s9 + $0x60] sm:$0xff]  ;;  %3471 = vmatpush.msrb.mxu0 %v3462_v52 }
 0x3ad   :  { %2656 = vst [vmem:[#allocation2 + $0x48] sm:$0xf] %v2652_v28  ;;  %v4281_v57 = vld [vmem:[#allocation2 + $0xb8] sm:$0xf0]  ;;  %v4742_v52 = vld [vmem:[%s5839_s10] ss:$0 sm:$0xff] }
 0x3ae   :  { %2699 = vst [vmem:[#allocation2 + $0x14] sm:$0xf] %v2695_v25  ;;  %v4664_v8 = vld [vmem:[#allocation2 + $0x4c] sm:$0xf0]  ;;  %v3460_v25 = vld [vmem:[%s5838_s9 + $0x58] sm:$0xff]  ;;  %3472 = vmatpush.msrb.mxu0 %v3461_v53 }
 0x3af   :  { %v4260_v43 = vor.u32 %v4664_v8, %v4259_v23 }
 0x3b0   :  { %v2728_v60 = vpop.permute.xlu0 %2727  ;;  %3473 = vmatpush.msrb.mxu0 %v3460_v25 }
 0x3b1   :  { %v2737_v19 = vmul.f32 %v2728_v60, %v2707_v24  ;;  %v2733_v7 = vpop.permute.xlu1 %2732 }
 0x3b2   :  { %v2738_v63 = vmul.f32 %v2733_v7, %v2710_v31  ;;  %v3459_v7 = vld [vmem:[%s5838_s9 + $0x50] sm:$0xff] }
 0x3b3   :  { %v2741_v21 = vpack.c.bf16 %v2737_v19, %v2737_v19  ;;  %3474 = vmatpush.msrb.mxu0 %v3459_v7  ;;  %v4745_v7 = vld [vmem:[#allocation6] ss:$0 sm:$0xff] }
 0x3b4   :  { %v2742_v13 = vpack.c.bf16 %v2738_v63, %v2738_v63  ;;  %v4663_v20 = vld [vmem:[#allocation2 + $0x44] sm:$0xf0] }
 0x3b5   :  { %2745 = vst [vmem:[#allocation2 + $0x88] sm:$0xf] %v2741_v21  ;;  %v4252_v22 = vor.u32 %v4663_v20, %v4251_v61  ;;  %v4660_v12 = vld [vmem:[#allocation2 + $0x14] sm:$0xf]  ;;  %v3458_v21 = vld [vmem:[%s5838_s9 + $0x48] sm:$0xff] }
 0x3b6   :  { %2746 = vst [vmem:[#allocation2 + $0xc0] sm:$0xf] %v2742_v13  ;;  %v4256_v58 = vor.u32 %v4660_v12, %v4253_v42  ;;  %v3457_v42 = vld [vmem:[%s5838_s9 + $0x40] sm:$0xff]  ;;  %3475 = vmatpush.msrb.mxu0 %v3458_v21 }
 0x3b7   :  { %3409 = vmatmul.bf16.vlgmr.msra.gmra.mxu2 %v4260_v43 }
 0x3b8   :  { %v2645_v34 = vpop.permute.xlu0 %2644  ;;  %3476 = vmatpush.msrb.mxu0 %v3457_v42 }
 0x3b9   :  { %3371 = vmatmul.bf16.vlgmr.msra.gmra.mxu0 %v4252_v22  ;;  %3390 = vmatmul.bf16.vlgmr.msra.gmra.mxu1 %v4256_v58  ;;  %v2650_v9 = vmul.f32 %v2645_v34, %v2622_v11  ;;  %v2684_v0 = vpop.permute.xlu1 %2683  ;;  %v3456_v11 = vld [vmem:[%s5838_s9 + $0x38] sm:$0xff] }
 0x3ba   :  { %v2693_v14 = vmul.f32 %v2684_v0, %v2663_v5  ;;  %3477 = vmatpush.msrb.mxu0 %v3456_v11 }
 0x3bb   :  { %v2654_v54 = vpack.c.bf16 %v2650_v9, %v2650_v9 }
 0x3bc   :  { %v2697_v15 = vpack.c.bf16 %v2693_v14, %v2693_v14  ;;  %v4287_v2 = vld [vmem:[#allocation2 + $0x88] sm:$0xf]  ;;  %v3455_v14 = vld [vmem:[%s5838_s9 + $0x30] sm:$0xff] }
 0x3bd   :  { %2658 = vst [vmem:[#allocation2 + $0xb8] sm:$0xf] %v2654_v54  ;;  %v4671_v10 = vld [vmem:[#allocation2 + $0xbc] sm:$0xf0]  ;;  %3478 = vmatpush.msrb.mxu0 %v3455_v14 }
 0x3be   :  { %2701 = vst [vmem:[#allocation2 + $0x84] sm:$0xf] %v2697_v15  ;;  %v4288_v17 = vor.u32 %v4671_v10, %v4287_v2 }
 0x3c4   :  { %v4670_v59 = vld [vmem:[#allocation2 + $0xb4] sm:$0xf0]  ;;  %v3353_v27 = vpop.f32.mrf.mxu3 }
 0x3c5   :  { %v4280_v45 = vor.u32 %v4670_v59, %v4279_v39  ;;  %v4667_v1 = vld [vmem:[#allocation2 + $0x84] sm:$0xf]  ;;  %v3454_v39 = vld [vmem:[%s5838_s9 + $0x28] sm:$0xff] }
 0x3c6   :  { %v4284_v36 = vor.u32 %v4667_v1, %v4281_v57  ;;  %3479 = vmatpush.msrb.mxu0 %v3454_v39 }
 0x3c7   :  { %3414 = vmatmul.bf16.gmra.mxu2 %v4288_v17  ;;  %v3453_v17 = vld [vmem:[%s5838_s9 + $0x20] sm:$0xff] }
 0x3c8   :  { %3480 = vmatpush.msrb.mxu0 %v3453_v17 }
 0x3c9   :  { %3376 = vmatmul.bf16.gmra.mxu0 %v4280_v45  ;;  %3395 = vmatmul.bf16.gmra.mxu1 %v4284_v36 }
 0x3cc   :  { %v3355_v41 = vpop.f32.mrf.mxu3 }
 0x3fc   :  { %v3315_v48 = vpop.f32.mrf.mxu1 }
 0x3ff   :  { %v3358_v18 = vpop.f32.mrf.mxu3 }
 0x404   :  { %v3317_v46 = vpop.f32.mrf.mxu1 }
 0x407   :  { %v3360_v22 = vpop.f32.mrf.mxu3 }
 0x416   :  { %v3296_v38 = vpop.f32.mrf.mxu0 }
 0x417   :  { %v3297_v24 = vadd.f32 %v4741_v4, %v3296_v38 }
 0x419   :  { %v3316_v13 = vadd.f32 %v3315_v48, %v3297_v24  ;;  %v4744_v24 = vld [vmem:[%s5842_s13] ss:$0 sm:$0xff] }
 0x41a   :  { %v3334_v44 = vpop.f32.mrf.mxu2 }
 0x41b   :  { %v3335_v43 = vadd.f32 %v3334_v44, %v3316_v13  ;;  %v3452_v44 = vld [vmem:[%s5838_s9 + $0x18] sm:$0xff] }
 0x41c   :  { %3481 = vmatpush.msrb.mxu0 %v3452_v44 }
 0x41d   :  { %v3354_v54 = vadd.f32 %v3353_v27, %v3335_v43  ;;  %v3450_v27 = vld [vmem:[%s5838_s9 + $0x8] sm:$0xff] }
 0x41e   :  { %v3298_v47 = vpop.f32.mrf.mxu0 }
 0x41f   :  { %v3299_v50 = vadd.f32 %v4741_v4, %v3298_v47 }
 0x421   :  { %v3318_v63 = vadd.f32 %v3317_v46, %v3299_v50  ;;  %v4743_v50 = vld [vmem:[%s5841_s12] ss:$0 sm:$0xff] }
 0x422   :  { %v3336_v56 = vpop.f32.mrf.mxu2 }
 0x423   :  { %v3337_v61 = vadd.f32 %v3336_v56, %v3318_v63 }
 0x425   :  { %v3356_v5 = vadd.f32 %v3355_v41, %v3337_v61  ;;  %v3449_v41 = vld [vmem:[%s5838_s9] sm:$0xff] }
 0x426   :  { %v3301_v55 = vpop.f32.mrf.mxu0  ;;  %v3320_v3 = vpop.f32.mrf.mxu1 }
 0x427   :  { %v3302_v16 = vadd.f32 %v4741_v4, %v3301_v55  ;;  %v3451_v55 = vld [vmem:[%s5838_s9 + $0x10] sm:$0xff] }
 0x428   :  { %3482 = vmatpush.msrb.mxu0 %v3451_v55 }
 0x429   :  { %v3321_v31 = vadd.f32 %v3320_v3, %v3302_v16 }
 0x42a   :  { %v3339_v26 = vpop.f32.mrf.mxu2  ;;  %3483 = vmatpush.msrb.mxu0 %v3450_v27 }
 0x42b   :  { %v3340_v23 = vadd.f32 %v3339_v26, %v3321_v31 }
 0x42c   :  { %3484 = vmatpush.msrb.mxu0 %v3449_v41 }
 0x42d   :  { %v3359_v58 = vadd.f32 %v3358_v18, %v3340_v23  ;;  %v3490_v18 = vld [vmem:[%s5840_s11] sm:$0xff] }
 0x42e   :  { %v3303_v30 = vpop.f32.mrf.mxu0  ;;  %v3322_v33 = vpop.f32.mrf.mxu1 }
 0x42f   :  { %v3304_v28 = vadd.f32 %v4741_v4, %v3303_v30  ;;  %v3491_v4 = vld [vmem:[%s5840_s11 + $0x8] sm:$0xff] }
 0x431   :  { %v3323_v8 = vadd.f32 %v3322_v33, %v3304_v28 }
 0x432   :  { %v3341_v29 = vpop.f32.mrf.mxu2 }
 0x433   :  { %v3342_v20 = vadd.f32 %v3341_v29, %v3323_v8  ;;  %v3424_v29 = vld [vmem:[%s5835_s2] sm:$0x3] }
 0x435   :  { %v3361_v34 = vadd.f32 %v3360_v22, %v3342_v20 }
 0x436   :  { %v3372_v35 = vpop.f32.mrf.mxu0  ;;  %v5734_v40 = vpop.f32.mrf.mxu1 }
 0x437   :  { %v3373_v59 = vadd.f32 %v3372_v35, %v3354_v54  ;;  %v3497_v35 = vld [vmem:[%s5840_s11 + $0x38] sm:$0xff] }
 0x439   :  { %v3392_v46 = vadd.f32 %v5734_v40, %v3373_v59  ;;  %v3496_v40 = vld [vmem:[%s5840_s11 + $0x30] sm:$0xff] }
 0x43a   :  { %v5736_v6 = vpop.f32.mrf.mxu2 }
 0x43b   :  { %v3411_v3 = vadd.f32 %v5736_v6, %v3392_v46  ;;  %v3495_v6 = vld [vmem:[%s5840_s11 + $0x28] sm:$0xff] }
 0x43d   :  { %v3420_v33 = vmax.f32 %v3411_v3, 0.0 }
 0x43e   :  { %v3374_v51 = vpop.f32.mrf.mxu0  ;;  %v3393_v62 = vpop.f32.mrf.mxu1 }
 0x43f   :  { %v3375_v15 = vadd.f32 %v3374_v51, %v3356_v5  ;;  %v3494_v51 = vld [vmem:[%s5840_s11 + $0x20] sm:$0xff] }
 0x441   :  { %v3394_v36 = vadd.f32 %v3393_v62, %v3375_v15  ;;  %v3493_v62 = vld [vmem:[%s5840_s11 + $0x18] sm:$0xff] }
 0x442   :  { %v3412_v49 = vpop.f32.mrf.mxu2 }
 0x443   :  { %v3413_v47 = vadd.f32 %v3412_v49, %v3394_v36 }
 0x445   :  { %v3421_v30 = vmax.f32 %v3413_v47, 0.0 }
 0x446   :  { %v3377_v60 = vpop.f32.mrf.mxu0  ;;  %v3396_v19 = vpop.f32.mrf.mxu1 }
 0x447   :  { %v3378_v9 = vadd.f32 %v3377_v60, %v3359_v58 }
 0x449   :  { %v3397_v45 = vadd.f32 %v3396_v19, %v3378_v9 }
 0x44a   :  { %v3415_v12 = vpop.f32.mrf.mxu2 }
 0x44b   :  { %v3416_v48 = vadd.f32 %v3415_v12, %v3397_v45 }
 0x44d   :  { %v3422_v26 = vmax.f32 %v3416_v48, 0.0 }
 0x44e   :  { %v3379_v0 = vpop.f32.mrf.mxu0  ;;  %v3398_v10 = vpop.f32.mrf.mxu1 }
 0x44f   :  { %v3380_v2 = vadd.f32 %v3379_v0, %v3361_v34 }
 0x451   :  { %v3399_v1 = vadd.f32 %v3398_v10, %v3380_v2 }
 0x452   :  { %v3417_v57 = vpop.f32.mrf.mxu2 }
 0x453   :  { %v3418_v38 = vadd.f32 %v3417_v57, %v3399_v1 }
 0x455   :  { %v3423_v56 = vmax.f32 %v3418_v38, 0.0 }
 0x457   :  { %3441 = vmatpush.msra.mxu3 %v3423_v56 }
 0x459   :  { %3442 = vmatpush.msra.mxu3 %v3422_v26 }
 0x45b   :  { %3443 = vmatpush.msra.mxu3 %v3421_v30 }
 0x45d   :  { %3444 = vmatpush.msra.mxu3 %v3420_v33 }
 0x45e   :  { %4513 = vmatmul.msk.f32.vlgmr.msra.gmra.mxu3 %vm3425_vm8, %v3424_v29 }
 0x45f   :  { %3514 = vmatpush.msrb.mxu3 %v3497_v35 }
 0x461   :  { %3515 = vmatpush.msrb.mxu3 %v3496_v40 }
 0x463   :  { %3516 = vmatpush.msrb.mxu3 %v3495_v6 }
 0x465   :  { %3517 = vmatpush.msrb.mxu3 %v3494_v51 }
 0x467   :  { %3518 = vmatpush.msrb.mxu3 %v3493_v62 }
 0x469   :  { %3519 = vmatpush.msrb.mxu3 %v3492_v32 }
 0x46b   :  { %3520 = vmatpush.msrb.mxu3 %v3491_v4 }
 0x46d   :  { %3521 = vmatpush.msrb.mxu3 %v3490_v18 }
 0x4e1   :  { %v3446_v37 = vpop.f32.mrf.mxu3 }
 0x4e2   :  { %3485 = vmatmul.f32.vlgmr.msrb.gmra.mxu0 %v3446_v37 }
 0x55f   :  { %v3486_v16 = vpop.f32.mrf.mxu0 }
 0x560   :  { %v3487_v49 = vadd.f32 %v4742_v52, %v3486_v16 }
 0x562   :  { %v3489_v53 = vmax.f32 %v3487_v49, 0.0 }
 0x564   :  { %4514 = vmatmul.msk.f32.vlgmr.msrb.gmra.mxu3 %vm3502_vm9, %v3489_v53 }
 0x5e7   :  { %v3523_v28 = vpop.f32.mrf.mxu3 }
 0x5e8   :  { %v3524_v25 = vadd.f32 %v4743_v50, %v3523_v28 }
 0x5ea   :  { %v3526_v31 = vmax.f32 %v3524_v25, 0.0 }
 0x5ec   :  { %v3531_v60 = vmul.f32 %v4744_v24, %v3526_v31 }
 0x5ee   :  { %v3533_v19 = vsel %vm3532_vm10, %v3531_v60, 0.0 }
 0x5ef   :  { %3534 = vadd.xlane.f32.xlu0 %v3533_v19 }
 0x662   :  { %v3535_v63 = vpop.xlane.xlu0 %3534 }
 0x663   :  { %v3540_v23 = vadd.f32 %v4745_v7, %v3535_v63 }
 0x665   :  { %v4515_v8 = vmul.f32 -1.442695, %v3540_v23 }
 0x667   :  { %4746 = vpow2.f32 %v4515_v8 }
 0x66d   :  { %v4747_v21 = vpop.eup %4746 }
 0x66e   :  { %v3544_v13 = vadd.f32 1.0, %v4747_v21 }
 0x670   :  { %4748 = vrcp.f32 %v3544_v13  ;;  %v3556_v12 = vand.u32 2147483648, %v3544_v13  ;;  %v3554_v43 = vand.u32 2147483647, %v3544_v13  ;;  %vm3550_vm12 = vweird.f32 %v3544_v13 }
 0x672   :  { %v3557_v11 = vor.u32 1.1754944e-38, %v3556_v12  ;;  %vm3555_vm15 = vcmp.eq.f32.partialorder %v3554_v43, 8.507059e+37 }
 0x676   :  { %v4749_v61 = vpop.eup %4748 }
 0x677   :  { %v3546_v20 = vmul.f32 %v4749_v61, %v3544_v13  ;;  %vm3551_vm11 = vweird.f32 %v4749_v61 }
 0x678   :  { %vm3552_vm14 = vmor %vm3550_vm12, %vm3551_vm11 }
 0x679   :  { %v3547_v22 = vsub.f32 1.0, %v3546_v20 }
 0x67b   :  { %v3548_v42 = vmul.f32 %v4749_v61, %v3547_v22 }
 0x67d   :  { %v3549_v58 = vadd.f32 %v4749_v61, %v3548_v42 }
 0x67f   :  { %v3553_v5 = vsel %vm3552_vm14, %v4749_v61, %v3549_v58 }
 0x680   :  { %v3558_v34 = vsel %vm3555_vm15, %v3557_v11, %v3553_v5 }
 0x681   :  { %3561 = vst.msk [vmem:[%s5843_s15] sm:$0x3] %vm3560_vm13, %v3558_v34 }
 0x682   :  { %3566 = vsyncmov [#allocation5] }
 0x685   :  { %s3567_s12 = vpop.sfrf %3566 }
 0x686   :  { %p4516_p0 = scmp.ne.s32.totalorder %s3567_s12, 0 }
 0x688   :  { %3571 = shalt.err (%p4516_p0)  }
 0x689   :  { %3573 = vsyncmov [#allocation5 + $0x1] }
 0x68c   :  { %s3574_s13 = vpop.sfrf %3573 }
 0x68d   :  { %p4517_p1 = scmp.ne.s32.totalorder %s3574_s13, 0 }
 0x68f   :  { %3578 = shalt.err (%p4517_p1)  }

</bundles_post_ra>
